<compile_context>
chip_gen: v5e
topology: v5e:2x2
jax: 0.10.0
libtpu: 0.0.40
codegen_flags: <defaults>
</compile_context>

<pallas_src>
import functools

import jax
import jax.numpy as jnp
from jax import lax
from jax.experimental import pallas as pl
from jax.experimental.pallas import tpu as pltpu


def _fpp_kernel(k_nn, n_layers, p1_ref, p2_ref, *refs):
    wb_refs = refs[: 2 * n_layers]
    out_ref = refs[2 * n_layers]

    p1 = p1_ref[...].astype(jnp.float32)          # (Bt, N1, 3 + C1)
    p2 = p2_ref[...].astype(jnp.float32)          # (Bt, N2, 3 + C2)
    Bt, N1, _ = p1.shape
    N2 = p2.shape[1]

    xyz1 = p1[:, :, 0:3]
    feat1 = p1[:, :, 3:]
    xyz2 = p2[:, :, 0:3]
    feat2 = p2[:, :, 3:]

    # ---------------- pairwise Euclidean distances (torch.cdist, p=2) ----------
    a2 = jnp.sum(xyz1 * xyz1, axis=-1, keepdims=True)            # (Bt, N1, 1)
    b2 = jnp.sum(xyz2 * xyz2, axis=-1)[:, None, :]               # (Bt, 1, N2)
    cross = jnp.einsum("bik,bjk->bij", xyz1, xyz2,
                       preferred_element_type=jnp.float32)       # (Bt, N1, N2)
    dist = jnp.sqrt(jnp.maximum(a2 - 2.0 * cross + b2, 0.0))     # (Bt, N1, N2)

    # ---------------- k-NN inverse-distance weights (no gathers) ---------------
    # Build a dense weight matrix W[b, i, j] = normalized 1/(d+eps) if j is one
    # of the k nearest points2 of points1[i], else 0.  Interpolation then is a
    # single MXU matmul W @ features2.
    lane = lax.broadcasted_iota(jnp.int32, (Bt, N1, N2), 2)
    d = dist
    w_mat = jnp.zeros((Bt, N1, N2), dtype=jnp.float32)
    w_sum = jnp.zeros((Bt, N1, 1), dtype=jnp.float32)
    for _ in range(k_nn):
        min_d = jnp.min(d, axis=-1, keepdims=True)                         # (Bt,N1,1)
        idx = jnp.min(jnp.where(d == min_d, lane, N2), axis=-1, keepdims=True)
        onehot = lane == idx                                               # (Bt,N1,N2)
        w = 1.0 / (min_d + 1e-8)
        w_mat = w_mat + jnp.where(onehot, w, 0.0)
        w_sum = w_sum + w
        d = jnp.where(onehot, jnp.inf, d)                                  # exclude
    w_mat = w_mat / w_sum

    interp = jnp.einsum("bij,bjc->bic", w_mat, feat2,
                        preferred_element_type=jnp.float32)      # (Bt, N1, C2)

    # ---------------- shared-MLP PointNet (1x1 conv == per-point matmul) -------
    if feat1.shape[-1] > 0:
        h = jnp.concatenate([feat1, interp], axis=-1)            # (Bt, N1, C1+C2)
    else:
        h = interp
    h = h.reshape(Bt * N1, h.shape[-1])                          # fold batch into M
    for l in range(n_layers):
        w = wb_refs[2 * l][...].astype(jnp.bfloat16)
        b = wb_refs[2 * l + 1][...].astype(jnp.float32)
        h = jnp.dot(h.astype(jnp.bfloat16), w,
                    preferred_element_type=jnp.float32) + b
        h = jnp.maximum(h, 0.0)
    c_out = h.shape[-1]
    h = h.reshape(Bt, N1, c_out)

    # ---------------- single lane-dense (128-padded) output store --------------
    pad = out_ref.shape[-1] - (3 + c_out)
    pieces = [xyz1, h]
    if pad > 0:
        pieces.append(jnp.zeros((Bt, N1, pad), dtype=jnp.float32))
    out_ref[...] = jnp.concatenate(pieces, axis=-1).astype(out_ref.dtype)


def point_feature_propagation(points1, points2, weights, biases, *, k=3,
                              block_b=None):
    """points1: (B, N1, 3+C1), points2: (B, N2, 3+C2), weights[i]: (Cin, Cout),
    biases[i]: (1, Cout).  Returns (B, N1, 3 + Cout_last)."""
    B, N1, D1 = points1.shape
    B2, N2, D2 = points2.shape
    assert B == B2
    n_layers = len(weights)
    c_out = weights[-1].shape[1]
    out_dim = 3 + c_out
    out_pad = ((out_dim + 127) // 128) * 128

    # Block several batch elements per grid step so the MLP matmuls see
    # M = block_b * N1 (target ~256 rows to fill the 256-wide v6e/v7x MXU).
    if block_b is None:
        block_b = max(1, min(B, max(1, 256 // max(N1, 1))))
        while B % block_b != 0:
            block_b -= 1

    in_specs = [
        pl.BlockSpec((block_b, N1, D1), lambda b: (b, 0, 0)),
        pl.BlockSpec((block_b, N2, D2), lambda b: (b, 0, 0)),
    ]
    params = []
    for w, bias in zip(weights, biases):
        in_specs.append(pl.BlockSpec(w.shape, lambda b: (0, 0)))
        in_specs.append(pl.BlockSpec(bias.shape, lambda b: (0, 0)))
        params += [w, bias]

    kernel = functools.partial(_fpp_kernel, k, n_layers)
    out_padded = pl.pallas_call(
        kernel,
        out_shape=jax.ShapeDtypeStruct((B, N1, out_pad), points1.dtype),
        grid_spec=pltpu.PrefetchScalarGridSpec(
            num_scalar_prefetch=0,
            grid=(B // block_b,),
            in_specs=in_specs,
            out_specs=pl.BlockSpec((block_b, N1, out_pad), lambda b: (b, 0, 0)),
        ),
        compiler_params=pltpu.CompilerParams(
            dimension_semantics=("parallel",),   # batch axis is independent
        ),
    )(points1, points2, *params)
    return out_padded[:, :, :out_dim]


def _reference(points1, points2, weights, biases, *, k=3):
    """Pure-JAX reference mirroring the kernel's bf16 MLP casting."""
    B = points1.shape[0]
    xyz1, feat1 = points1[:, :, :3], points1[:, :, 3:]
    xyz2, feat2 = points2[:, :, :3], points2[:, :, 3:]
    d2 = (jnp.sum(xyz1 * xyz1, -1)[:, :, None]
          - 2.0 * jnp.einsum("bik,bjk->bij", xyz1, xyz2)
          + jnp.sum(xyz2 * xyz2, -1)[:, None, :])
    dist = jnp.sqrt(jnp.maximum(d2, 0.0))
    neg_vals, idx = lax.top_k(-dist, k)
    vals = -neg_vals
    w = 1.0 / (vals + 1e-8)
    w = w / jnp.sum(w, axis=-1, keepdims=True)
    bidx = jnp.arange(B)[:, None, None]
    gathered = feat2[bidx, idx, :]                         # (B, N1, k, C2)
    interp = jnp.sum(w[..., None] * gathered, axis=2)      # (B, N1, C2)
    h = jnp.concatenate([feat1, interp], axis=-1)
    M = h.shape[0] * h.shape[1]
    h2 = h.reshape(M, h.shape[-1])
    for wgt, b in zip(weights, biases):
        h2 = jnp.dot(h2.astype(jnp.bfloat16), wgt.astype(jnp.bfloat16),
                     preferred_element_type=jnp.float32) + b
        h2 = jnp.maximum(h2, 0.0)
    h2 = h2.reshape(points1.shape[0], points1.shape[1], -1)
    return jnp.concatenate([xyz1, h2], axis=-1)


if __name__ == "__main__":
    key = jax.random.PRNGKey(0)

    # small shapes consistent with the module
    B, N1, N2 = 2, 64, 16        # dense layer has more points than sparse layer
    C1, C2 = 3, 6                # extra feature channels of points1 / points2
    layers = [32, 64]            # PointNet MLP widths
    in_channel = C1 + C2         # PointNet input channels (features1 + interp)

    k1, k2, kw = jax.random.split(key, 3)
    xyz1 = jax.random.uniform(k1, (B, N1, 3), dtype=jnp.float32)
    f1 = 0.1 * jax.random.normal(jax.random.fold_in(k1, 1), (B, N1, C1),
                                 dtype=jnp.float32)
    points1 = jnp.concatenate([xyz1, f1], axis=-1)

    xyz2 = jax.random.uniform(k2, (B, N2, 3), dtype=jnp.float32)
    f2 = 0.1 * jax.random.normal(jax.random.fold_in(k2, 1), (B, N2, C2),
                                 dtype=jnp.float32)
    points2 = jnp.concatenate([xyz2, f2], axis=-1)

    # deterministic parameter init (shared-MLP weights / biases)
    weights, biases = [], []
    c_in = in_channel
    for i, c in enumerate(layers):
        kwi = jax.random.fold_in(kw, 2 * i)
        kbi = jax.random.fold_in(kw, 2 * i + 1)
        weights.append(jax.random.normal(kwi, (c_in, c), dtype=jnp.float32)
                       / jnp.sqrt(c_in))
        biases.append(0.01 * jax.random.normal(kbi, (1, c), dtype=jnp.float32))
        c_in = c

    out = point_feature_propagation(points1, points2, weights, biases, k=3)
    out = jax.block_until_ready(out)

    assert out.shape == (B, N1, 3 + layers[-1]), out.shape
    assert bool(jnp.all(jnp.isfinite(out)))

    ref = _reference(points1, points2, weights, biases, k=3)
    err = float(jnp.max(jnp.abs(out - ref)))
    assert jnp.allclose(out, ref, rtol=2e-2, atol=2e-2), err

    print("KERNEL_OK")
</pallas_src>

<mosaic_0001>
module attributes {stable_mosaic.version = 11 : i64} {
  func.func @_fpp_kernel(%arg0: i32, %arg1: memref<2x64x6xf32, #tpu.memory_space<vmem>>, %arg2: memref<2x16x9xf32, #tpu.memory_space<vmem>>, %arg3: memref<9x32xf32, #tpu.memory_space<vmem>>, %arg4: memref<1x32xf32, #tpu.memory_space<vmem>>, %arg5: memref<32x64xf32, #tpu.memory_space<vmem>>, %arg6: memref<1x64xf32, #tpu.memory_space<vmem>>, %arg7: memref<2x64x128xf32, #tpu.memory_space<vmem>>) attributes {dimension_semantics = [#tpu.dimension_semantics<parallel>], iteration_bounds = array<i64: 1>, scalar_prefetch = 0 : i64, scratch_operands = 0 : i64, tpu.core_type = #tpu.core_type<tc>, window_params = [{transform_indices = @transform_0, window_bounds = array<i64: 2, 64, 6>}, {transform_indices = @transform_1, window_bounds = array<i64: 2, 16, 9>}, {pipeline_mode = #tpu.pipeline_mode<synchronous>, transform_indices = @transform_2, window_bounds = array<i64: 9, 32>}, {pipeline_mode = #tpu.pipeline_mode<synchronous>, transform_indices = @transform_3, window_bounds = array<i64: 1, 32>}, {pipeline_mode = #tpu.pipeline_mode<synchronous>, transform_indices = @transform_4, window_bounds = array<i64: 32, 64>}, {pipeline_mode = #tpu.pipeline_mode<synchronous>, transform_indices = @transform_5, window_bounds = array<i64: 1, 64>}, {transform_indices = @transform_6, window_bounds = array<i64: 2, 64, 128>}]} {
    %c0 = arith.constant 0 : index
    %c0_0 = arith.constant 0 : index
    %c0_1 = arith.constant 0 : index
    %0 = vector.load %arg1[%c0, %c0_0, %c0_1] : memref<2x64x6xf32, #tpu.memory_space<vmem>>, vector<2x64x6xf32>
    %c0_2 = arith.constant 0 : index
    %c0_3 = arith.constant 0 : index
    %c0_4 = arith.constant 0 : index
    %1 = vector.load %arg2[%c0_2, %c0_3, %c0_4] : memref<2x16x9xf32, #tpu.memory_space<vmem>>, vector<2x16x9xf32>
    %2 = vector.extract_strided_slice %0 {offsets = [0, 0, 0], sizes = [2, 64, 3], strides = [1, 1, 1]} : vector<2x64x6xf32> to vector<2x64x3xf32>
    %3 = vector.extract_strided_slice %0 {offsets = [0, 0, 3], sizes = [2, 64, 3], strides = [1, 1, 1]} : vector<2x64x6xf32> to vector<2x64x3xf32>
    %4 = vector.extract_strided_slice %1 {offsets = [0, 0, 0], sizes = [2, 16, 3], strides = [1, 1, 1]} : vector<2x16x9xf32> to vector<2x16x3xf32>
    %5 = vector.extract_strided_slice %1 {offsets = [0, 0, 3], sizes = [2, 16, 6], strides = [1, 1, 1]} : vector<2x16x9xf32> to vector<2x16x6xf32>
    %6 = arith.mulf %2, %2 : vector<2x64x3xf32>
    %cst = arith.constant dense<0.000000e+00> : vector<2x64xf32>
    %7 = vector.multi_reduction <add>, %6, %cst [2] : vector<2x64x3xf32> to vector<2x64xf32>
    %8 = vector.shape_cast %7 : vector<2x64xf32> to vector<2x64x1xf32>
    %9 = arith.mulf %4, %4 : vector<2x16x3xf32>
    %cst_5 = arith.constant dense<0.000000e+00> : vector<2x16xf32>
    %10 = vector.multi_reduction <add>, %9, %cst_5 [2] : vector<2x16x3xf32> to vector<2x16xf32>
    %11 = vector.shape_cast %10 : vector<2x16xf32> to vector<2x1x16xf32>
    "tpu.trace_start"() <{level = 10 : i32, message = "bik,bjk->bij"}> : () -> ()
    %cst_6 = arith.constant dense<0.000000e+00> : vector<2x64x16xf32>
    %12 = tpu.matmul %2, %4, %cst_6 {dimension_numbers = #tpu.dot_dimension_numbers<[2], [2], [1], [1], [0, 0, 0, 1, 1, 1], [0], [0]>} : vector<2x64x3xf32>, vector<2x16x3xf32>, vector<2x64x16xf32> -> vector<2x64x16xf32>
    "tpu.trace_stop"() : () -> ()
    %cst_7 = arith.constant 2.000000e+00 : f32
    %13 = vector.broadcast %cst_7 : f32 to vector<2x64x16xf32>
    %14 = arith.mulf %13, %12 : vector<2x64x16xf32>
    %15 = vector.broadcast %8 : vector<2x64x1xf32> to vector<2x64x16xf32>
    %16 = arith.subf %15, %14 : vector<2x64x16xf32>
    %17 = vector.broadcast %11 : vector<2x1x16xf32> to vector<2x64x16xf32>
    %18 = arith.addf %16, %17 : vector<2x64x16xf32>
    %cst_8 = arith.constant 0.000000e+00 : f32
    %19 = vector.broadcast %cst_8 : f32 to vector<2x64x16xf32>
    %20 = arith.maximumf %18, %19 : vector<2x64x16xf32>
    %21 = math.sqrt %20 : vector<2x64x16xf32>
    %22 = tpu.iota {dimensions = array<i32: 2>} : vector<2x64x16xi32>
    %cst_9 = arith.constant 0.000000e+00 : f32
    %23 = vector.broadcast %cst_9 : f32 to vector<2x64x16xf32>
    %cst_10 = arith.constant 0.000000e+00 : f32
    %24 = vector.broadcast %cst_10 : f32 to vector<2x64x1xf32>
    %cst_11 = arith.constant dense<0x7F800000> : vector<2x64xf32>
    %25 = vector.multi_reduction <minimumf>, %21, %cst_11 [2] : vector<2x64x16xf32> to vector<2x64xf32>
    %26 = vector.shape_cast %25 : vector<2x64xf32> to vector<2x64x1xf32>
    %27 = vector.broadcast %26 : vector<2x64x1xf32> to vector<2x64x16xf32>
    %28 = arith.cmpf oeq, %21, %27 : vector<2x64x16xf32>
    %c16_i32 = arith.constant 16 : i32
    %29 = vector.broadcast %c16_i32 : i32 to vector<2x64x16xi32>
    %30 = arith.select %28, %22, %29 : vector<2x64x16xi1>, vector<2x64x16xi32>
    %cst_12 = arith.constant dense<2147483647> : vector<2x64xi32>
    %31 = vector.multi_reduction <minsi>, %30, %cst_12 [2] : vector<2x64x16xi32> to vector<2x64xi32>
    %32 = vector.shape_cast %31 : vector<2x64xi32> to vector<2x64x1xi32>
    %33 = vector.broadcast %32 : vector<2x64x1xi32> to vector<2x64x16xi32>
    %34 = arith.cmpi eq, %22, %33 : vector<2x64x16xi32>
    %cst_13 = arith.constant 9.99999993E-9 : f32
    %35 = vector.broadcast %cst_13 : f32 to vector<2x64x1xf32>
    %36 = arith.addf %26, %35 : vector<2x64x1xf32>
    %cst_14 = arith.constant 1.000000e+00 : f32
    %37 = vector.broadcast %cst_14 : f32 to vector<2x64x1xf32>
    %38 = arith.divf %37, %36 : vector<2x64x1xf32>
    %cst_15 = arith.constant 0.000000e+00 : f32
    %39 = vector.shape_cast %38 : vector<2x64x1xf32> to vector<2x64x1xf32>
    %40 = vector.broadcast %39 : vector<2x64x1xf32> to vector<2x64x16xf32>
    %41 = vector.broadcast %cst_15 : f32 to vector<2x64x16xf32>
    %42 = arith.select %34, %40, %41 : vector<2x64x16xi1>, vector<2x64x16xf32>
    %43 = arith.addf %23, %42 : vector<2x64x16xf32>
    %44 = arith.addf %24, %38 : vector<2x64x1xf32>
    %cst_16 = arith.constant 0x7F800000 : f32
    %45 = vector.broadcast %cst_16 : f32 to vector<2x64x16xf32>
    %46 = arith.select %34, %45, %21 : vector<2x64x16xi1>, vector<2x64x16xf32>
    %cst_17 = arith.constant dense<0x7F800000> : vector<2x64xf32>
    %47 = vector.multi_reduction <minimumf>, %46, %cst_17 [2] : vector<2x64x16xf32> to vector<2x64xf32>
    %48 = vector.shape_cast %47 : vector<2x64xf32> to vector<2x64x1xf32>
    %49 = vector.broadcast %48 : vector<2x64x1xf32> to vector<2x64x16xf32>
    %50 = arith.cmpf oeq, %46, %49 : vector<2x64x16xf32>
    %c16_i32_18 = arith.constant 16 : i32
    %51 = vector.broadcast %c16_i32_18 : i32 to vector<2x64x16xi32>
    %52 = arith.select %50, %22, %51 : vector<2x64x16xi1>, vector<2x64x16xi32>
    %cst_19 = arith.constant dense<2147483647> : vector<2x64xi32>
    %53 = vector.multi_reduction <minsi>, %52, %cst_19 [2] : vector<2x64x16xi32> to vector<2x64xi32>
    %54 = vector.shape_cast %53 : vector<2x64xi32> to vector<2x64x1xi32>
    %55 = vector.broadcast %54 : vector<2x64x1xi32> to vector<2x64x16xi32>
    %56 = arith.cmpi eq, %22, %55 : vector<2x64x16xi32>
    %cst_20 = arith.constant 9.99999993E-9 : f32
    %57 = vector.broadcast %cst_20 : f32 to vector<2x64x1xf32>
    %58 = arith.addf %48, %57 : vector<2x64x1xf32>
    %cst_21 = arith.constant 1.000000e+00 : f32
    %59 = vector.broadcast %cst_21 : f32 to vector<2x64x1xf32>
    %60 = arith.divf %59, %58 : vector<2x64x1xf32>
    %cst_22 = arith.constant 0.000000e+00 : f32
    %61 = vector.shape_cast %60 : vector<2x64x1xf32> to vector<2x64x1xf32>
    %62 = vector.broadcast %61 : vector<2x64x1xf32> to vector<2x64x16xf32>
    %63 = vector.broadcast %cst_22 : f32 to vector<2x64x16xf32>
    %64 = arith.select %56, %62, %63 : vector<2x64x16xi1>, vector<2x64x16xf32>
    %65 = arith.addf %43, %64 : vector<2x64x16xf32>
    %66 = arith.addf %44, %60 : vector<2x64x1xf32>
    %cst_23 = arith.constant 0x7F800000 : f32
    %67 = vector.broadcast %cst_23 : f32 to vector<2x64x16xf32>
    %68 = arith.select %56, %67, %46 : vector<2x64x16xi1>, vector<2x64x16xf32>
    %cst_24 = arith.constant dense<0x7F800000> : vector<2x64xf32>
    %69 = vector.multi_reduction <minimumf>, %68, %cst_24 [2] : vector<2x64x16xf32> to vector<2x64xf32>
    %70 = vector.shape_cast %69 : vector<2x64xf32> to vector<2x64x1xf32>
    %71 = vector.broadcast %70 : vector<2x64x1xf32> to vector<2x64x16xf32>
    %72 = arith.cmpf oeq, %68, %71 : vector<2x64x16xf32>
    %c16_i32_25 = arith.constant 16 : i32
    %73 = vector.broadcast %c16_i32_25 : i32 to vector<2x64x16xi32>
    %74 = arith.select %72, %22, %73 : vector<2x64x16xi1>, vector<2x64x16xi32>
    %cst_26 = arith.constant dense<2147483647> : vector<2x64xi32>
    %75 = vector.multi_reduction <minsi>, %74, %cst_26 [2] : vector<2x64x16xi32> to vector<2x64xi32>
    %76 = vector.shape_cast %75 : vector<2x64xi32> to vector<2x64x1xi32>
    %77 = vector.broadcast %76 : vector<2x64x1xi32> to vector<2x64x16xi32>
    %78 = arith.cmpi eq, %22, %77 : vector<2x64x16xi32>
    %cst_27 = arith.constant 9.99999993E-9 : f32
    %79 = vector.broadcast %cst_27 : f32 to vector<2x64x1xf32>
    %80 = arith.addf %70, %79 : vector<2x64x1xf32>
    %cst_28 = arith.constant 1.000000e+00 : f32
    %81 = vector.broadcast %cst_28 : f32 to vector<2x64x1xf32>
    %82 = arith.divf %81, %80 : vector<2x64x1xf32>
    %cst_29 = arith.constant 0.000000e+00 : f32
    %83 = vector.shape_cast %82 : vector<2x64x1xf32> to vector<2x64x1xf32>
    %84 = vector.broadcast %83 : vector<2x64x1xf32> to vector<2x64x16xf32>
    %85 = vector.broadcast %cst_29 : f32 to vector<2x64x16xf32>
    %86 = arith.select %78, %84, %85 : vector<2x64x16xi1>, vector<2x64x16xf32>
    %87 = arith.addf %65, %86 : vector<2x64x16xf32>
    %88 = arith.addf %66, %82 : vector<2x64x1xf32>
    %89 = vector.broadcast %88 : vector<2x64x1xf32> to vector<2x64x16xf32>
    %90 = arith.divf %87, %89 : vector<2x64x16xf32>
    "tpu.trace_start"() <{level = 10 : i32, message = "bij,bjc->bic"}> : () -> ()
    %cst_30 = arith.constant dense<0.000000e+00> : vector<2x64x6xf32>
    %91 = tpu.matmul %90, %5, %cst_30 {dimension_numbers = #tpu.dot_dimension_numbers<[2], [1], [1], [2], [0, 0, 0, 1, 1, 2], [0], [0]>} : vector<2x64x16xf32>, vector<2x16x6xf32>, vector<2x64x6xf32> -> vector<2x64x6xf32>
    "tpu.trace_stop"() : () -> ()
    %92 = tpu.concatenate %3, %91 in 2 : vector<2x64x3xf32>, vector<2x64x6xf32> -> vector<2x64x9xf32>
    %93 = vector.shape_cast %92 : vector<2x64x9xf32> to vector<128x9xf32>
    %c0_31 = arith.constant 0 : index
    %c0_32 = arith.constant 0 : index
    %94 = vector.load %arg3[%c0_31, %c0_32] : memref<9x32xf32, #tpu.memory_space<vmem>>, vector<9x32xf32>
    %95 = arith.truncf %94 : vector<9x32xf32> to vector<9x32xbf16>
    %c0_33 = arith.constant 0 : index
    %c0_34 = arith.constant 0 : index
    %96 = vector.load %arg4[%c0_33, %c0_34] : memref<1x32xf32, #tpu.memory_space<vmem>>, vector<1x32xf32>
    %97 = arith.truncf %93 : vector<128x9xf32> to vector<128x9xbf16>
    %cst_35 = arith.constant dense<0.000000e+00> : vector<128x32xf32>
    %98 = tpu.matmul %97, %95, %cst_35 {dimension_numbers = #tpu.dot_dimension_numbers<[1], [0], [0], [1], [0, 0, 1, 1], [], []>} : vector<128x9xbf16>, vector<9x32xbf16>, vector<128x32xf32> -> vector<128x32xf32>
    %99 = vector.broadcast %96 : vector<1x32xf32> to vector<128x32xf32>
    %100 = arith.addf %98, %99 : vector<128x32xf32>
    %cst_36 = arith.constant 0.000000e+00 : f32
    %101 = vector.broadcast %cst_36 : f32 to vector<128x32xf32>
    %102 = arith.maximumf %100, %101 : vector<128x32xf32>
    %c0_37 = arith.constant 0 : index
    %c0_38 = arith.constant 0 : index
    %103 = vector.load %arg5[%c0_37, %c0_38] : memref<32x64xf32, #tpu.memory_space<vmem>>, vector<32x64xf32>
    %104 = arith.truncf %103 : vector<32x64xf32> to vector<32x64xbf16>
    %c0_39 = arith.constant 0 : index
    %c0_40 = arith.constant 0 : index
    %105 = vector.load %arg6[%c0_39, %c0_40] : memref<1x64xf32, #tpu.memory_space<vmem>>, vector<1x64xf32>
    %106 = arith.truncf %102 : vector<128x32xf32> to vector<128x32xbf16>
    %cst_41 = arith.constant dense<0.000000e+00> : vector<128x64xf32>
    %107 = tpu.matmul %106, %104, %cst_41 {dimension_numbers = #tpu.dot_dimension_numbers<[1], [0], [0], [1], [0, 0, 1, 1], [], []>} : vector<128x32xbf16>, vector<32x64xbf16>, vector<128x64xf32> -> vector<128x64xf32>
    %108 = vector.broadcast %105 : vector<1x64xf32> to vector<128x64xf32>
    %109 = arith.addf %107, %108 : vector<128x64xf32>
    %cst_42 = arith.constant 0.000000e+00 : f32
    %110 = vector.broadcast %cst_42 : f32 to vector<128x64xf32>
    %111 = arith.maximumf %109, %110 : vector<128x64xf32>
    %112 = vector.shape_cast %111 : vector<128x64xf32> to vector<2x64x64xf32>
    %cst_43 = arith.constant 0.000000e+00 : f32
    %113 = vector.broadcast %cst_43 : f32 to vector<2x64x61xf32>
    %114 = tpu.concatenate %2, %112, %113 in 2 : vector<2x64x3xf32>, vector<2x64x64xf32>, vector<2x64x61xf32> -> vector<2x64x128xf32>
    %c0_44 = arith.constant 0 : index
    %c0_45 = arith.constant 0 : index
    %c0_46 = arith.constant 0 : index
    %115 = vector.load %arg7[%c0_44, %c0_45, %c0_46] : memref<2x64x128xf32, #tpu.memory_space<vmem>>, vector<2x64x128xf32>
    tpu.vector_store %arg7[%c0_44, %c0_45, %c0_46], %114 {strides = array<i32>} : memref<2x64x128xf32, #tpu.memory_space<vmem>>, vector<2x64x128xf32>,
    return
  }
  func.func @transform_0(%arg0: i32) -> (i32, i32, i32) {
    %c0_i32 = arith.constant 0 : i32
    %c0_i32_0 = arith.constant 0 : i32
    %c0_i32_1 = arith.constant 0 : i32
    return %arg0, %c0_i32, %c0_i32_0 : i32, i32, i32
  }
  func.func @transform_1(%arg0: i32) -> (i32, i32, i32) {
    %c0_i32 = arith.constant 0 : i32
    %c0_i32_0 = arith.constant 0 : i32
    %c0_i32_1 = arith.constant 0 : i32
    return %arg0, %c0_i32, %c0_i32_0 : i32, i32, i32
  }
  func.func @transform_2(%arg0: i32) -> (i32, i32) {
    %c0_i32 = arith.constant 0 : i32
    %c0_i32_0 = arith.constant 0 : i32
    %c0_i32_1 = arith.constant 0 : i32
    return %c0_i32, %c0_i32_0 : i32, i32
  }
  func.func @transform_3(%arg0: i32) -> (i32, i32) {
    %c0_i32 = arith.constant 0 : i32
    %c0_i32_0 = arith.constant 0 : i32
    %c0_i32_1 = arith.constant 0 : i32
    return %c0_i32, %c0_i32_0 : i32, i32
  }
  func.func @transform_4(%arg0: i32) -> (i32, i32) {
    %c0_i32 = arith.constant 0 : i32
    %c0_i32_0 = arith.constant 0 : i32
    %c0_i32_1 = arith.constant 0 : i32
    return %c0_i32, %c0_i32_0 : i32, i32
  }
  func.func @transform_5(%arg0: i32) -> (i32, i32) {
    %c0_i32 = arith.constant 0 : i32
    %c0_i32_0 = arith.constant 0 : i32
    %c0_i32_1 = arith.constant 0 : i32
    return %c0_i32, %c0_i32_0 : i32, i32
  }
  func.func @transform_6(%arg0: i32) -> (i32, i32, i32) {
    %c0_i32 = arith.constant 0 : i32
    %c0_i32_0 = arith.constant 0 : i32
    %c0_i32_1 = arith.constant 0 : i32
    return %arg0, %c0_i32, %c0_i32_0 : i32, i32, i32
  }
}

</mosaic_0001>

<bundles_post_ra>
// kernel: tpu_custom_call.1
= control target key start
LH: loop header
LB: loop body
LE: loop exit
PB: predicated region body
PF: predicated region fallthrough
CT: control target
= control target key end

     0   :  { %vm7139_vm0 = vcmask 23552   ;;  %s7121_s0 = inlined_call_operand.vmem [shape: f32[2,64,6], index: 0, kind: input, shape index: {}]   ;;  %s7122_s1 = inlined_call_operand.vmem [shape: f32[2,16,9], index: 1, kind: input, shape index: {}]   ;;  %s7123_s2 = inlined_call_operand.vmem [shape: f32[9,32], index: 2, kind: input, shape index: {}]   ;;  %s7124_s3 = inlined_call_operand.vmem [shape: f32[1,32], index: 3, kind: input, shape index: {}]   ;;  %s7125_s4 = inlined_call_operand.vmem [shape: f32[32,64], index: 4, kind: input, shape index: {}]   ;;  %s7126_s5 = inlined_call_operand.vmem [shape: f32[1,64], index: 5, kind: input, shape index: {}]   ;;  %s7127_s6 = inlined_call_operand.hbm [shape: f32[2,64,128], index: 6, kind: output, shape index: {}]  }
   0x1   :  { %v42_v0 = vld [vmem:[%s7122_s1 + $0x8] sm:$0xff]  ;;  %v41_v1 = vld [vmem:[%s7122_s1] sm:$0xff]  ;;  %v27_v5 = vld [vmem:[%s7121_s0 + $0x10] sm:$0xff] }
   0x2   :  { %v25_v2 = vld [vmem:[%s7121_s0] sm:$0xff]  ;;  %3372 = vmatpush.xpose.msk.msra.mxu0 %vm7139_vm0, %v42_v0  ;;  %v110_v3 = vmul.f32 %v41_v1, %v41_v1  ;;  %v47_v6 = vmul.f32 %v27_v5, %v27_v5 }
   0x3   :  { %v45_v4 = vmul.f32 %v25_v2, %v25_v2 }
   0x4   :  { %v114_v7 = vsel %vm7139_vm0, %v110_v3, 0.0 }
   0x5   :  { %v62_v8 = vsel %vm7139_vm0, %v45_v4, 0.0 }
   0x6   :  { %11 = vsyncpa [#allocation3], 0  ;;  %115 = vadd.xlane.f32.xlu0 %v114_v7  ;;  %v26_v9 = vld [vmem:[%s7121_s0 + $0x8] sm:$0xff]  ;;  %63 = vadd.xlane.f32.xlu1 %v62_v8  ;;  %v68_v10 = vsel %vm7139_vm0, %v47_v6, 0.0  ;;  %v111_v11 = vmul.f32 %v42_v0, %v42_v0  ;;  %v28_v13 = vld [vmem:[%s7121_s0 + $0x18] sm:$0xff]  ;;  %v304_v44 = vlaneseq  ;;  %vm309_vm1 = vcmask 130112  }
   0x7   :  { %3373 = vmatpush.xpose.msk.msra.mxu0 %vm7139_vm0, %v41_v1  ;;  %v46_v12 = vmul.f32 %v26_v9, %v26_v9  ;;  %69 = vadd.xlane.f32.xlu2 %v68_v10  ;;  %v3794_v14 = vld [vmem:[%s7122_s1 + $0x18] sm:$0xff]  ;;  %v48_v15 = vmul.f32 %v28_v13, %v28_v13  ;;  %v3799_v16 = vld [vmem:[%s7122_s1 + $0x10] sm:$0xff]  ;;  %v29_v21 = vld [vmem:[%s7121_s0 + $0x20] sm:$0xff]  ;;  %vm558_vm2 = vcmask 130048   ;;  %s3726_s17 = smov 125   ;;  %s3727_s25 = smov 3  }
   0x8   :  { %7208 = vst [vmem:[#allocation5_spill] sm:$0xff] %v3794_v14  ;;  %v117_v17 = vsel %vm7139_vm0, %v111_v11, 0.0  ;;  %3382 = vmatpush.xpose.msk.msra.mxu1 %vm7139_vm0, %v3794_v14  ;;  %v33_v22 = vld [vmem:[%s7121_s0 + $0x40] sm:$0xff]  ;;  %v49_v23 = vmul.f32 %v29_v21, %v29_v21  ;;  %v31_v24 = vld [vmem:[%s7121_s0 + $0x30] sm:$0xff]  ;;  %v30_v28 = vld [vmem:[%s7121_s0 + $0x28] sm:$0xff]  ;;  %v113_v31 = vmul.f32 %v3794_v14, %v3794_v14  ;;  %v112_v35 = vmul.f32 %v3799_v16, %v3799_v16  ;;  %s3360_s16 = sshll.u32 %s7127_s6, 4  ;;  %s3361_s16 = int_to_ptr.hbm [resolvable:$true] %s3360_s16 }
   0x9   :  { %7209 = vst [vmem:[#allocation6_spill] sm:$0xff] %v3799_v16  ;;  %v65_v18 = vsel %vm7139_vm0, %v46_v12, 0.0  ;;  %v71_v20 = vsel %vm7139_vm0, %v48_v15, 0.0  ;;  %v51_v25 = vmul.f32 %v31_v24, %v31_v24  ;;  %v34_v29 = vld [vmem:[%s7121_s0 + $0x48] sm:$0xff]  ;;  %v50_v30 = vmul.f32 %v30_v28, %v30_v28  ;;  %v32_v34 = vld [vmem:[%s7121_s0 + $0x38] sm:$0xff]  ;;  %v3852_v43 = vld [vmem:[%s7121_s0 + $0x50] sm:$0xff] }
   0xa   :  { %3374 = vmatmul.msk.f32.vlgmr.msra.gmra.mxu0 %vm7139_vm0, %v25_v2  ;;  %v74_v26 = vsel %vm7139_vm0, %v49_v23, 0.0  ;;  %v123_v33 = vsel %vm7139_vm0, %v113_v31, 0.0  ;;  %v54_v36 = vmul.f32 %v34_v29, %v34_v29  ;;  %v52_v37 = vmul.f32 %v32_v34, %v32_v34  ;;  %v3859_v46 = vld [vmem:[%s7121_s0 + $0x58] sm:$0xff]  ;;  %v3869_v51 = vld [vmem:[%s7121_s0 + $0x60] sm:$0xff]  ;;  %v3884_v62 = vld [vmem:[%s7121_s0 + $0x68] sm:$0xff]  ;;  %s3731_s18 = smov 8  }
   0xb   :  { %v80_v27 = vsel %vm7139_vm0, %v51_v25, 0.0  ;;  %v77_v32 = vsel %vm7139_vm0, %v50_v30, 0.0  ;;  %v120_v38 = vsel %vm7139_vm0, %v112_v35, 0.0  ;;  %v53_v41 = vmul.f32 %v33_v22, %v33_v22  ;;  %v3896_v6 = vld [vmem:[%s7121_s0 + $0x70] sm:$0xff] }
   0xc   :  { %3383 = vmatpush.xpose.msk.msra.mxu1 %vm7139_vm0, %v3799_v16  ;;  %v89_v39 = vsel %vm7139_vm0, %v54_v36, 0.0  ;;  %v83_v40 = vsel %vm7139_vm0, %v52_v37, 0.0  ;;  %v3863_v48 = vand.u32 127, %v304_v44 }
   0xd   :  { %v86_v42 = vsel %vm7139_vm0, %v53_v41, 0.0 }
   0xe   :  { %118 = vadd.xlane.f32.xlu0 %v117_v17  ;;  %66 = vadd.xlane.f32.xlu1 %v65_v18  ;;  %v307_v50 = vadd.s32 4294967288, %v3863_v48 }
   0xf   :  { %72 = vadd.xlane.f32.xlu2 %v71_v20  ;;  %3384 = vmatmul.msk.f32.vlgmr.msra.gmra.mxu1 %vm7139_vm0, %v33_v22 }
  0x12   :  { %3375 = vmatmul.msk.f32.gmra.mxu0 %vm7139_vm0, %v26_v9 }
  0x16   :  { %75 = vadd.xlane.f32.xlu0 %v74_v26  ;;  %78 = vadd.xlane.f32.xlu1 %v77_v32 }
  0x17   :  { %81 = vadd.xlane.f32.xlu2 %v80_v27  ;;  %3385 = vmatmul.msk.f32.gmra.mxu1 %vm7139_vm0, %v34_v29 }
  0x1a   :  { %3376 = vmatmul.msk.f32.gmra.mxu0 %vm7139_vm0, %v27_v5 }
  0x1e   :  { %121 = vadd.xlane.f32.xlu1 %v120_v38  ;;  %84 = vadd.xlane.f32.xlu0 %v83_v40  ;;  %v3917_v40 = vld [vmem:[%s7121_s0 + $0x78] sm:$0xff] }
  0x1f   :  { %124 = vadd.xlane.f32.xlu2 %v123_v33  ;;  %3386 = vmatmul.msk.f32.gmra.mxu1 %vm7139_vm0, %v3852_v43 }
  0x22   :  { %3377 = vmatmul.msk.f32.gmra.mxu0 %vm7139_vm0, %v28_v13 }
  0x26   :  { %87 = vadd.xlane.f32.xlu0 %v86_v42 }
  0x27   :  { %90 = vadd.xlane.f32.xlu2 %v89_v39  ;;  %3387 = vmatmul.msk.f32.gmra.mxu1 %vm7139_vm0, %v3859_v46 }
  0x2a   :  { %3378 = vmatmul.msk.f32.gmra.mxu0 %vm7139_vm0, %v29_v21 }
  0x2f   :  { %3388 = vmatmul.msk.f32.gmra.mxu1 %vm7139_vm0, %v3869_v51 }
  0x32   :  { %3379 = vmatmul.msk.f32.gmra.mxu0 %vm7139_vm0, %v30_v28 }
  0x37   :  { %3389 = vmatmul.msk.f32.gmra.mxu1 %vm7139_vm0, %v3884_v62 }
  0x3a   :  { %3380 = vmatmul.msk.f32.gmra.mxu0 %vm7139_vm0, %v31_v24 }
  0x3f   :  { %3390 = vmatmul.msk.f32.gmra.mxu1 %vm7139_vm0, %v3896_v6 }
  0x42   :  { %3381 = vmatmul.msk.f32.gmra.mxu0 %vm7139_vm0, %v32_v34 }
  0x47   :  { %3391 = vmatmul.msk.f32.gmra.mxu1 %vm7139_vm0, %v3917_v40 }
  0x79   :  { %v116_v45 = vpop.xlane.xlu0 %115  ;;  %v64_v49 = vpop.xlane.xlu1 %63 }
  0x7a   :  { %v70_v47 = vpop.xlane.xlu2 %69  ;;  %v306_v54 = vperm.slane %v116_v45, %v3863_v48 }
  0x81   :  { %v119_v52 = vpop.xlane.xlu0 %118  ;;  %v67_v59 = vpop.xlane.xlu1 %66 }
  0x82   :  { %v3871_v53 = vpop.xlane.xlu2 %72  ;;  %v308_v55 = vperm.slane %v119_v52, %v307_v50 }
  0x84   :  { %v3877_v58 = vsel %vm309_vm1, %v308_v55, %v306_v54 }
  0x87   :  { %v173_v56 = vpop.f32.mrf.mxu0 }
  0x88   :  { %v268_v57 = vmul.f32 2.0, %v173_v56  ;;  %v55_v56 = vmul.f32 %v3852_v43, %v3852_v43 }
  0x89   :  { %v3891_v4 = vpop.xlane.xlu1 %78  ;;  %v76_v55 = vpop.xlane.xlu0 %75 }
  0x8a   :  { %v284_v60 = vsub.f32 %v64_v49, %v268_v57  ;;  %v3879_v61 = vpop.xlane.xlu2 %81 }
  0x8c   :  { %v334_v63 = vadd.f32 %v3877_v58, %v284_v60  ;;  %v3889_v3 = vpop.f32.mrf.mxu1 }
  0x8e   :  { %v350_v0 = vmax.f32 %v334_v63, 0.0 }
  0x8f   :  { %v176_v1 = vpop.f32.mrf.mxu0 }
  0x90   :  { %v269_v2 = vmul.f32 2.0, %v176_v1  ;;  %3522 = vrsqrt.f32 %v350_v0  ;;  %vm373_vm3 = vcmp.eq.f32.partialorder %v350_v0, inf  ;;  %v376_v38 = vand.u32 2147483648, %v350_v0 }
  0x91   :  { %v122_v21 = vpop.xlane.xlu1 %121  ;;  %vm375_vm4 = vcmp.eq.f32.partialorder %v350_v0, 0.0 }
  0x92   :  { %v285_v5 = vsub.f32 %v67_v59, %v269_v2  ;;  %v125_v8 = vpop.xlane.xlu2 %124  ;;  %v311_v28 = vperm.slane %v122_v21, %v3863_v48 }
  0x93   :  { %v312_v27 = vperm.slane %v125_v8, %v307_v50 }
  0x94   :  { %v335_v7 = vadd.f32 %v3877_v58, %v285_v5  ;;  %v247_v18 = vpop.f32.mrf.mxu1 }
  0x95   :  { %v277_v24 = vmul.f32 2.0, %v247_v18  ;;  %v3912_v39 = vsel %vm309_vm1, %v312_v27, %v311_v28 }
  0x96   :  { %v3523_v9 = vpop.eup %3522  ;;  %v3901_v10 = vmax.f32 %v335_v7, 0.0  ;;  %v92_v7 = vsel %vm7139_vm0, %v55_v56, 0.0 }
  0x97   :  { %v179_v11 = vpop.f32.mrf.mxu0  ;;  %v367_v12 = vmul.f32 %v3523_v9, %v350_v0 }
  0x98   :  { %v270_v13 = vmul.f32 2.0, %v179_v11  ;;  %3524 = vrsqrt.f32 %v3901_v10  ;;  %vm385_vm5 = vcmp.eq.f32.partialorder %v3901_v10, inf  ;;  %v388_v5 = vand.u32 2147483648, %v3901_v10 }
  0x99   :  { %v368_v15 = vmul.f32 %v3523_v9, %v367_v12  ;;  %vm387_vm6 = vcmp.eq.f32.partialorder %v3901_v10, 0.0 }
  0x9a   :  { %v286_v17 = vsub.f32 %v70_v47, %v270_v13  ;;  %v91_v29 = vpop.xlane.xlu2 %90 }
  0x9b   :  { %v369_v20 = vmul.f32 0.5, %v368_v15  ;;  %v293_v36 = vsub.f32 %v91_v29, %v277_v24 }
  0x9c   :  { %v336_v22 = vadd.f32 %v3877_v58, %v286_v17 }
  0x9d   :  { %v370_v23 = vsub.f32 1.5, %v369_v20  ;;  %v343_v50 = vadd.f32 %v3912_v39, %v293_v36 }
  0x9e   :  { %v3525_v25 = vpop.eup %3524  ;;  %v3905_v26 = vmax.f32 %v336_v22, 0.0 }
  0x9f   :  { %v182_v30 = vpop.f32.mrf.mxu0  ;;  %v371_v31 = vmul.f32 %v3523_v9, %v370_v23  ;;  %v379_v32 = vmul.f32 %v3525_v25, %v3901_v10  ;;  %v3934_v1 = vmax.f32 %v343_v50, 0.0 }
  0xa0   :  { %v271_v33 = vmul.f32 2.0, %v182_v30  ;;  %3526 = vrsqrt.f32 %v3905_v26  ;;  %vm397_vm7 = vcmp.eq.f32.partialorder %v3905_v26, inf  ;;  %v400_v27 = vand.u32 2147483648, %v3905_v26 }
  0xa1   :  { %v372_v34 = vmul.f32 %v371_v31, %v350_v0  ;;  %v380_v35 = vmul.f32 %v3525_v25, %v379_v32  ;;  %vm399_vm8 = vcmp.eq.f32.partialorder %v3905_v26, 0.0  ;;  %vm481_vm15 = vcmp.eq.f32.partialorder %v3934_v1, inf }
  0xa2   :  { %v287_v37 = vsub.f32 %v3871_v53, %v271_v33  ;;  %vm483_vm1 = vcmp.eq.f32.partialorder %v3934_v1, 0.0 }
  0xa3   :  { %v374_v41 = vsel %vm373_vm3, %v350_v0, %v372_v34  ;;  %v381_v42 = vmul.f32 0.5, %v380_v35 }
  0xa4   :  { %v337_v44 = vadd.f32 %v3877_v58, %v287_v37  ;;  %v3922_v45 = vsel %vm375_vm4, %v376_v38, %v374_v41  ;;  %v57_v37 = vmul.f32 %v3869_v51, %v3869_v51 }
  0xa5   :  { %v559_v47 = vsel %vm558_vm2, %v3922_v45, inf  ;;  %v382_v49 = vsub.f32 1.5, %v381_v42 }
  0xa6   :  { %v3527_v52 = vpop.eup %3526  ;;  %v3927_v53 = vmax.f32 %v337_v44, 0.0  ;;  %560 = vmin.xlane.f32.xlu1 %v559_v47  ;;  %v59_v44 = vmul.f32 %v3896_v6, %v3896_v6 }
  0xa7   :  { %v185_v54 = vpop.f32.mrf.mxu0  ;;  %v383_v57 = vmul.f32 %v3525_v25, %v382_v49  ;;  %v391_v59 = vmul.f32 %v3527_v52, %v3905_v26 }
  0xa8   :  { %v272_v60 = vmul.f32 2.0, %v185_v54  ;;  %3528 = vrsqrt.f32 %v3927_v53  ;;  %vm409_vm9 = vcmp.eq.f32.partialorder %v3927_v53, inf  ;;  %v98_v54 = vsel %vm7139_vm0, %v57_v37, 0.0 }
  0xa9   :  { %v384_v63 = vmul.f32 %v383_v57, %v3901_v10  ;;  %v392_v0 = vmul.f32 %v3527_v52, %v391_v59  ;;  %3530 = vrsqrt.f32 %v3934_v1  ;;  %vm411_vm10 = vcmp.eq.f32.partialorder %v3927_v53, 0.0 }
  0xaa   :  { %v288_v2 = vsub.f32 %v76_v55, %v272_v60  ;;  %v104_v59 = vsel %vm7139_vm0, %v59_v44, 0.0 }
  0xab   :  { %v386_v43 = vsel %vm385_vm5, %v3901_v10, %v384_v63  ;;  %v393_v8 = vmul.f32 0.5, %v392_v0  ;;  %v56_v10 = vmul.f32 %v3859_v46, %v3859_v46 }
  0xac   :  { %v338_v9 = vadd.f32 %v3877_v58, %v288_v2  ;;  %v3942_v11 = vsel %vm387_vm6, %v388_v5, %v386_v43 }
  0xad   :  { %v562_v12 = vsel %vm558_vm2, %v3942_v11, inf  ;;  %v394_v13 = vsub.f32 1.5, %v393_v8  ;;  %v95_v46 = vsel %vm7139_vm0, %v56_v10, 0.0 }
  0xae   :  { %v3529_v15 = vpop.eup %3528  ;;  %v3947_v17 = vmax.f32 %v338_v9, 0.0  ;;  %93 = vadd.xlane.f32.xlu1 %v92_v7  ;;  %563 = vmin.xlane.f32.xlu0 %v562_v12  ;;  %v58_v7 = vmul.f32 %v3884_v62, %v3884_v62 }
  0xaf   :  { %v188_v18 = vpop.f32.mrf.mxu0  ;;  %v395_v20 = vmul.f32 %v3527_v52, %v394_v13  ;;  %v403_v21 = vmul.f32 %v3529_v15, %v3927_v53  ;;  %v3957_v28 = vpop.eup %3530  ;;  %v412_v52 = vand.u32 2147483648, %v3927_v53 }
  0xb0   :  { %v273_v22 = vmul.f32 2.0, %v188_v18  ;;  %3532 = vrsqrt.f32 %v3947_v17  ;;  %v475_v36 = vmul.f32 %v3957_v28, %v3934_v1  ;;  %vm421_vm11 = vcmp.eq.f32.partialorder %v3947_v17, inf }
  0xb1   :  { %v396_v23 = vmul.f32 %v395_v20, %v3905_v26  ;;  %v404_v24 = vmul.f32 %v3529_v15, %v403_v21  ;;  %v424_v18 = vand.u32 2147483648, %v3947_v17  ;;  %v101_v10 = vsel %vm7139_vm0, %v58_v7, 0.0 }
  0xb2   :  { %v289_v25 = vsub.f32 %v3891_v4, %v273_v22  ;;  %v476_v51 = vmul.f32 %v3957_v28, %v475_v36  ;;  %vm423_vm12 = vcmp.eq.f32.partialorder %v3947_v17, 0.0 }
  0xb3   :  { %v398_v29 = vsel %vm397_vm7, %v3905_v26, %v396_v23  ;;  %v405_v30 = vmul.f32 0.5, %v404_v24 }
  0xb4   :  { %v339_v31 = vadd.f32 %v3877_v58, %v289_v25  ;;  %v3963_v32 = vsel %vm399_vm8, %v400_v27, %v398_v29  ;;  %v477_v2 = vmul.f32 0.5, %v476_v51 }
  0xb5   :  { %v565_v4 = vsel %vm558_vm2, %v3963_v32, inf  ;;  %v406_v33 = vsub.f32 1.5, %v405_v30 }
  0xb6   :  { %v3533_v34 = vpop.eup %3532  ;;  %v3967_v35 = vmax.f32 %v339_v31, 0.0  ;;  %566 = vmin.xlane.f32.xlu2 %v565_v4  ;;  %96 = vadd.xlane.f32.xlu0 %v95_v46  ;;  %v478_v20 = vsub.f32 1.5, %v477_v2 }
  0xb7   :  { %v191_v26 = vpop.f32.mrf.mxu0  ;;  %v407_v38 = vmul.f32 %v3529_v15, %v406_v33  ;;  %v415_v41 = vmul.f32 %v3533_v34, %v3947_v17 }
  0xb8   :  { %v274_v42 = vmul.f32 2.0, %v191_v26  ;;  %3534 = vrsqrt.f32 %v3967_v35  ;;  %v479_v46 = vmul.f32 %v3957_v28, %v478_v20  ;;  %vm433_vm13 = vcmp.eq.f32.partialorder %v3967_v35, inf }
  0xb9   :  { %v408_v47 = vmul.f32 %v407_v38, %v3927_v53  ;;  %v416_v49 = vmul.f32 %v3533_v34, %v415_v41  ;;  %v436_v33 = vand.u32 2147483648, %v3967_v35  ;;  %vm435_vm14 = vcmp.eq.f32.partialorder %v3967_v35, 0.0 }
  0xba   :  { %v290_v50 = vsub.f32 %v3879_v61, %v274_v42  ;;  %v484_v41 = vand.u32 2147483648, %v3934_v1 }
  0xbb   :  { %v410_v55 = vsel %vm409_vm9, %v3927_v53, %v408_v47  ;;  %v417_v6 = vmul.f32 0.5, %v416_v49  ;;  %v85_v53 = vpop.xlane.xlu0 %84 }
  0xbc   :  { %v340_v56 = vadd.f32 %v3877_v58, %v290_v50  ;;  %v3986_v57 = vsel %vm411_vm10, %v412_v52, %v410_v55 }
  0xbd   :  { %v568_v61 = vsel %vm558_vm2, %v3986_v57, inf  ;;  %v418_v60 = vsub.f32 1.5, %v417_v6 }
  0xbe   :  { %v3535_v63 = vpop.eup %3534  ;;  %v3991_v0 = vmax.f32 %v340_v56, 0.0  ;;  %99 = vadd.xlane.f32.xlu2 %v98_v54  ;;  %569 = vmin.xlane.f32.xlu1 %v568_v61 }
  0xbf   :  { %105 = vadd.xlane.f32.xlu0 %v104_v59  ;;  %v194_v5 = vpop.f32.mrf.mxu0  ;;  %v419_v43 = vmul.f32 %v3533_v34, %v418_v60  ;;  %v427_v8 = vmul.f32 %v3535_v63, %v3967_v35  ;;  %v480_v34 = vmul.f32 %v479_v46, %v3934_v1 }
  0xc0   :  { %v275_v9 = vmul.f32 2.0, %v194_v5  ;;  %3536 = vrsqrt.f32 %v3991_v0  ;;  %vm445_vm3 = vcmp.eq.f32.partialorder %v3991_v0, inf  ;;  %v448_v51 = vand.u32 2147483648, %v3991_v0 }
  0xc1   :  { %v420_v12 = vmul.f32 %v419_v43, %v3947_v17  ;;  %v428_v13 = vmul.f32 %v3535_v63, %v427_v8  ;;  %v482_v44 = vsel %vm481_vm15, %v3934_v1, %v480_v34  ;;  %vm447_vm4 = vcmp.eq.f32.partialorder %v3991_v0, 0.0 }
  0xc2   :  { %v291_v15 = vsub.f32 %v85_v53, %v275_v9  ;;  %v4028_v50 = vsel %vm483_vm1, %v484_v41, %v482_v44  ;;  %v276_v53 = vmul.f32 2.0, %v3889_v3  ;;  %v250_v9 = vpop.f32.mrf.mxu1 }
  0xc3   :  { %v422_v21 = vsel %vm421_vm11, %v3947_v17, %v420_v12  ;;  %v429_v62 = vmul.f32 0.5, %v428_v13  ;;  %v60_v17 = vmul.f32 %v3917_v40, %v3917_v40  ;;  %v586_v1 = vsel %vm558_vm2, %v4028_v50, inf  ;;  %v88_v7 = vpop.xlane.xlu0 %87 }
  0xc4   :  { %v341_v22 = vadd.f32 %v3877_v58, %v291_v15  ;;  %v4004_v23 = vsel %vm423_vm12, %v424_v18, %v422_v21  ;;  %v292_v43 = vsub.f32 %v88_v7, %v276_v53 }
  0xc5   :  { %v571_v24 = vsel %vm558_vm2, %v4004_v23, inf  ;;  %v430_v25 = vsub.f32 1.5, %v429_v62  ;;  %v107_v26 = vsel %vm7139_vm0, %v60_v17, 0.0 }
  0xc6   :  { %v3537_v27 = vpop.eup %3536  ;;  %v357_v29 = vmax.f32 %v341_v22, 0.0  ;;  %102 = vadd.xlane.f32.xlu1 %v101_v10  ;;  %v342_v8 = vadd.f32 %v3912_v39, %v292_v43 }
  0xc7   :  { %572 = vmin.xlane.f32.xlu0 %v571_v24  ;;  %v431_v30 = vmul.f32 %v3535_v63, %v430_v25  ;;  %v439_v31 = vmul.f32 %v3537_v27, %v3991_v0  ;;  %v278_v25 = vmul.f32 2.0, %v250_v9 }
  0xc8   :  { %3538 = vrsqrt.f32 %v357_v29  ;;  %vm457_vm5 = vcmp.eq.f32.partialorder %v357_v29, inf  ;;  %v460_v63 = vand.u32 2147483648, %v357_v29  ;;  %vm459_vm6 = vcmp.eq.f32.partialorder %v357_v29, 0.0 }
  0xc9   :  { %v432_v58 = vmul.f32 %v431_v30, %v3967_v35  ;;  %v440_v4 = vmul.f32 %v3537_v27, %v439_v31  ;;  %v358_v12 = vmax.f32 %v342_v8, 0.0 }
  0xca   :  { %v253_v13 = vpop.f32.mrf.mxu1 }
  0xcb   :  { %v434_v36 = vsel %vm433_vm13, %v3967_v35, %v432_v58  ;;  %v441_v28 = vmul.f32 0.5, %v440_v4  ;;  %3540 = vrsqrt.f32 %v358_v12  ;;  %vm469_vm9 = vcmp.eq.f32.partialorder %v358_v12, inf }
  0xcc   :  { %v4020_v40 = vsel %vm435_vm14, %v436_v33, %v434_v36  ;;  %v472_v44 = vand.u32 2147483648, %v358_v12  ;;  %vm471_vm11 = vcmp.eq.f32.partialorder %v358_v12, 0.0 }
  0xcd   :  { %v574_v37 = vsel %vm558_vm2, %v4020_v40, inf  ;;  %v442_v38 = vsub.f32 1.5, %v441_v28  ;;  %v279_v28 = vmul.f32 2.0, %v253_v13 }
  0xce   :  { %v3539_v42 = vpop.eup %3538  ;;  %575 = vmin.xlane.f32.xlu2 %v574_v37 }
  0xcf   :  { %108 = vadd.xlane.f32.xlu0 %v107_v26  ;;  %v443_v35 = vmul.f32 %v3537_v27, %v442_v38  ;;  %v451_v47 = vmul.f32 %v3539_v42, %v357_v29 }
  0xd1   :  { %v444_v49 = vmul.f32 %v443_v35, %v3991_v0  ;;  %v452_v52 = vmul.f32 %v3539_v42, %v451_v47  ;;  %v3541_v15 = vpop.eup %3540 }
  0xd2   :  { %v463_v18 = vmul.f32 %v3541_v15, %v358_v12  ;;  %v256_v10 = vpop.f32.mrf.mxu1 }
  0xd3   :  { %v446_v54 = vsel %vm445_vm3, %v3991_v0, %v444_v49  ;;  %v453_v55 = vmul.f32 0.5, %v452_v52 }
  0xd4   :  { %v4034_v6 = vsel %vm447_vm4, %v448_v51, %v446_v54  ;;  %v464_v20 = vmul.f32 %v3541_v15, %v463_v18 }
  0xd5   :  { %v577_v56 = vsel %vm558_vm2, %v4034_v6, inf  ;;  %v454_v59 = vsub.f32 1.5, %v453_v55 }
  0xd6   :  { %578 = vmin.xlane.f32.xlu2 %v577_v56  ;;  %v465_v62 = vmul.f32 0.5, %v464_v20 }
  0xd7   :  { %587 = vmin.xlane.f32.xlu0 %v586_v1  ;;  %v455_v61 = vmul.f32 %v3539_v42, %v454_v59  ;;  %v280_v59 = vmul.f32 2.0, %v256_v10 }
  0xd8   :  { %v466_v27 = vsub.f32 1.5, %v465_v62 }
  0xd9   :  { %v456_v60 = vmul.f32 %v455_v61, %v357_v29 }
  0xda   :  { %v259_v17 = vpop.f32.mrf.mxu1  ;;  %v467_v58 = vmul.f32 %v3541_v15, %v466_v27 }
  0xdb   :  { %v458_v2 = vsel %vm457_vm5, %v357_v29, %v456_v60 }
  0xdc   :  { %v4040_v5 = vsel %vm459_vm6, %v460_v63, %v458_v2  ;;  %v468_v37 = vmul.f32 %v467_v58, %v358_v12 }
  0xdd   :  { %v580_v0 = vsel %vm558_vm2, %v4040_v5, inf }
  0xde   :  { %581 = vmin.xlane.f32.xlu2 %v580_v0  ;;  %v470_v47 = vsel %vm469_vm9, %v358_v12, %v468_v37 }
  0xdf   :  { %v4084_v1 = vsel %vm471_vm11, %v472_v44, %v470_v47 }
  0xe0   :  { %v583_v0 = vsel %vm558_vm2, %v4084_v1, inf }
  0xe2   :  { %v262_v51 = vpop.f32.mrf.mxu1 }
  0xe3   :  { %v282_v60 = vmul.f32 2.0, %v262_v51 }
  0xea   :  { %v265_v47 = vpop.f32.mrf.mxu1 }
 0x119   :  { %v4046_v21 = vpop.xlane.xlu1 %560 }
 0x11a   :  { %vm607_vm7 = vcmp.eq.f32.partialorder %v3922_v45, %v4046_v21 }
 0x11b   :  { %v623_v3 = vsel %vm607_vm7, %v3863_v48, 16 }
 0x11c   :  { %v4052_v22 = vsel %vm558_vm2, %v623_v3, 2147483647 }
 0x11d   :  { %v641_v24 = vshra.s32 %v4052_v22, 16 }
 0x11f   :  { %v4055_v29 = vcvt.s32.f32 %v641_v24 }
 0x121   :  { %v4057_v46 = vpop.xlane.xlu0 %563  ;;  %644 = vmin.xlane.f32.xlu1 %v4055_v29  ;;  %v94_v30 = vpop.xlane.xlu1 %93 }
 0x122   :  { %vm608_vm8 = vcmp.eq.f32.partialorder %v3942_v11, %v4057_v46  ;;  %v294_v31 = vsub.f32 %v94_v30, %v278_v25  ;;  %v281_v25 = vmul.f32 2.0, %v259_v17 }
 0x123   :  { %v624_v4 = vsel %vm608_vm8, %v3863_v48, 16 }
 0x124   :  { %v344_v33 = vadd.f32 %v3912_v39, %v294_v31  ;;  %v4065_v34 = vsel %vm558_vm2, %v624_v4, 2147483647 }
 0x125   :  { %v656_v36 = vshra.s32 %v4065_v34, 16 }
 0x126   :  { %v4068_v26 = vmax.f32 %v344_v33, 0.0 }
 0x127   :  { %v4070_v38 = vcvt.s32.f32 %v656_v36 }
 0x128   :  { %3542 = vrsqrt.f32 %v4068_v26  ;;  %vm493_vm13 = vcmp.eq.f32.partialorder %v4068_v26, inf  ;;  %v496_v44 = vand.u32 2147483648, %v4068_v26  ;;  %vm495_vm15 = vcmp.eq.f32.partialorder %v4068_v26, 0.0 }
 0x129   :  { %v4073_v41 = vpop.xlane.xlu2 %566  ;;  %v97_v42 = vpop.xlane.xlu0 %96  ;;  %659 = vmin.xlane.f32.xlu1 %v4070_v38 }
 0x12a   :  { %vm609_vm10 = vcmp.eq.f32.partialorder %v3963_v32, %v4073_v41  ;;  %v295_v35 = vsub.f32 %v97_v42, %v279_v28 }
 0x12b   :  { %v625_v49 = vsel %vm609_vm10, %v3863_v48, 16 }
 0x12c   :  { %v345_v52 = vadd.f32 %v3912_v39, %v295_v35  ;;  %v4081_v54 = vsel %vm558_vm2, %v625_v49, 2147483647 }
 0x12d   :  { %v671_v55 = vshra.s32 %v4081_v54, 16 }
 0x12e   :  { %v3543_v56 = vpop.eup %3542  ;;  %v4086_v61 = vmax.f32 %v345_v52, 0.0 }
 0x12f   :  { %v4088_v63 = vcvt.s32.f32 %v671_v55  ;;  %v487_v2 = vmul.f32 %v3543_v56, %v4068_v26 }
 0x130   :  { %3544 = vrsqrt.f32 %v4086_v61  ;;  %vm505_vm1 = vcmp.eq.f32.partialorder %v4086_v61, inf  ;;  %vm507_vm3 = vcmp.eq.f32.partialorder %v4086_v61, 0.0 }
 0x131   :  { %v100_v53 = vpop.xlane.xlu2 %99  ;;  %674 = vmin.xlane.f32.xlu0 %v4088_v63  ;;  %584 = vmin.xlane.f32.xlu1 %v583_v0  ;;  %v4095_v7 = vpop.xlane.xlu1 %569  ;;  %v488_v43 = vmul.f32 %v3543_v56, %v487_v2  ;;  %v283_v0 = vmul.f32 2.0, %v265_v47 }
 0x132   :  { %v296_v8 = vsub.f32 %v100_v53, %v280_v59  ;;  %v106_v9 = vpop.xlane.xlu0 %105  ;;  %vm610_vm12 = vcmp.eq.f32.partialorder %v3986_v57, %v4095_v7 }
 0x133   :  { %v298_v12 = vsub.f32 %v106_v9, %v282_v60  ;;  %v626_v13 = vsel %vm610_vm12, %v3863_v48, 16  ;;  %v489_v15 = vmul.f32 0.5, %v488_v43 }
 0x134   :  { %v346_v18 = vadd.f32 %v3912_v39, %v296_v8  ;;  %v4102_v20 = vsel %vm558_vm2, %v626_v13, 2147483647 }
 0x135   :  { %v348_v10 = vadd.f32 %v3912_v39, %v298_v12  ;;  %v686_v62 = vshra.s32 %v4102_v20, 16  ;;  %v490_v3 = vsub.f32 1.5, %v489_v15 }
 0x136   :  { %v3545_v24 = vpop.eup %3544  ;;  %v4106_v27 = vmax.f32 %v346_v18, 0.0 }
 0x137   :  { %v4108_v30 = vmax.f32 %v348_v10, 0.0  ;;  %v4110_v31 = vcvt.s32.f32 %v686_v62  ;;  %v491_v58 = vmul.f32 %v3543_v56, %v490_v3  ;;  %v499_v4 = vmul.f32 %v3545_v24, %v4086_v61 }
 0x138   :  { %3546 = vrsqrt.f32 %v4106_v27  ;;  %vm517_vm4 = vcmp.eq.f32.partialorder %v4106_v27, inf  ;;  %vm519_vm5 = vcmp.eq.f32.partialorder %v4106_v27, 0.0 }
 0x139   :  { %689 = vmin.xlane.f32.xlu2 %v4110_v31  ;;  %v103_v33 = vpop.xlane.xlu1 %102  ;;  %v492_v36 = vmul.f32 %v491_v58, %v4068_v26  ;;  %v500_v28 = vmul.f32 %v3545_v24, %v499_v4  ;;  %3548 = vrsqrt.f32 %v4108_v30  ;;  %vm541_vm8 = vcmp.eq.f32.partialorder %v4108_v30, inf }
 0x13a   :  { %v4116_v37 = vpop.xlane.xlu0 %572  ;;  %v297_v17 = vsub.f32 %v103_v33, %v281_v25  ;;  %v508_v25 = vand.u32 2147483648, %v4086_v61  ;;  %vm543_vm9 = vcmp.eq.f32.partialorder %v4108_v30, 0.0 }
 0x13b   :  { %vm611_vm14 = vcmp.eq.f32.partialorder %v4004_v23, %v4116_v37  ;;  %v494_v42 = vsel %vm493_vm13, %v4068_v26, %v492_v36  ;;  %v501_v52 = vmul.f32 0.5, %v500_v28 }
 0x13c   :  { %v347_v35 = vadd.f32 %v3912_v39, %v297_v17  ;;  %v627_v49 = vsel %vm611_vm14, %v3863_v48, 16  ;;  %v4130_v55 = vsel %vm495_vm15, %v496_v44, %v494_v42 }
 0x13d   :  { %v4128_v51 = vsel %vm558_vm2, %v627_v49, 2147483647  ;;  %v502_v2 = vsub.f32 1.5, %v501_v52  ;;  %v589_v26 = vsel %vm558_vm2, %v4130_v55, inf  ;;  %v520_v49 = vand.u32 2147483648, %v4106_v27 }
 0x13e   :  { %v3547_v56 = vpop.eup %3546  ;;  %v363_v59 = vmax.f32 %v347_v35, 0.0  ;;  %v701_v60 = vshra.s32 %v4128_v51, 16 }
 0x13f   :  { %v511_v53 = vmul.f32 %v3547_v56, %v4106_v27  ;;  %v3549_v43 = vpop.eup %3548  ;;  %v503_v9 = vmul.f32 %v3545_v24, %v502_v2 }
 0x140   :  { %v4134_v8 = vcvt.s32.f32 %v701_v60  ;;  %3550 = vrsqrt.f32 %v363_v59  ;;  %v535_v62 = vmul.f32 %v3549_v43, %v4108_v30  ;;  %vm529_vm6 = vcmp.eq.f32.partialorder %v363_v59, inf }
 0x141   :  { %590 = vmin.xlane.f32.xlu2 %v589_v26  ;;  %v512_v12 = vmul.f32 %v3547_v56, %v511_v53  ;;  %v504_v15 = vmul.f32 %v503_v9, %v4086_v61  ;;  %vm531_vm7 = vcmp.eq.f32.partialorder %v363_v59, 0.0 }
 0x142   :  { %v109_v13 = vpop.xlane.xlu0 %108  ;;  %704 = vmin.xlane.f32.xlu1 %v4134_v8  ;;  %v536_v42 = vmul.f32 %v3549_v43, %v535_v62 }
 0x143   :  { %v299_v18 = vsub.f32 %v109_v13, %v283_v0  ;;  %v513_v10 = vmul.f32 0.5, %v512_v12  ;;  %v506_v3 = vsel %vm505_vm1, %v4086_v61, %v504_v15 }
 0x144   :  { %v4146_v33 = vsel %vm507_vm3, %v508_v25, %v506_v3  ;;  %v537_v61 = vmul.f32 0.5, %v536_v42 }
 0x145   :  { %v349_v24 = vadd.f32 %v3912_v39, %v299_v18  ;;  %v514_v58 = vsub.f32 1.5, %v513_v10  ;;  %v592_v44 = vsel %vm558_vm2, %v4146_v33, inf  ;;  %v532_v10 = vand.u32 2147483648, %v363_v59 }
 0x146   :  { %v3551_v4 = vpop.eup %3550  ;;  %v538_v0 = vsub.f32 1.5, %v537_v61 }
 0x147   :  { %v365_v36 = vmax.f32 %v349_v24, 0.0  ;;  %v515_v28 = vmul.f32 %v3547_v56, %v514_v58  ;;  %v523_v17 = vmul.f32 %v3551_v4, %v363_v59 }
 0x148   :  { %v539_v15 = vmul.f32 %v3549_v43, %v538_v0  ;;  %v544_v43 = vand.u32 2147483648, %v4108_v30 }
 0x149   :  { %v516_v35 = vmul.f32 %v515_v28, %v4106_v27  ;;  %v524_v47 = vmul.f32 %v3551_v4, %v523_v17  ;;  %3552 = vrsqrt.f32 %v365_v36  ;;  %vm553_vm10 = vcmp.eq.f32.partialorder %v365_v36, inf }
 0x14a   :  { %593 = vmin.xlane.f32.xlu1 %v592_v44  ;;  %v540_v3 = vmul.f32 %v539_v15, %v4108_v30  ;;  %v556_v44 = vand.u32 2147483648, %v365_v36  ;;  %vm555_vm11 = vcmp.eq.f32.partialorder %v365_v36, 0.0 }
 0x14b   :  { %v518_v39 = vsel %vm517_vm4, %v4106_v27, %v516_v35  ;;  %v525_v52 = vmul.f32 0.5, %v524_v47 }
 0x14c   :  { %v4155_v56 = vsel %vm519_vm5, %v520_v49, %v518_v39  ;;  %v542_v58 = vsel %vm541_vm8, %v4108_v30, %v540_v3  ;;  %v4176_v39 = vpop.xlane.xlu2 %575 }
 0x14d   :  { %v526_v60 = vsub.f32 1.5, %v525_v52  ;;  %v595_v9 = vsel %vm558_vm2, %v4155_v56, inf  ;;  %v4168_v28 = vsel %vm543_vm9, %v544_v43, %v542_v58  ;;  %v4184_v52 = vpop.xlane.xlu0 %587  ;;  %vm612_vm14 = vcmp.eq.f32.partialorder %v4020_v40, %v4176_v39 }
 0x14e   :  { %v601_v17 = vsel %vm558_vm2, %v4168_v28, inf  ;;  %7210 = vst [vmem:[#allocation7_spill] sm:$0xff] %v4184_v52  ;;  %vm616_vm12 = vcmp.eq.f32.partialorder %v4028_v50, %v4184_v52  ;;  %v628_v58 = vsel %vm612_vm14, %v3863_v48, 16  ;;  %v670_v52 = vand.u32 65535, %v4081_v54 }
 0x14f   :  { %v3553_v2 = vpop.eup %3552  ;;  %v527_v53 = vmul.f32 %v3551_v4, %v526_v60  ;;  %v4229_v43 = vsel %vm558_vm2, %v628_v58, 2147483647  ;;  %v700_v54 = vand.u32 65535, %v4128_v51 }
 0x150   :  { %v547_v26 = vmul.f32 %v3553_v2, %v365_v36 }
 0x151   :  { %v528_v12 = vmul.f32 %v527_v53, %v363_v59 }
 0x152   :  { %596 = vmin.xlane.f32.xlu1 %v595_v9  ;;  %v548_v13 = vmul.f32 %v3553_v2, %v547_v26  ;;  %v632_v26 = vsel %vm616_vm12, %v3863_v48, 16 }
 0x153   :  { %v530_v18 = vsel %vm529_vm6, %v363_v59, %v528_v12  ;;  %v4203_v12 = vsel %vm558_vm2, %v632_v26, 2147483647 }
 0x154   :  { %v549_v62 = vmul.f32 0.5, %v548_v13  ;;  %v4159_v27 = vsel %vm531_vm7, %v532_v10, %v530_v18  ;;  %v4180_v61 = vpop.xlane.xlu2 %578  ;;  %v776_v15 = vshra.s32 %v4203_v12, 16 }
 0x155   :  { %v598_v24 = vsel %vm558_vm2, %v4159_v27, inf  ;;  %vm613_vm1 = vcmp.eq.f32.partialorder %v4034_v6, %v4180_v61 }
 0x156   :  { %v550_v25 = vsub.f32 1.5, %v549_v62  ;;  %v4209_v18 = vcvt.s32.f32 %v776_v15 }
 0x158   :  { %v551_v4 = vmul.f32 %v3553_v2, %v550_v25 }
 0x15a   :  { %599 = vmin.xlane.f32.xlu1 %v598_v24  ;;  %v552_v59 = vmul.f32 %v551_v4, %v365_v36 }
 0x15c   :  { %v554_v42 = vsel %vm553_vm10, %v365_v36, %v552_v59  ;;  %v4186_v60 = vpop.xlane.xlu2 %581 }
 0x15d   :  { %v4172_v35 = vsel %vm555_vm11, %v556_v44, %v554_v42  ;;  %7211 = vst [vmem:[#allocation8_spill] sm:$0xff] %v4186_v60  ;;  %vm614_vm4 = vcmp.eq.f32.partialorder %v4040_v5, %v4186_v60 }
 0x15e   :  { %v604_v47 = vsel %vm558_vm2, %v4172_v35, inf }
 0x162   :  { %602 = vmin.xlane.f32.xlu1 %v601_v17  ;;  %v716_v17 = vshra.s32 %v4229_v43, 16 }
 0x16a   :  { %605 = vmin.xlane.f32.xlu1 %v604_v47  ;;  %v629_v47 = vsel %vm613_vm1, %v3863_v48, 16 }
 0x16b   :  { %v4250_v15 = vsel %vm558_vm2, %v629_v47, 2147483647 }
 0x194   :  { %v4178_v30 = vpop.xlane.xlu1 %644 }
 0x195   :  { %vm646_vm7 = vcmp.eq.f32.partialorder %v4055_v29, %v4178_v30 }
 0x19c   :  { %v4182_v49 = vpop.xlane.xlu1 %659 }
 0x19d   :  { %vm661_vm8 = vcmp.eq.f32.partialorder %v4070_v38, %v4182_v49 }
 0x1a4   :  { %v4188_v2 = vpop.xlane.xlu1 %584  ;;  %v4298_v60 = vpop.xlane.xlu0 %674 }
 0x1a5   :  { %7212 = vst [vmem:[#allocation9_spill] sm:$0xff] %v4188_v2  ;;  %vm615_vm13 = vcmp.eq.f32.partialorder %v4084_v1, %v4188_v2  ;;  %vm676_vm9 = vcmp.eq.f32.partialorder %v4088_v63, %v4298_v60 }
 0x1a6   :  { %v631_v36 = vsel %vm615_vm13, %v3863_v48, 16 }
 0x1a7   :  { %v4196_v0 = vsel %vm558_vm2, %v631_v36, 2147483647 }
 0x1a8   :  { %v761_v53 = vshra.s32 %v4196_v0, 16 }
 0x1aa   :  { %v4200_v9 = vcvt.s32.f32 %v761_v53  ;;  %v4245_v53 = vcvt.s32.f32 %v716_v17 }
 0x1ac   :  { %v4205_v13 = vpop.xlane.xlu2 %689  ;;  %764 = vmin.xlane.f32.xlu0 %v4200_v9 }
 0x1ad   :  { %vm691_vm10 = vcmp.eq.f32.partialorder %v4110_v31, %v4205_v13 }
 0x1b4   :  { %v4211_v10 = vpop.xlane.xlu2 %590  ;;  %779 = vmin.xlane.f32.xlu0 %v4209_v18 }
 0x1b5   :  { %7213 = vst [vmem:[#allocation10_spill] sm:$0xff] %v4211_v10  ;;  %vm617_vm15 = vcmp.eq.f32.partialorder %v4130_v55, %v4211_v10  ;;  %v4218_v62 = vpop.xlane.xlu1 %704 }
 0x1b6   :  { %v633_v3 = vsel %vm617_vm15, %v3863_v48, 16  ;;  %vm706_vm12 = vcmp.eq.f32.partialorder %v4134_v8, %v4218_v62 }
 0x1b7   :  { %v4222_v25 = vsel %vm558_vm2, %v633_v3, 2147483647 }
 0x1b8   :  { %v791_v24 = vshra.s32 %v4222_v25, 16 }
 0x1ba   :  { %v4226_v4 = vcvt.s32.f32 %v791_v24  ;;  %v731_v24 = vshra.s32 %v4250_v15, 16 }
 0x1bc   :  { %794 = vmin.xlane.f32.xlu0 %v4226_v4 }
 0x1bd   :  { %v4234_v59 = vpop.xlane.xlu1 %593 }
 0x1be   :  { %7214 = vst [vmem:[#allocation11_spill] sm:$0xff] %v4234_v59  ;;  %vm618_vm3 = vcmp.eq.f32.partialorder %v4146_v33, %v4234_v59  ;;  %v640_v59 = vand.u32 65535, %v4052_v22  ;;  %v672_v22 = vcvt.s32.f32 %v670_v52  ;;  %v702_v52 = vcvt.s32.f32 %v700_v54 }
 0x1bf   :  { %v634_v42 = vsel %vm618_vm3, %v3863_v48, 16 }
 0x1c0   :  { %v4241_v44 = vsel %vm558_vm2, %v634_v42, 2147483647  ;;  %v630_v42 = vsel %vm614_vm4, %v3863_v48, 16  ;;  %v677_v29 = vsel %vm676_vm9, %v672_v22, inf }
 0x1c1   :  { %v806_v36 = vshra.s32 %v4241_v44, 16  ;;  %v4272_v14 = vsel %vm558_vm2, %v630_v42, 2147483647  ;;  %v805_v54 = vand.u32 65535, %v4241_v44 }
 0x1c3   :  { %v4247_v26 = vcvt.s32.f32 %v806_v36  ;;  %v4267_v36 = vcvt.s32.f32 %v731_v24 }
 0x1c4   :  { %719 = vmin.xlane.f32.xlu0 %v4245_v53 }
 0x1c5   :  { %809 = vmin.xlane.f32.xlu2 %v4247_v26  ;;  %v4256_v3 = vpop.xlane.xlu1 %596 }
 0x1c6   :  { %7215 = vst [vmem:[#allocation12_spill] sm:$0xff] %v4256_v3  ;;  %vm619_vm5 = vcmp.eq.f32.partialorder %v4155_v56, %v4256_v3 }
 0x1c7   :  { %v635_v58 = vsel %vm619_vm5, %v3863_v48, 16 }
 0x1c8   :  { %v4263_v17 = vsel %vm558_vm2, %v635_v58, 2147483647  ;;  %v746_v58 = vshra.s32 %v4272_v14, 16 }
 0x1c9   :  { %v821_v47 = vshra.s32 %v4263_v17, 16  ;;  %v820_v44 = vand.u32 65535, %v4263_v17 }
 0x1ca   :  { %v4286_v42 = vcvt.s32.f32 %v746_v58 }
 0x1cb   :  { %v4269_v19 = vcvt.s32.f32 %v821_v47 }
 0x1cc   :  { %734 = vmin.xlane.f32.xlu0 %v4267_v36 }
 0x1cd   :  { %824 = vmin.xlane.f32.xlu2 %v4269_v19  ;;  %v4276_v16 = vpop.xlane.xlu1 %599 }
 0x1ce   :  { %7216 = vst [vmem:[#allocation13_spill] sm:$0xff] %v4276_v16  ;;  %vm620_vm6 = vcmp.eq.f32.partialorder %v4159_v27, %v4276_v16  ;;  %v642_v16 = vcvt.s32.f32 %v640_v59  ;;  %v707_v59 = vsel %vm706_vm12, %v702_v52, inf }
 0x1cf   :  { %v636_v10 = vsel %vm620_vm6, %v3863_v48, 16 }
 0x1d0   :  { %v4283_v24 = vsel %vm558_vm2, %v636_v10, 2147483647  ;;  %v647_v2 = vsel %vm646_vm7, %v642_v16, inf  ;;  %v655_v10 = vand.u32 65535, %v4065_v34  ;;  %v685_v16 = vand.u32 65535, %v4102_v20 }
 0x1d1   :  { %v836_v47 = vshra.s32 %v4283_v24, 16  ;;  %v835_v17 = vand.u32 65535, %v4283_v24  ;;  %v651_v24 = vcvt.f32.s32 %v4178_v30 }
 0x1d2   :  { %v657_v58 = vcvt.s32.f32 %v655_v10  ;;  %v687_v34 = vcvt.s32.f32 %v685_v16 }
 0x1d3   :  { %v4288_v3 = vcvt.s32.f32 %v836_v47 }
 0x1d4   :  { %749 = vmin.xlane.f32.xlu0 %v4286_v42  ;;  %v662_v47 = vsel %vm661_vm8, %v657_v58, inf  ;;  %v692_v38 = vsel %vm691_vm10, %v687_v34, inf }
 0x1d5   :  { %839 = vmin.xlane.f32.xlu2 %v4288_v3 }
 0x1dd   :  { %648 = vmin.xlane.f32.xlu2 %v647_v2  ;;  %v4304_v2 = vpop.xlane.xlu1 %602 }
 0x1de   :  { %7217 = vst [vmem:[#allocation14_spill] sm:$0xff] %v4304_v2  ;;  %vm621_vm11 = vcmp.eq.f32.partialorder %v4168_v28, %v4304_v2 }
 0x1df   :  { %v637_v63 = vsel %vm621_vm11, %v3863_v48, 16 }
 0x1e0   :  { %v4317_v10 = vsel %vm558_vm2, %v637_v63, 2147483647 }
 0x1e1   :  { %v851_v31 = vshra.s32 %v4317_v10, 16 }
 0x1e3   :  { %v4323_v58 = vcvt.s32.f32 %v851_v31  ;;  %v807_v31 = vcvt.s32.f32 %v805_v54 }
 0x1e5   :  { %663 = vmin.xlane.f32.xlu2 %v662_v47  ;;  %v4314_v20 = vpop.xlane.xlu1 %605 }
 0x1e6   :  { %7218 = vst [vmem:[#allocation15_spill] sm:$0xff] %v4314_v20  ;;  %vm622_vm13 = vcmp.eq.f32.partialorder %v4172_v35, %v4314_v20 }
 0x1e7   :  { %v638_v51 = vsel %vm622_vm13, %v3863_v48, 16 }
 0x1e8   :  { %v4326_v8 = vsel %vm558_vm2, %v638_v51, 2147483647 }
 0x1e9   :  { %v866_v47 = vshra.s32 %v4326_v8, 16 }
 0x1eb   :  { %v4330_v22 = vcvt.s32.f32 %v866_v47 }
 0x1ed   :  { %678 = vmin.xlane.f32.xlu2 %v677_v29 }
 0x1f5   :  { %693 = vmin.xlane.f32.xlu2 %v692_v38  ;;  %v715_v38 = vand.u32 65535, %v4229_v43  ;;  %v730_v43 = vand.u32 65535, %v4250_v15  ;;  %v745_v15 = vand.u32 65535, %v4272_v14  ;;  %v760_v14 = vand.u32 65535, %v4196_v0 }
 0x1f7   :  { %v717_v52 = vcvt.s32.f32 %v715_v38  ;;  %v732_v38 = vcvt.s32.f32 %v730_v43  ;;  %v762_v43 = vcvt.s32.f32 %v760_v14 }
 0x1fd   :  { %708 = vmin.xlane.f32.xlu2 %v707_v59 }
 0x205   :  { %854 = vmin.xlane.f32.xlu2 %v4323_v58 }
 0x20d   :  { %869 = vmin.xlane.f32.xlu2 %v4330_v22 }
 0x21f   :  { %v4333_v29 = vpop.xlane.xlu0 %764 }
 0x220   :  { %vm766_vm6 = vcmp.eq.f32.partialorder %v4200_v9, %v4333_v29 }
 0x227   :  { %v4335_v16 = vpop.xlane.xlu0 %779 }
 0x228   :  { %vm781_vm8 = vcmp.eq.f32.partialorder %v4209_v18, %v4335_v16 }
 0x22f   :  { %v4337_v34 = vpop.xlane.xlu0 %794 }
 0x230   :  { %vm796_vm10 = vcmp.eq.f32.partialorder %v4226_v4, %v4337_v34 }
 0x237   :  { %v4341_v63 = vpop.xlane.xlu0 %719 }
 0x238   :  { %v4343_v59 = vpop.xlane.xlu2 %809  ;;  %vm721_vm14 = vcmp.eq.f32.partialorder %v4245_v53, %v4341_v63  ;;  %v822_v53 = vcvt.s32.f32 %v820_v44 }
 0x239   :  { %v722_v51 = vsel %vm721_vm14, %v717_v52, inf  ;;  %vm811_vm15 = vcmp.eq.f32.partialorder %v4247_v26, %v4343_v59 }
 0x23a   :  { %723 = vmin.xlane.f32.xlu1 %v722_v51  ;;  %v812_v47 = vsel %vm811_vm15, %v807_v31, inf  ;;  %v747_v31 = vcvt.s32.f32 %v745_v15 }
 0x23b   :  { %813 = vmin.xlane.f32.xlu0 %v812_v47 }
 0x23f   :  { %v4351_v20 = vpop.xlane.xlu0 %734 }
 0x240   :  { %v4353_v2 = vpop.xlane.xlu2 %824  ;;  %vm736_vm1 = vcmp.eq.f32.partialorder %v4267_v36, %v4351_v20  ;;  %v837_v36 = vcvt.s32.f32 %v835_v17 }
 0x241   :  { %v737_v54 = vsel %vm736_vm1, %v732_v38, inf  ;;  %vm826_vm3 = vcmp.eq.f32.partialorder %v4269_v19, %v4353_v2  ;;  %v652_v38 = vshll.u32 %v651_v24, 16 }
 0x242   :  { %738 = vmin.xlane.f32.xlu1 %v737_v54  ;;  %v827_v26 = vsel %vm826_vm3, %v822_v53, inf }
 0x243   :  { %828 = vmin.xlane.f32.xlu0 %v827_v26  ;;  %v666_v26 = vcvt.f32.s32 %v4182_v49 }
 0x247   :  { %v4361_v52 = vpop.xlane.xlu0 %749 }
 0x248   :  { %v4363_v51 = vpop.xlane.xlu2 %839  ;;  %vm751_vm4 = vcmp.eq.f32.partialorder %v4286_v42, %v4361_v52  ;;  %v767_v42 = vsel %vm766_vm6, %v762_v43, inf }
 0x249   :  { %v752_v47 = vsel %vm751_vm4, %v747_v31, inf  ;;  %vm841_vm5 = vcmp.eq.f32.partialorder %v4288_v3, %v4363_v51  ;;  %v775_v3 = vand.u32 65535, %v4203_v12  ;;  %v667_v12 = vshll.u32 %v666_v26, 16 }
 0x24a   :  { %753 = vmin.xlane.f32.xlu1 %v752_v47  ;;  %v842_v19 = vsel %vm841_vm5, %v837_v36, inf  ;;  %v790_v36 = vand.u32 65535, %v4222_v25 }
 0x24b   :  { %843 = vmin.xlane.f32.xlu0 %v842_v19  ;;  %v777_v9 = vcvt.s32.f32 %v775_v3 }
 0x24c   :  { %v792_v19 = vcvt.s32.f32 %v790_v36 }
 0x24d   :  { %v782_v17 = vsel %vm781_vm8, %v777_v9, inf }
 0x24e   :  { %v797_v24 = vsel %vm796_vm10, %v792_v19, inf  ;;  %v865_v19 = vand.u32 65535, %v4326_v8 }
 0x250   :  { %v649_v44 = vpop.xlane.xlu2 %648 }
 0x251   :  { %v650_v53 = vcvt.f32.s32 %v649_v44  ;;  %v696_v44 = vcvt.f32.s32 %v4205_v13  ;;  %v711_v13 = vcvt.f32.s32 %v4218_v62 }
 0x252   :  { %768 = vmin.xlane.f32.xlu1 %v767_v42 }
 0x253   :  { %v4373_v54 = vadd.s32 %v652_v38, %v650_v53  ;;  %v697_v53 = vshll.u32 %v696_v44, 16  ;;  %v712_v9 = vshll.u32 %v711_v13, 16  ;;  %v771_v44 = vcvt.f32.s32 %v4333_v29 }
 0x255   :  { %vm879_vm7 = vcmp.eq.s32.totalorder %v3863_v48, %v4373_v54  ;;  %v772_v8 = vshll.u32 %v771_v44, 16 }
 0x256   :  { %v4383_v30 = vsel %vm879_vm7, inf, %v3922_v45  ;;  %v681_v45 = vcvt.f32.s32 %v4298_v60 }
 0x257   :  { %v1215_v0 = vsel %vm558_vm2, %v4383_v30, inf }
 0x258   :  { %v664_v15 = vpop.xlane.xlu2 %663  ;;  %1216 = vmin.xlane.f32.xlu0 %v1215_v0  ;;  %v682_v25 = vshll.u32 %v681_v45, 16 }
 0x259   :  { %v665_v49 = vcvt.f32.s32 %v664_v15 }
 0x25a   :  { %783 = vmin.xlane.f32.xlu1 %v782_v17  ;;  %v850_v17 = vand.u32 65535, %v4317_v10 }
 0x25b   :  { %v4389_v31 = vadd.s32 %v667_v12, %v665_v49 }
 0x25c   :  { %v852_v36 = vcvt.s32.f32 %v850_v17 }
 0x25d   :  { %vm880_vm9 = vcmp.eq.s32.totalorder %v3863_v48, %v4389_v31 }
 0x25e   :  { %v4399_v18 = vsel %vm880_vm9, inf, %v3942_v11 }
 0x25f   :  { %v1218_v47 = vsel %vm558_vm2, %v4399_v18, inf }
 0x260   :  { %v679_v14 = vpop.xlane.xlu2 %678  ;;  %1219 = vmin.xlane.f32.xlu0 %v1218_v47 }
 0x261   :  { %v680_v60 = vcvt.f32.s32 %v679_v14 }
 0x262   :  { %798 = vmin.xlane.f32.xlu1 %v797_v24 }
 0x263   :  { %v4405_v43 = vadd.s32 %v682_v25, %v680_v60 }
 0x265   :  { %vm881_vm11 = vcmp.eq.s32.totalorder %v3863_v48, %v4405_v43 }
 0x266   :  { %v4414_v11 = vsel %vm881_vm11, inf, %v3963_v32 }
 0x267   :  { %v1221_v4 = vsel %vm558_vm2, %v4414_v11, inf }
 0x268   :  { %v694_v38 = vpop.xlane.xlu2 %693  ;;  %1222 = vmin.xlane.f32.xlu0 %v1221_v4 }
 0x269   :  { %v695_v42 = vcvt.f32.s32 %v694_v38 }
 0x26b   :  { %v4418_v3 = vadd.s32 %v697_v53, %v695_v42 }
 0x26d   :  { %vm882_vm12 = vcmp.eq.s32.totalorder %v3863_v48, %v4418_v3 }
 0x26e   :  { %v4427_v32 = vsel %vm882_vm12, inf, %v3986_v57 }
 0x26f   :  { %7219 = vst [vmem:[#allocation16_spill] sm:$0xff] %v4427_v32  ;;  %v1224_v26 = vsel %vm558_vm2, %v4427_v32, inf }
 0x270   :  { %v709_v0 = vpop.xlane.xlu2 %708  ;;  %1225 = vmin.xlane.f32.xlu0 %v1224_v26 }
 0x271   :  { %v710_v15 = vcvt.f32.s32 %v709_v0 }
 0x273   :  { %v4431_v12 = vadd.s32 %v712_v9, %v710_v15 }
 0x275   :  { %vm883_vm13 = vcmp.eq.s32.totalorder %v3863_v48, %v4431_v12 }
 0x276   :  { %v4439_v62 = vsel %vm883_vm13, inf, %v4004_v23  ;;  %v867_v23 = vcvt.s32.f32 %v865_v19 }
 0x277   :  { %7220 = vst [vmem:[#allocation17_spill] sm:$0xff] %v4439_v62  ;;  %v1227_v57 = vsel %vm558_vm2, %v4439_v62, inf }
 0x278   :  { %1228 = vmin.xlane.f32.xlu0 %v1227_v57  ;;  %v4443_v49 = vpop.xlane.xlu2 %854 }
 0x279   :  { %vm856_vm14 = vcmp.eq.f32.partialorder %v4323_v58, %v4443_v49 }
 0x27a   :  { %v857_v45 = vsel %vm856_vm14, %v852_v36, inf }
 0x280   :  { %858 = vmin.xlane.f32.xlu0 %v857_v45  ;;  %v4448_v47 = vpop.xlane.xlu2 %869  ;;  %v801_v45 = vcvt.f32.s32 %v4337_v34 }
 0x281   :  { %vm871_vm15 = vcmp.eq.f32.partialorder %v4330_v22, %v4448_v47  ;;  %v786_v22 = vcvt.f32.s32 %v4335_v16 }
 0x282   :  { %v872_v14 = vsel %vm871_vm15, %v867_v23, inf }
 0x283   :  { %v787_v9 = vshll.u32 %v786_v22, 16 }
 0x288   :  { %873 = vmin.xlane.f32.xlu0 %v872_v14  ;;  %v726_v14 = vcvt.f32.s32 %v4341_v63 }
 0x2ad   :  { %v724_v25 = vpop.xlane.xlu1 %723 }
 0x2ae   :  { %v4453_v60 = vpop.xlane.xlu0 %813 }
 0x2b5   :  { %v739_v10 = vpop.xlane.xlu1 %738 }
 0x2b6   :  { %v4455_v24 = vpop.xlane.xlu0 %828 }
 0x2bd   :  { %v4457_v58 = vpop.xlane.xlu1 %753 }
 0x2be   :  { %v4460_v4 = vpop.xlane.xlu0 %843 }
 0x2c5   :  { %v769_v38 = vpop.xlane.xlu1 %768 }
 0x2c6   :  { %v770_v53 = vcvt.f32.s32 %v769_v38 }
 0x2c8   :  { %v4462_v42 = vadd.s32 %v772_v8, %v770_v53  ;;  %v802_v8 = vshll.u32 %v801_v45, 16  ;;  %v725_v53 = vcvt.f32.s32 %v724_v25 }
 0x2ca   :  { %7221 = vst [vmem:[#allocation18_spill] sm:$0xff] %v4462_v42  ;;  %vm7179_vm1 = vcmp.eq.s32.totalorder %v3863_v48, %v4462_v42 }
 0x2cb   :  { %v4467_v13 = vpop.xlane.xlu0 %1216  ;;  %v4473_v26 = vsel %vm7179_vm1, inf, %v4084_v1 }
 0x2cc   :  { %7222 = vst [vmem:[#allocation19_spill] sm:$0xff] %v4473_v26  ;;  %vm1263_vm3 = vcmp.eq.f32.partialorder %v4383_v30, %v4467_v13  ;;  %v1239_v29 = vsel %vm558_vm2, %v4473_v26, inf }
 0x2cd   :  { %v1279_v0 = vsel %vm1263_vm3, %v3863_v48, 16  ;;  %1240 = vmin.xlane.f32.xlu2 %v1239_v29  ;;  %v784_v16 = vpop.xlane.xlu1 %783 }
 0x2ce   :  { %v785_v15 = vcvt.f32.s32 %v784_v16  ;;  %v4481_v57 = vsel %vm558_vm2, %v1279_v0, 2147483647  ;;  %v727_v0 = vshll.u32 %v726_v14, 16 }
 0x2cf   :  { %v1297_v17 = vshra.s32 %v4481_v57, 16 }
 0x2d0   :  { %v4484_v36 = vadd.s32 %v787_v9, %v785_v15  ;;  %v4514_v9 = vadd.s32 %v727_v0, %v725_v53 }
 0x2d1   :  { %v4486_v1 = vcvt.s32.f32 %v1297_v17  ;;  %v741_v17 = vcvt.f32.s32 %v4351_v20 }
 0x2d2   :  { %7223 = vst [vmem:[#allocation20_spill] sm:$0xff] %v4484_v36  ;;  %vm7175_vm4 = vcmp.eq.s32.totalorder %v3863_v48, %v4484_v36  ;;  %vm884_vm10 = vcmp.eq.s32.totalorder %v3863_v48, %v4514_v9 }
 0x2d3   :  { %1300 = vmin.xlane.f32.xlu1 %v4486_v1  ;;  %v4492_v19 = vpop.xlane.xlu0 %1219  ;;  %v4498_v23 = vsel %vm7175_vm4, inf, %v4028_v50  ;;  %7226 = vst [vmem:[#allocation23_spill] sm:$0xff] %v4514_v9 }
 0x2d4   :  { %7224 = vst [vmem:[#allocation21_spill] sm:$0xff] %v4498_v23  ;;  %vm1264_vm5 = vcmp.eq.f32.partialorder %v4399_v18, %v4492_v19  ;;  %v1242_v34 = vsel %vm558_vm2, %v4498_v23, inf }
 0x2d5   :  { %v1280_v44 = vsel %vm1264_vm5, %v3863_v48, 16  ;;  %1243 = vmin.xlane.f32.xlu2 %v1242_v34  ;;  %v799_v38 = vpop.xlane.xlu1 %798  ;;  %v740_v34 = vcvt.f32.s32 %v739_v10 }
 0x2d6   :  { %v800_v22 = vcvt.f32.s32 %v799_v38  ;;  %v4507_v29 = vsel %vm558_vm2, %v1280_v44, 2147483647  ;;  %v742_v38 = vshll.u32 %v741_v17, 16 }
 0x2d7   :  { %v1312_v50 = vshra.s32 %v4507_v29, 16 }
 0x2d8   :  { %v4510_v63 = vadd.s32 %v802_v8, %v800_v22  ;;  %v4545_v8 = vsel %vm884_vm10, inf, %v4020_v40  ;;  %v4547_v53 = vadd.s32 %v742_v38, %v740_v34  ;;  %v756_v22 = vcvt.f32.s32 %v4361_v52 }
 0x2d9   :  { %v4512_v16 = vcvt.s32.f32 %v1312_v50  ;;  %7228 = vst [vmem:[#allocation25_spill] sm:$0xff] %v4545_v8  ;;  %v1230_v50 = vsel %vm558_vm2, %v4545_v8, inf  ;;  %v755_v40 = vcvt.f32.s32 %v4457_v58 }
 0x2da   :  { %7225 = vst [vmem:[#allocation22_spill] sm:$0xff] %v4510_v63  ;;  %vm7140_vm6 = vcmp.eq.s32.totalorder %v3863_v48, %v4510_v63  ;;  %vm885_vm15 = vcmp.eq.s32.totalorder %v3863_v48, %v4547_v53  ;;  %v757_v52 = vshll.u32 %v756_v22, 16 }
 0x2db   :  { %1315 = vmin.xlane.f32.xlu1 %v4512_v16  ;;  %v4519_v15 = vpop.xlane.xlu0 %1222  ;;  %v4525_v25 = vsel %vm7140_vm6, inf, %v4130_v55  ;;  %7229 = vst [vmem:[#allocation26_spill] sm:$0xff] %v4547_v53  ;;  %v4571_v34 = vsel %vm885_vm15, inf, %v4034_v6 }
 0x2dc   :  { %7227 = vst [vmem:[#allocation24_spill] sm:$0xff] %v4525_v25  ;;  %vm1265_vm8 = vcmp.eq.f32.partialorder %v4414_v11, %v4519_v15  ;;  %v1245_v45 = vsel %vm558_vm2, %v4525_v25, inf  ;;  %v4574_v58 = vadd.s32 %v757_v52, %v755_v40  ;;  %v1233_v22 = vsel %vm558_vm2, %v4571_v34, inf }
 0x2dd   :  { %v1281_v14 = vsel %vm1265_vm8, %v3863_v48, 16  ;;  %1246 = vmin.xlane.f32.xlu2 %v1245_v45  ;;  %7230 = vst [vmem:[#allocation27_spill] sm:$0xff] %v4571_v34 }
 0x2de   :  { %v4534_v44 = vsel %vm558_vm2, %v1281_v14, 2147483647  ;;  %7231 = vst [vmem:[#allocation28_spill] sm:$0xff] %v4574_v58  ;;  %vm7174_vm5 = vcmp.eq.s32.totalorder %v3863_v48, %v4574_v58 }
 0x2df   :  { %v1327_v55 = vshra.s32 %v4534_v44, 16  ;;  %v4599_v52 = vsel %vm7174_vm5, inf, %v4040_v5 }
 0x2e0   :  { %7233 = vst [vmem:[#allocation30_spill] sm:$0xff] %v4599_v52 }
 0x2e1   :  { %v4539_v20 = vcvt.s32.f32 %v1327_v55  ;;  %v816_v55 = vcvt.f32.s32 %v4343_v59 }
 0x2e3   :  { %1330 = vmin.xlane.f32.xlu1 %v4539_v20  ;;  %v4550_v10 = vpop.xlane.xlu0 %1225  ;;  %v817_v6 = vshll.u32 %v816_v55, 16  ;;  %v831_v55 = vcvt.f32.s32 %v4353_v2  ;;  %v846_v2 = vcvt.f32.s32 %v4363_v51  ;;  %v861_v51 = vcvt.f32.s32 %v4443_v49 }
 0x2e4   :  { %vm1266_vm14 = vcmp.eq.f32.partialorder %v4427_v32, %v4550_v10  ;;  %v876_v49 = vcvt.f32.s32 %v4448_v47 }
 0x2e5   :  { %v1282_v0 = vsel %vm1266_vm14, %v3863_v48, 16  ;;  %1231 = vmin.xlane.f32.xlu2 %v1230_v50  ;;  %v815_v50 = vcvt.f32.s32 %v4453_v60 }
 0x2e6   :  { %v4560_v17 = vsel %vm558_vm2, %v1282_v0, 2147483647 }
 0x2e7   :  { %v1342_v45 = vshra.s32 %v4560_v17, 16 }
 0x2e9   :  { %v4565_v14 = vcvt.s32.f32 %v1342_v45  ;;  %v4591_v45 = vadd.s32 %v817_v6, %v815_v50  ;;  %v832_v50 = vshll.u32 %v831_v55, 16  ;;  %v847_v55 = vshll.u32 %v846_v2, 16 }
 0x2ea   :  { %v862_v2 = vshll.u32 %v861_v51, 16  ;;  %v877_v51 = vshll.u32 %v876_v49, 16 }
 0x2eb   :  { %1345 = vmin.xlane.f32.xlu1 %v4565_v14  ;;  %v4577_v38 = vpop.xlane.xlu0 %1228  ;;  %7232 = vst [vmem:[#allocation29_spill] sm:$0xff] %v4591_v45  ;;  %vm890_vm8 = vcmp.eq.s32.totalorder %v3863_v48, %v4591_v45 }
 0x2ec   :  { %vm1267_vm3 = vcmp.eq.f32.partialorder %v4439_v62, %v4577_v38  ;;  %v4612_v5 = vsel %vm890_vm8, inf, %v4146_v33 }
 0x2ed   :  { %v1283_v0 = vsel %vm1267_vm3, %v3863_v48, 16  ;;  %1234 = vmin.xlane.f32.xlu2 %v1233_v22  ;;  %v830_v22 = vcvt.f32.s32 %v4455_v24  ;;  %7234 = vst [vmem:[#allocation31_spill] sm:$0xff] %v4612_v5  ;;  %v1248_v24 = vsel %vm558_vm2, %v4612_v5, inf }
 0x2ee   :  { %v4586_v59 = vsel %vm558_vm2, %v1283_v0, 2147483647  ;;  %v1236_v0 = vsel %vm558_vm2, %v4599_v52, inf }
 0x2ef   :  { %v1357_v40 = vshra.s32 %v4586_v59, 16  ;;  %v4614_v6 = vadd.s32 %v832_v50, %v830_v22 }
 0x2f1   :  { %v4593_v60 = vcvt.s32.f32 %v1357_v40  ;;  %7235 = vst [vmem:[#allocation32_spill] sm:$0xff] %v4614_v6  ;;  %v845_v40 = vcvt.f32.s32 %v4460_v4  ;;  %vm7181_vm14 = vcmp.eq.s32.totalorder %v3863_v48, %v4614_v6 }
 0x2f2   :  { %v4626_v33 = vsel %vm7181_vm14, inf, %v4155_v56 }
 0x2f3   :  { %1360 = vmin.xlane.f32.xlu1 %v4593_v60  ;;  %7236 = vst [vmem:[#allocation33_spill] sm:$0xff] %v4626_v33  ;;  %v4628_v22 = vadd.s32 %v847_v55, %v845_v40  ;;  %v1251_v50 = vsel %vm558_vm2, %v4626_v33, inf }
 0x2f5   :  { %1237 = vmin.xlane.f32.xlu2 %v1236_v0  ;;  %v859_v0 = vpop.xlane.xlu0 %858  ;;  %7237 = vst [vmem:[#allocation34_spill] sm:$0xff] %v4628_v22  ;;  %vm7158_vm3 = vcmp.eq.s32.totalorder %v3863_v48, %v4628_v22 }
 0x2f6   :  { %v860_v4 = vcvt.f32.s32 %v859_v0 }
 0x2f8   :  { %v4641_v56 = vadd.s32 %v862_v2, %v860_v4 }
 0x2fa   :  { %7239 = vst [vmem:[#allocation36_spill] sm:$0xff] %v4641_v56  ;;  %vm7141_vm0 = vcmp.eq.s32.totalorder %v3863_v48, %v4641_v56  ;;  %v1311_v56 = vand.u32 65535, %v4507_v29 }
 0x2fb   :  { %1249 = vmin.xlane.f32.xlu1 %v1248_v24  ;;  %v4639_v24 = vsel %vm7158_vm3, inf, %v4159_v27  ;;  %v4652_v27 = vsel %vm7141_vm0, inf, %v4168_v28 }
 0x2fc   :  { %7238 = vst [vmem:[#allocation35_spill] sm:$0xff] %v4639_v24  ;;  %v1254_v55 = vsel %vm558_vm2, %v4639_v24, inf  ;;  %v1257_v47 = vsel %vm558_vm2, %v4652_v27, inf }
 0x2fd   :  { %v874_v40 = vpop.xlane.xlu0 %873  ;;  %7240 = vst [vmem:[#allocation37_spill] sm:$0xff] %v4652_v27 }
 0x2fe   :  { %v875_v0 = vcvt.f32.s32 %v874_v40 }
 0x303   :  { %1252 = vmin.xlane.f32.xlu1 %v1251_v50  ;;  %v4654_v50 = vadd.s32 %v877_v51, %v875_v0  ;;  %v1296_v0 = vand.u32 65535, %v4481_v57 }
 0x305   :  { %7241 = vst [vmem:[#allocation38_spill] sm:$0xff] %v4654_v50  ;;  %vm7142_vm6 = vcmp.eq.s32.totalorder %v3863_v48, %v4654_v50 }
 0x306   :  { %v4664_v4 = vsel %vm7142_vm6, inf, %v4172_v35 }
 0x307   :  { %7242 = vst [vmem:[#allocation39_spill] sm:$0xff] %v4664_v4  ;;  %v1260_v2 = vsel %vm558_vm2, %v4664_v4, inf }
 0x30b   :  { %1255 = vmin.xlane.f32.xlu1 %v1254_v55 }
 0x313   :  { %1258 = vmin.xlane.f32.xlu1 %v1257_v47 }
 0x31b   :  { %1261 = vmin.xlane.f32.xlu1 %v1260_v2  ;;  %v1298_v2 = vcvt.s32.f32 %v1296_v0 }
 0x340   :  { %v4668_v28 = vpop.xlane.xlu2 %1240 }
 0x341   :  { %vm1271_vm0 = vcmp.eq.f32.partialorder %v4473_v26, %v4668_v28 }
 0x342   :  { %v1287_v40 = vsel %vm1271_vm0, %v3863_v48, 16 }
 0x343   :  { %v4674_v49 = vsel %vm558_vm2, %v1287_v40, 2147483647 }
 0x344   :  { %v1417_v55 = vshra.s32 %v4674_v49, 16 }
 0x346   :  { %v4678_v35 = vpop.xlane.xlu1 %1300  ;;  %v4680_v51 = vcvt.s32.f32 %v1417_v55 }
 0x347   :  { %vm1302_vm0 = vcmp.eq.f32.partialorder %v4486_v1, %v4678_v35  ;;  %v1313_v1 = vcvt.s32.f32 %v1311_v56 }
 0x348   :  { %1420 = vmin.xlane.f32.xlu0 %v4680_v51  ;;  %v4683_v47 = vpop.xlane.xlu2 %1243  ;;  %v4690_v50 = vsel %vm1302_vm0, %v1298_v2, inf }
 0x349   :  { %vm1272_vm6 = vcmp.eq.f32.partialorder %v4498_v23, %v4683_v47  ;;  %v1326_v23 = vand.u32 65535, %v4534_v44 }
 0x34a   :  { %v1288_v40 = vsel %vm1272_vm6, %v3863_v48, 16 }
 0x34b   :  { %v4693_v57 = vsel %vm558_vm2, %v1288_v40, 2147483647 }
 0x34c   :  { %v1432_v55 = vshra.s32 %v4693_v57, 16 }
 0x34e   :  { %v4697_v63 = vpop.xlane.xlu1 %1315  ;;  %v4699_v0 = vcvt.s32.f32 %v1432_v55 }
 0x34f   :  { %vm1317_vm0 = vcmp.eq.f32.partialorder %v4512_v16, %v4697_v63 }
 0x350   :  { %1435 = vmin.xlane.f32.xlu0 %v4699_v0  ;;  %v4702_v22 = vpop.xlane.xlu2 %1246  ;;  %v1318_v40 = vsel %vm1317_vm0, %v1313_v1, inf }
 0x351   :  { %vm1273_vm6 = vcmp.eq.f32.partialorder %v4525_v25, %v4702_v22  ;;  %v1328_v25 = vcvt.s32.f32 %v1326_v23 }
 0x352   :  { %v1289_v2 = vsel %vm1273_vm6, %v3863_v48, 16 }
 0x353   :  { %v4710_v29 = vsel %vm558_vm2, %v1289_v2, 2147483647 }
 0x354   :  { %v1447_v55 = vshra.s32 %v4710_v29, 16 }
 0x356   :  { %v4714_v26 = vpop.xlane.xlu1 %1330  ;;  %v4716_v62 = vcvt.s32.f32 %v1447_v55  ;;  %v1341_v55 = vand.u32 65535, %v4560_v17 }
 0x357   :  { %vm1332_vm0 = vcmp.eq.f32.partialorder %v4539_v20, %v4714_v26 }
 0x358   :  { %1450 = vmin.xlane.f32.xlu0 %v4716_v62  ;;  %v4719_v56 = vpop.xlane.xlu2 %1231  ;;  %v1333_v1 = vsel %vm1332_vm0, %v1328_v25, inf }
 0x359   :  { %vm1268_vm6 = vcmp.eq.f32.partialorder %v4545_v8, %v4719_v56  ;;  %v1343_v8 = vcvt.s32.f32 %v1341_v55 }
 0x35a   :  { %v1284_v16 = vsel %vm1268_vm6, %v3863_v48, 16 }
 0x35b   :  { %v4727_v44 = vsel %vm558_vm2, %v1284_v16, 2147483647 }
 0x35c   :  { %v1372_v2 = vshra.s32 %v4727_v44, 16 }
 0x35e   :  { %v4731_v58 = vpop.xlane.xlu1 %1345  ;;  %v4733_v36 = vcvt.s32.f32 %v1372_v2  ;;  %v1356_v2 = vand.u32 65535, %v4586_v59 }
 0x35f   :  { %vm1347_vm0 = vcmp.eq.f32.partialorder %v4565_v14, %v4731_v58 }
 0x360   :  { %1375 = vmin.xlane.f32.xlu0 %v4733_v36  ;;  %v4736_v23 = vpop.xlane.xlu2 %1234  ;;  %v1348_v20 = vsel %vm1347_vm0, %v1343_v8, inf }
 0x361   :  { %vm1269_vm6 = vcmp.eq.f32.partialorder %v4571_v34, %v4736_v23  ;;  %v1358_v34 = vcvt.s32.f32 %v1356_v2 }
 0x362   :  { %v1285_v25 = vsel %vm1269_vm6, %v3863_v48, 16 }
 0x363   :  { %v4744_v17 = vsel %vm558_vm2, %v1285_v25, 2147483647 }
 0x364   :  { %v1387_v16 = vshra.s32 %v4744_v17, 16 }
 0x366   :  { %v4748_v42 = vpop.xlane.xlu1 %1360  ;;  %v4750_v32 = vcvt.s32.f32 %v1387_v16 }
 0x367   :  { %vm1362_vm0 = vcmp.eq.f32.partialorder %v4593_v60, %v4748_v42 }
 0x368   :  { %1390 = vmin.xlane.f32.xlu0 %v4750_v32  ;;  %v4753_v55 = vpop.xlane.xlu2 %1237  ;;  %v1363_v14 = vsel %vm1362_vm0, %v1358_v34, inf }
 0x369   :  { %vm1270_vm6 = vcmp.eq.f32.partialorder %v4599_v52, %v4753_v55 }
 0x36a   :  { %v1286_v8 = vsel %vm1270_vm6, %v3863_v48, 16 }
 0x36b   :  { %v4761_v59 = vsel %vm558_vm2, %v1286_v8, 2147483647 }
 0x36c   :  { %v1402_v25 = vshra.s32 %v4761_v59, 16 }
 0x36e   :  { %v4764_v16 = vpop.xlane.xlu1 %1249  ;;  %v4766_v6 = vcvt.s32.f32 %v1402_v25 }
 0x36f   :  { %vm1274_vm3 = vcmp.eq.f32.partialorder %v4612_v5, %v4764_v16 }
 0x370   :  { %v1290_v2 = vsel %vm1274_vm3, %v3863_v48, 16  ;;  %1405 = vmin.xlane.f32.xlu0 %v4766_v6 }
 0x371   :  { %v4773_v60 = vsel %vm558_vm2, %v1290_v2, 2147483647 }
 0x372   :  { %v1462_v34 = vshra.s32 %v4773_v60, 16 }
 0x374   :  { %v4776_v8 = vcvt.s32.f32 %v1462_v34 }
 0x376   :  { %1465 = vmin.xlane.f32.xlu2 %v4776_v8  ;;  %v4779_v52 = vpop.xlane.xlu1 %1252 }
 0x377   :  { %7243 = vst [vmem:[#allocation40_spill] sm:$0xff] %v4779_v52  ;;  %vm1275_vm6 = vcmp.eq.f32.partialorder %v4626_v33, %v4779_v52 }
 0x378   :  { %v1291_v25 = vsel %vm1275_vm6, %v3863_v48, 16 }
 0x379   :  { %v4785_v5 = vsel %vm558_vm2, %v1291_v25, 2147483647 }
 0x37a   :  { %v1477_v45 = vshra.s32 %v4785_v5, 16 }
 0x37c   :  { %v4788_v2 = vcvt.s32.f32 %v1477_v45 }
 0x37e   :  { %1480 = vmin.xlane.f32.xlu2 %v4788_v2  ;;  %v4791_v34 = vpop.xlane.xlu1 %1255 }
 0x37f   :  { %7244 = vst [vmem:[#allocation41_spill] sm:$0xff] %v4791_v34  ;;  %vm1276_vm3 = vcmp.eq.f32.partialorder %v4639_v24, %v4791_v34 }
 0x380   :  { %v1292_v53 = vsel %vm1276_vm3, %v3863_v48, 16 }
 0x381   :  { %v4797_v33 = vsel %vm558_vm2, %v1292_v53, 2147483647 }
 0x382   :  { %v1492_v52 = vshra.s32 %v4797_v33, 16 }
 0x384   :  { %v4800_v25 = vcvt.s32.f32 %v1492_v52 }
 0x386   :  { %1495 = vmin.xlane.f32.xlu2 %v4800_v25  ;;  %v4804_v45 = vpop.xlane.xlu1 %1258 }
 0x387   :  { %7245 = vst [vmem:[#allocation42_spill] sm:$0xff] %v4804_v45  ;;  %vm1277_vm0 = vcmp.eq.f32.partialorder %v4652_v27, %v4804_v45 }
 0x388   :  { %v1293_v24 = vsel %vm1277_vm0, %v3863_v48, 16 }
 0x389   :  { %v4812_v34 = vsel %vm558_vm2, %v1293_v24, 2147483647 }
 0x38a   :  { %v1507_v52 = vshra.s32 %v4812_v34, 16 }
 0x38e   :  { %1304 = vmin.xlane.f32.xlu2 %v4690_v50  ;;  %v4809_v53 = vpop.xlane.xlu1 %1261 }
 0x38f   :  { %7246 = vst [vmem:[#allocation43_spill] sm:$0xff] %v4809_v53  ;;  %vm1278_vm6 = vcmp.eq.f32.partialorder %v4664_v4, %v4809_v53 }
 0x390   :  { %v1294_v50 = vsel %vm1278_vm6, %v3863_v48, 16 }
 0x396   :  { %1319 = vmin.xlane.f32.xlu2 %v1318_v40  ;;  %v4818_v40 = vcvt.s32.f32 %v1507_v52  ;;  %v1371_v52 = vand.u32 65535, %v4727_v44  ;;  %v4845_v44 = vadd.f32 1e-08, %v4046_v21  ;;  %v1416_v21 = vand.u32 65535, %v4674_v49 }
 0x398   :  { %3554 = vrcp.f32 %v4845_v44 }
 0x39e   :  { %1334 = vmin.xlane.f32.xlu2 %v1333_v1  ;;  %v4821_v1 = vsel %vm558_vm2, %v1294_v50, 2147483647  ;;  %v1373_v50 = vcvt.s32.f32 %v1371_v52  ;;  %v1401_v52 = vand.u32 65535, %v4761_v59  ;;  %v4861_v59 = vpop.eup %3554 }
 0x39f   :  { %7247 = vst [vmem:[#allocation44_spill] sm:$0xff] %v4821_v1  ;;  %v912_v49 = vmul.f32 %v4861_v59, %v4845_v44 }
 0x3a6   :  { %1349 = vmin.xlane.f32.xlu2 %v1348_v20  ;;  %v1522_v20 = vshra.s32 %v4821_v1, 16  ;;  %v1386_v1 = vand.u32 65535, %v4744_v17 }
 0x3a8   :  { %v4827_v24 = vcvt.s32.f32 %v1522_v20  ;;  %v1388_v9 = vcvt.s32.f32 %v1386_v1  ;;  %v1461_v1 = vand.u32 65535, %v4773_v60 }
 0x3aa   :  { %7248 = vst [vmem:[#allocation45_spill] sm:$0xff] %v4827_v24 }
 0x3ae   :  { %1364 = vmin.xlane.f32.xlu2 %v1363_v14 }
 0x3b6   :  { %1510 = vmin.xlane.f32.xlu2 %v4818_v40 }
 0x3bb   :  { %v4825_v27 = vpop.xlane.xlu0 %1420 }
 0x3be   :  { %1525 = vmin.xlane.f32.xlu2 %v4827_v24 }
 0x3c3   :  { %v4830_v14 = vpop.xlane.xlu0 %1435 }
 0x3c4   :  { %7249 = vst [vmem:[#allocation46_spill] sm:$0xff] %v4830_v14 }
 0x3cb   :  { %v4832_v4 = vpop.xlane.xlu0 %1450 }
 0x3cc   :  { %7250 = vst [vmem:[#allocation47_spill] sm:$0xff] %v4832_v4  ;;  %vm1452_vm5 = vcmp.eq.f32.partialorder %v4716_v62, %v4832_v4 }
 0x3d3   :  { %v4835_v53 = vpop.xlane.xlu0 %1375 }
 0x3d4   :  { %vm1377_vm3 = vcmp.eq.f32.partialorder %v4733_v36, %v4835_v53 }
 0x3d5   :  { %v1378_v45 = vsel %vm1377_vm3, %v1373_v50, inf  ;;  %v1463_v50 = vcvt.s32.f32 %v1461_v1 }
 0x3d6   :  { %1379 = vmin.xlane.f32.xlu1 %v1378_v45  ;;  %v1403_v45 = vcvt.s32.f32 %v1401_v52  ;;  %v1476_v52 = vand.u32 65535, %v4785_v5 }
 0x3db   :  { %v4840_v20 = vpop.xlane.xlu0 %1390 }
 0x3dc   :  { %vm1392_vm0 = vcmp.eq.f32.partialorder %v4750_v32, %v4840_v20  ;;  %v4855_v32 = vadd.f32 1e-08, %v4057_v46 }
 0x3dd   :  { %v1393_v24 = vsel %vm1392_vm0, %v1388_v9, inf  ;;  %v4859_v9 = vadd.f32 1e-08, %v4467_v13  ;;  %vm1422_vm0 = vcmp.eq.f32.partialorder %v4680_v51, %v4825_v27  ;;  %v4873_v13 = vadd.f32 1e-08, %v4073_v41 }
 0x3de   :  { %1394 = vmin.xlane.f32.xlu1 %v1393_v24  ;;  %3556 = vrcp.f32 %v4855_v32  ;;  %v913_v51 = vsub.f32 1.0, %v912_v49  ;;  %v1478_v41 = vcvt.s32.f32 %v1476_v52  ;;  %v1491_v49 = vand.u32 65535, %v4797_v33 }
 0x3df   :  { %3558 = vrcp.f32 %v4859_v9  ;;  %v1446_v52 = vand.u32 65535, %v4710_v29  ;;  %v920_v29 = vand.u32 2147483647, %v4845_v44 }
 0x3e0   :  { %3560 = vrcp.f32 %v4873_v13 }
 0x3e3   :  { %v4849_v36 = vpop.xlane.xlu0 %1405 }
 0x3e4   :  { %vm1407_vm6 = vcmp.eq.f32.partialorder %v4766_v6, %v4849_v36  ;;  %v1418_v6 = vcvt.s32.f32 %v1416_v21 }
 0x3e5   :  { %v1408_v17 = vsel %vm1407_vm6, %v1403_v45, inf  ;;  %v4880_v45 = vadd.f32 1e-08, %v4492_v19  ;;  %v914_v19 = vmul.f32 %v4861_v59, %v913_v51 }
 0x3e6   :  { %1409 = vmin.xlane.f32.xlu1 %v1408_v17  ;;  %v1423_v60 = vsel %vm1422_vm0, %v1418_v6, inf  ;;  %v4882_v17 = vpop.eup %3556  ;;  %vm917_vm0 = vweird.f32 %v4861_v59 }
 0x3e7   :  { %v4886_v21 = vpop.eup %3558  ;;  %3562 = vrcp.f32 %v4880_v45 }
 0x3e9   :  { %v4863_v24 = vpop.xlane.xlu2 %1465 }
 0x3ea   :  { %vm1467_vm3 = vcmp.eq.f32.partialorder %v4776_v8, %v4863_v24  ;;  %v1431_v8 = vand.u32 65535, %v4693_v57 }
 0x3eb   :  { %v1468_v46 = vsel %vm1467_vm3, %v1463_v50, inf  ;;  %vm1437_vm3 = vcmp.eq.f32.partialorder %v4699_v0, %v4830_v14  ;;  %v927_v50 = vmul.f32 %v4882_v17, %v4855_v32  ;;  %v4902_v0 = vadd.f32 1e-08, %v4095_v7 }
 0x3ec   :  { %1469 = vmin.xlane.f32.xlu0 %v1468_v46  ;;  %v1433_v57 = vcvt.s32.f32 %v1431_v8  ;;  %v1568_v46 = vmul.f32 %v4886_v21, %v4859_v9  ;;  %v915_v8 = vadd.f32 %v4861_v59, %v914_v19 }
 0x3ed   :  { %v928_v51 = vsub.f32 1.0, %v927_v50  ;;  %3564 = vrcp.f32 %v4902_v0  ;;  %v937_v50 = vand.u32 2147483648, %v4855_v32 }
 0x3ee   :  { %1424 = vmin.xlane.f32.xlu1 %v1423_v60  ;;  %v1438_v6 = vsel %vm1437_vm3, %v1433_v57, inf  ;;  %v922_v60 = vand.u32 2147483648, %v4845_v44  ;;  %v1569_v7 = vsub.f32 1.0, %v1568_v46  ;;  %v1493_v57 = vcvt.s32.f32 %v1491_v49 }
 0x3ef   :  { %v1448_v46 = vcvt.s32.f32 %v1446_v52  ;;  %v935_v52 = vand.u32 2147483647, %v4855_v32 }
 0x3f0   :  { %v923_v14 = vor.u32 1.1754944e-38, %v922_v60 }
 0x3f1   :  { %v4884_v1 = vpop.xlane.xlu2 %1480  ;;  %v1453_v4 = vsel %vm1452_vm5, %v1448_v46, inf  ;;  %vm1573_vm5 = vweird.f32 %v4886_v21 }
 0x3f2   :  { %7251 = vst [vmem:[#allocation48_spill] sm:$0xff] %v4884_v1  ;;  %vm1482_vm6 = vcmp.eq.f32.partialorder %v4788_v2, %v4884_v1  ;;  %v4899_v2 = vpop.eup %3560 }
 0x3f3   :  { %v1483_v5 = vsel %vm1482_vm6, %v1478_v41, inf  ;;  %v4909_v41 = vadd.f32 1e-08, %v4519_v15  ;;  %v942_v33 = vmul.f32 %v4899_v2, %v4873_v13  ;;  %vm916_vm6 = vweird.f32 %v4845_v44 }
 0x3f4   :  { %1484 = vmin.xlane.f32.xlu0 %v1483_v5  ;;  %vm4924_vm4 = vmor %vm916_vm6, %vm917_vm0  ;;  %v929_v44 = vmul.f32 %v4882_v17, %v928_v51  ;;  %vm921_vm0 = vcmp.eq.f32.partialorder %v920_v29, 8.507059e+37  ;;  %vm931_vm6 = vweird.f32 %v4855_v32  ;;  %v950_v51 = vand.u32 2147483647, %v4873_v13 }
 0x3f5   :  { %v919_v49 = vsel %vm4924_vm4, %v4861_v59, %v915_v8  ;;  %3566 = vrcp.f32 %v4909_v41  ;;  %v1307_v59 = vcvt.f32.s32 %v4678_v35  ;;  %vm932_vm4 = vweird.f32 %v4882_v17 }
 0x3f6   :  { %1439 = vmin.xlane.f32.xlu1 %v1438_v6  ;;  %v4916_v6 = vpop.eup %3562  ;;  %v4940_v60 = vsel %vm921_vm0, %v923_v14, %v919_v49  ;;  %v4943_v8 = vor.u32 1.1754944e-38, %v937_v50  ;;  %v952_v29 = vand.u32 2147483648, %v4873_v13  ;;  %vm1572_vm0 = vweird.f32 %v4859_v9 }
 0x3f7   :  { %v1583_v62 = vmul.f32 %v4916_v6, %v4880_v45  ;;  %v1308_v46 = vshll.u32 %v1307_v59, 16  ;;  %vm947_vm1 = vweird.f32 %v4899_v2 }
 0x3f9   :  { %v4914_v5 = vpop.xlane.xlu2 %1495  ;;  %v1584_v14 = vsub.f32 1.0, %v1583_v62 }
 0x3fa   :  { %7252 = vst [vmem:[#allocation49_spill] sm:$0xff] %v4914_v5  ;;  %vm1497_vm3 = vcmp.eq.f32.partialorder %v4800_v25, %v4914_v5  ;;  %v943_v25 = vsub.f32 1.0, %v942_v33  ;;  %v1570_v5 = vmul.f32 %v4886_v21, %v1569_v7  ;;  %v4946_v33 = vpop.eup %3564  ;;  %v4949_v7 = vadd.f32 1e-08, %v4116_v37 }
 0x3fb   :  { %v1498_v19 = vsel %vm1497_vm3, %v1493_v57, inf  ;;  %v4952_v57 = vadd.f32 %v4882_v17, %v929_v44  ;;  %v4964_v37 = vadd.f32 1e-08, %v4176_v39  ;;  %v1578_v44 = vand.u32 2147483648, %v4859_v9  ;;  %vm4976_vm3 = vmor %vm931_vm6, %vm932_vm4 }
 0x3fc   :  { %1499 = vmin.xlane.f32.xlu0 %v1498_v19  ;;  %v944_v35 = vmul.f32 %v4899_v2, %v943_v25  ;;  %v1571_v50 = vadd.f32 %v4886_v21, %v1570_v5  ;;  %v4961_v19 = vpop.eup %3566  ;;  %v4970_v25 = vadd.f32 1e-08, %v4180_v61  ;;  %v1576_v39 = vand.u32 2147483647, %v4859_v9  ;;  %vm4992_vm6 = vmor %vm1572_vm0, %vm1573_vm5  ;;  %v7270_v9 = vld [vmem:[#allocation8_spill] sm:$0xff] }
 0x3fd   :  { %v934_v62 = vsel %vm4976_vm3, %v4882_v17, %v4952_v57  ;;  %vm4997_vm4 = vcmp.eq.f32.partialorder %v935_v52, 8.507059e+37  ;;  %v1598_v17 = vmul.f32 %v4961_v19, %v4909_v41  ;;  %v1585_v57 = vmul.f32 %v4916_v6, %v1584_v14 }
 0x3fe   :  { %1454 = vmin.xlane.f32.xlu1 %v1453_v4  ;;  %v4956_v4 = vadd.f32 1e-08, %v4550_v10  ;;  %v957_v10 = vmul.f32 %v4946_v33, %v4902_v0  ;;  %v1575_v59 = vsel %vm4992_vm6, %v4886_v21, %v1571_v50  ;;  %v1579_v52 = vor.u32 1.1754944e-38, %v1578_v44 }
 0x3ff   :  { %vm1577_vm5 = vcmp.eq.f32.partialorder %v1576_v39, 8.507059e+37  ;;  %v1151_v21 = vsel %vm879_vm7, %v4940_v60, 0.0  ;;  %v5021_v14 = vadd.f32 1e-08, %v4577_v38  ;;  %vm1588_vm0 = vweird.f32 %v4916_v6 }
 0x400   :  { %3568 = vrcp.f32 %v4956_v4  ;;  %v958_v1 = vsub.f32 1.0, %v957_v10  ;;  %v1586_v10 = vadd.f32 %v4916_v6, %v1585_v57  ;;  %vm1587_vm7 = vweird.f32 %v4880_v45 }
 0x401   :  { %v1305_v15 = vpop.xlane.xlu2 %1304  ;;  %3570 = vrcp.f32 %v4949_v7  ;;  %v1591_v57 = vand.u32 2147483647, %v4880_v45  ;;  %vm946_vm6 = vweird.f32 %v4873_v13  ;;  %vm5056_vm14 = vmor %vm1587_vm7, %vm1588_vm0  ;;  %vm961_vm7 = vweird.f32 %v4902_v0 }
 0x402   :  { %v1306_v49 = vcvt.f32.s32 %v1305_v15  ;;  %3572 = vrcp.f32 %v4964_v37  ;;  %v5009_v15 = vadd.f32 %v4899_v2, %v944_v35  ;;  %v1599_v35 = vsub.f32 1.0, %v1598_v17  ;;  %vm5075_vm0 = vmor %vm946_vm6, %vm947_vm1 }
 0x403   :  { %3574 = vrcp.f32 %v4970_v25  ;;  %v959_v17 = vmul.f32 %v4946_v33, %v958_v1  ;;  %vm1592_vm1 = vcmp.eq.f32.partialorder %v1591_v57, 8.507059e+37  ;;  %vm1602_vm6 = vweird.f32 %v4909_v41 }
 0x404   :  { %v4988_v61 = vadd.s32 %v1308_v46, %v1306_v49  ;;  %v1322_v46 = vcvt.f32.s32 %v4697_v63  ;;  %v7261_v49 = vld [vmem:[#allocation7_spill] sm:$0xff]  ;;  %v5025_v63 = vsel %vm1577_vm5, %v1579_v52, %v1575_v59  ;;  %v1593_v59 = vand.u32 2147483648, %v4880_v45 }
 0x405   :  { %v5014_v5 = vadd.f32 1e-08, %v7261_v49  ;;  %vm5047_vm5 = vcmp.eq.f32.partialorder %v950_v51, 8.507059e+37  ;;  %v953_v45 = vor.u32 1.1754944e-38, %v952_v29  ;;  %v1590_v51 = vsel %vm5056_vm14, %v4916_v6, %v1586_v10 }
 0x406   :  { %vm1535_vm3 = vcmp.eq.s32.totalorder %v3863_v48, %v4988_v61  ;;  %v5033_v54 = vpop.eup %3568  ;;  %v1323_v38 = vshll.u32 %v1322_v46, 16  ;;  %v1337_v29 = vcvt.f32.s32 %v4714_v26 }
 0x407   :  { %v1807_v44 = vsel %vm1535_vm3, %v5025_v63, 0.0  ;;  %v5038_v52 = vpop.eup %3570  ;;  %3576 = vrcp.f32 %v5014_v5  ;;  %v1613_v13 = vmul.f32 %v5033_v54, %v4956_v4 }
 0x408   :  { %v5035_v32 = vadd.f32 %v1807_v44, %v1151_v21  ;;  %v5044_v49 = vpop.eup %3572  ;;  %3578 = vrcp.f32 %v5021_v14  ;;  %v1600_v44 = vmul.f32 %v4961_v19, %v1599_v35  ;;  %v972_v6 = vmul.f32 %v5038_v52, %v4949_v7 }
 0x409   :  { %v1320_v50 = vpop.xlane.xlu2 %1319  ;;  %v5091_v35 = vadd.f32 1e-08, %v7270_v9  ;;  %v1338_v1 = vshll.u32 %v1337_v29, 16 }
 0x40a   :  { %v1321_v39 = vcvt.f32.s32 %v1320_v50  ;;  %7262 = vst [vmem:[#allocation7_spill] sm:$0xff] %v5035_v32  ;;  %v5060_v50 = vpop.eup %3574  ;;  %v1594_v32 = vor.u32 1.1754944e-38, %v1593_v59  ;;  %v1601_v57 = vadd.f32 %v4961_v19, %v1600_v44  ;;  %v987_v44 = vmul.f32 %v5044_v49, %v4964_v37 }
 0x40b   :  { %3580 = vrcp.f32 %v5091_v35 }
 0x40c   :  { %v5052_v21 = vadd.s32 %v1323_v38, %v1321_v39  ;;  %v5071_v38 = vsel %vm4997_vm4, %v4943_v8, %v934_v62  ;;  %v949_v8 = vsel %vm5075_vm0, %v4899_v2, %v5009_v15  ;;  %v5088_v62 = vadd.f32 %v4946_v33, %v959_v17 }
 0x40d   :  { %7267 = vst [vmem:[#allocation50_spill] sm:$0xff] %v5071_v38  ;;  %v1152_v26 = vsel %vm880_vm9, %v5071_v38, 0.0  ;;  %v5099_v10 = vsel %vm1592_vm1, %v1594_v32, %v1590_v51  ;;  %v5101_v59 = vpop.eup %3576  ;;  %v1614_v2 = vsub.f32 1.0, %v1613_v13  ;;  %vm1603_vm4 = vweird.f32 %v4961_v19 }
 0x40e   :  { %vm1536_vm14 = vcmp.eq.s32.totalorder %v3863_v48, %v5052_v21  ;;  %7271 = vst [vmem:[#allocation8_spill] sm:$0xff] %v5099_v10  ;;  %v5109_v31 = vpop.eup %3578  ;;  %v1608_v32 = vand.u32 2147483648, %v4909_v41  ;;  %vm962_vm9 = vweird.f32 %v4946_v33  ;;  %v973_v13 = vsub.f32 1.0, %v972_v6  ;;  %vm5129_vm0 = vmor %vm1602_vm6, %vm1603_vm4 }
 0x40f   :  { %v1808_v17 = vsel %vm1536_vm14, %v5099_v10, 0.0  ;;  %v1606_v51 = vand.u32 2147483647, %v4909_v41  ;;  %v5121_v10 = vmul.f32 %v5060_v50, %v4970_v25  ;;  %v5125_v29 = vsel %vm5047_vm5, %v953_v45, %v949_v8  ;;  %vm5146_vm5 = vmor %vm961_vm7, %vm962_vm9 }
 0x410   :  { %v5111_v9 = vadd.f32 %v1808_v17, %v1152_v26  ;;  %v5135_v41 = vmul.f32 %v5101_v59, %v5014_v5  ;;  %v1628_v6 = vmul.f32 %v5109_v31, %v5021_v14  ;;  %v1605_v17 = vsel %vm5129_vm0, %v4961_v19, %v1601_v57 }
 0x411   :  { %v1335_v15 = vpop.xlane.xlu2 %1334  ;;  %v1615_v46 = vmul.f32 %v5033_v54, %v1614_v2  ;;  %v965_v8 = vand.u32 2147483647, %v4902_v0  ;;  %v964_v19 = vsel %vm5146_vm5, %v4946_v33, %v5088_v62  ;;  %v967_v2 = vand.u32 2147483648, %v4902_v0 }
 0x412   :  { %v1336_v39 = vcvt.f32.s32 %v1335_v15  ;;  %7272 = vst [vmem:[#allocation51_spill] sm:$0xff] %v5111_v9  ;;  %v974_v57 = vmul.f32 %v5038_v52, %v973_v13  ;;  %vm1607_vm1 = vcmp.eq.f32.partialorder %v1606_v51, 8.507059e+37  ;;  %v7277_v15 = vld [vmem:[#allocation9_spill] sm:$0xff]  ;;  %v1153_v38 = vsel %vm881_vm11, %v5125_v29, 0.0 }
 0x413   :  { %v5159_v9 = vadd.f32 1e-08, %v7277_v15  ;;  %v1616_v62 = vadd.f32 %v5033_v54, %v1615_v46  ;;  %vm1618_vm4 = vweird.f32 %v5033_v54  ;;  %v1623_v45 = vand.u32 2147483648, %v4956_v4  ;;  %v5185_v15 = vpop.eup %3580 }
 0x414   :  { %v5127_v26 = vadd.s32 %v1338_v1, %v1336_v39  ;;  %v1352_v1 = vcvt.f32.s32 %v4731_v58  ;;  %v1609_v39 = vor.u32 1.1754944e-38, %v1608_v32  ;;  %v1629_v32 = vsub.f32 1.0, %v1628_v6 }
 0x415   :  { %vm5178_vm11 = vcmp.eq.f32.partialorder %v965_v8, 8.507059e+37  ;;  %v980_v6 = vand.u32 2147483647, %v4949_v7  ;;  %vm1617_vm9 = vweird.f32 %v4956_v4  ;;  %v975_v46 = vadd.f32 %v5038_v52, %v974_v57  ;;  %v7290_v8 = vld [vmem:[#allocation11_spill] sm:$0xff] }
 0x416   :  { %vm1537_vm7 = vcmp.eq.s32.totalorder %v3863_v48, %v5127_v26  ;;  %v5167_v58 = vsel %vm1607_vm1, %v1609_v39, %v1605_v17  ;;  %v1353_v13 = vshll.u32 %v1352_v1, 16  ;;  %v1621_v39 = vand.u32 2147483647, %v4956_v4  ;;  %vm5191_vm0 = vmor %vm1617_vm9, %vm1618_vm4 }
 0x417   :  { %v1809_v0 = vsel %vm1537_vm7, %v5167_v58, 0.0  ;;  %vm977_vm6 = vweird.f32 %v5038_v52  ;;  %vm976_vm5 = vweird.f32 %v4949_v7  ;;  %v1620_v4 = vsel %vm5191_vm0, %v5033_v54, %v1616_v62 }
 0x418   :  { %v5175_v43 = vadd.f32 %v1809_v0, %v1153_v38  ;;  %v988_v38 = vsub.f32 1.0, %v987_v44  ;;  %v1630_v0 = vmul.f32 %v5109_v31, %v1629_v32  ;;  %3582 = vrcp.f32 %v5159_v9  ;;  %vm5209_vm1 = vmor %vm976_vm5, %vm977_vm6 }
 0x419   :  { %v1350_v33 = vpop.xlane.xlu2 %1349  ;;  %v982_v57 = vand.u32 2147483648, %v4949_v7  ;;  %v1367_v44 = vcvt.f32.s32 %v4748_v42  ;;  %vm5213_vm4 = vcmp.eq.f32.partialorder %v980_v6, 8.507059e+37  ;;  %vm1622_vm9 = vcmp.eq.f32.partialorder %v1621_v39, 8.507059e+37 }
 0x41a   :  { %v1351_v51 = vcvt.f32.s32 %v1350_v33  ;;  %7278 = vst [vmem:[#allocation9_spill] sm:$0xff] %v5175_v43  ;;  %v968_v33 = vor.u32 1.1754944e-38, %v967_v2  ;;  %v979_v42 = vsel %vm5209_vm1, %v5038_v52, %v975_v46  ;;  %v989_v7 = vmul.f32 %v5044_v49, %v988_v38 }
 0x41b   :  { %v1631_v43 = vadd.f32 %v5109_v31, %v1630_v0  ;;  %vm1633_vm6 = vweird.f32 %v5109_v31  ;;  %v1638_v39 = vand.u32 2147483648, %v5021_v14  ;;  %v983_v3 = vor.u32 1.1754944e-38, %v982_v57  ;;  %v7293_v57 = vld [vmem:[#allocation12_spill] sm:$0xff] }
 0x41c   :  { %v5189_v1 = vadd.s32 %v1353_v13, %v1351_v51  ;;  %v1624_v13 = vor.u32 1.1754944e-38, %v1623_v45  ;;  %v1017_v51 = vmul.f32 %v5185_v15, %v5091_v35  ;;  %v5207_v2 = vsel %vm5178_vm11, %v968_v33, %v964_v19 }
 0x41d   :  { %7283 = vst [vmem:[#allocation52_spill] sm:$0xff] %v5207_v2  ;;  %v1154_v32 = vsel %vm882_vm12, %v5207_v2, 0.0  ;;  %vm991_vm11 = vweird.f32 %v4964_v37  ;;  %v1368_v45 = vshll.u32 %v1367_v44, 16  ;;  %vm992_vm12 = vweird.f32 %v5044_v49 }
 0x41e   :  { %vm1538_vm0 = vcmp.eq.s32.totalorder %v3863_v48, %v5189_v1  ;;  %v5223_v19 = vsel %vm1622_vm9, %v1624_v13, %v1620_v4  ;;  %vm1632_vm5 = vweird.f32 %v5021_v14  ;;  %v1636_v46 = vand.u32 2147483647, %v5021_v14  ;;  %v5242_v38 = vpop.eup %3582 }
 0x41f   :  { %7288 = vst [vmem:[#allocation53_spill] sm:$0xff] %v5223_v19  ;;  %v1810_v52 = vsel %vm1538_vm0, %v5223_v19, 0.0  ;;  %v5245_v33 = vadd.f32 1e-08, %v7290_v8  ;;  %v995_v4 = vand.u32 2147483647, %v4964_v37  ;;  %vm5251_vm1 = vmor %vm1632_vm5, %vm1633_vm6  ;;  %v5260_v14 = vsel %vm5213_vm4, %v983_v3, %v979_v42 }
 0x420   :  { %v5236_v6 = vadd.f32 %v1810_v52, %v1154_v32  ;;  %v997_v0 = vand.u32 2147483648, %v4964_v37  ;;  %v5256_v32 = vadd.f32 1e-08, %v7293_v57  ;;  %7294 = vst [vmem:[#allocation11_spill] sm:$0xff] %v5260_v14  ;;  %v1635_v52 = vsel %vm5251_vm1, %v5109_v31, %v1631_v43  ;;  %v7295_v19 = vld [vmem:[#allocation10_spill] sm:$0xff]  ;;  %vm5297_vm6 = vmor %vm991_vm11, %vm992_vm12 }
 0x421   :  { %v1365_v62 = vpop.xlane.xlu2 %1364  ;;  %v1018_v8 = vsub.f32 1.0, %v1017_v51  ;;  %v1032_v57 = vmul.f32 %v5242_v38, %v5159_v9  ;;  %v5271_v2 = vadd.f32 1e-08, %v7295_v19  ;;  %v1048_v54 = vsub.f32 1.0, %v5135_v41 }
 0x422   :  { %v1366_v17 = vcvt.f32.s32 %v1365_v62  ;;  %7289 = vst [vmem:[#allocation54_spill] sm:$0xff] %v5236_v6  ;;  %v1506_v62 = vand.u32 65535, %v4812_v34  ;;  %v1639_v6 = vor.u32 1.1754944e-38, %v1638_v39  ;;  %vm1637_vm4 = vcmp.eq.f32.partialorder %v1636_v46, 8.507059e+37  ;;  %v7296_v34 = vld [vmem:[#allocation13_spill] sm:$0xff] }
 0x423   :  { %3584 = vrcp.f32 %v5245_v33  ;;  %v5276_v42 = vadd.f32 1e-08, %v7296_v34  ;;  %v1155_v31 = vsel %vm883_vm13, %v5260_v14, 0.0  ;;  %vm5301_vm5 = vcmp.eq.f32.partialorder %v995_v4, 8.507059e+37 }
 0x424   :  { %v5249_v44 = vadd.s32 %v1368_v45, %v1366_v17  ;;  %v990_v45 = vadd.f32 %v5044_v49, %v989_v7  ;;  %v1003_v17 = vsub.f32 1.0, %v5121_v10  ;;  %v5280_v10 = vsel %vm1637_vm4, %v1639_v6, %v1635_v52 }
 0x425   :  { %7297 = vst [vmem:[#allocation12_spill] sm:$0xff] %v5280_v10  ;;  %3586 = vrcp.f32 %v5256_v32  ;;  %v1508_v41 = vcvt.s32.f32 %v1506_v62  ;;  %v1019_v37 = vmul.f32 %v5185_v15, %v1018_v8  ;;  %v1049_v46 = vmul.f32 %v5101_v59, %v1048_v54 }
 0x426   :  { %vm1539_vm9 = vcmp.eq.s32.totalorder %v3863_v48, %v5249_v44  ;;  %v994_v6 = vsel %vm5297_vm6, %v5044_v49, %v990_v45  ;;  %v1004_v39 = vmul.f32 %v5060_v50, %v1003_v17  ;;  %3588 = vrcp.f32 %v5276_v42 }
 0x427   :  { %v1811_v7 = vsel %vm1539_vm9, %v5280_v10, 0.0  ;;  %v998_v4 = vor.u32 1.1754944e-38, %v997_v0  ;;  %vm1006_vm11 = vweird.f32 %v4970_v25  ;;  %3590 = vrcp.f32 %v5271_v2 }
 0x428   :  { %v5307_v12 = vadd.f32 %v1811_v7, %v1155_v31  ;;  %vm1007_vm12 = vweird.f32 %v5060_v50  ;;  %v1010_v49 = vand.u32 2147483647, %v4970_v25  ;;  %vm1051_vm1 = vweird.f32 %v5014_v5 }
 0x429   :  { %v5287_v51 = vpop.xlane.xlu2 %1510  ;;  %v5320_v13 = vpop.eup %3584  ;;  %vm1052_vm4 = vweird.f32 %v5101_v59  ;;  %v5326_v62 = vsel %vm5301_vm5, %v998_v4, %v994_v6  ;;  %v1012_v0 = vand.u32 2147483648, %v4970_v25  ;;  %v1005_v45 = vadd.f32 %v5060_v50, %v1004_v39  ;;  %vm5342_vm5 = vmor %vm1006_vm11, %vm1007_vm12 }
 0x42a   :  { %vm1512_vm13 = vcmp.eq.f32.partialorder %v4818_v40, %v5287_v51  ;;  %7302 = vst [vmem:[#allocation10_spill] sm:$0xff] %v5307_v12  ;;  %v1033_v40 = vsub.f32 1.0, %v1032_v57  ;;  %v1020_v17 = vadd.f32 %v5185_v15, %v1019_v37  ;;  %vm1022_vm6 = vweird.f32 %v5185_v15 }
 0x42b   :  { %v1513_v3 = vsel %vm1512_vm13, %v1508_v41, inf  ;;  %7303 = vst [vmem:[#allocation13_spill] sm:$0xff] %v5326_v62  ;;  %v5329_v52 = vpop.eup %3586  ;;  %v1027_v8 = vand.u32 2147483648, %v5091_v35  ;;  %v1050_v57 = vadd.f32 %v5101_v59, %v1049_v46  ;;  %v1055_v54 = vand.u32 2147483647, %v5014_v5  ;;  %vm5359_vm13 = vmor %vm1051_vm1, %vm1052_vm4 }
 0x42c   :  { %1514 = vmin.xlane.f32.xlu0 %v1513_v3  ;;  %v1057_v34 = vand.u32 2147483648, %v5014_v5  ;;  %v5350_v41 = vsel %vm1535_vm3, inf, %v4383_v30  ;;  %v1077_v7 = vmul.f32 %v5320_v13, %v5245_v33  ;;  %v1034_v19 = vmul.f32 %v5242_v38, %v1033_v40  ;;  %v5367_v30 = vpop.eup %3588 }
 0x42d   :  { %vm1021_vm11 = vweird.f32 %v5091_v35  ;;  %v5365_v43 = vadd.f32 1e-08, %v4719_v56  ;;  %v1092_v61 = vmul.f32 %v5329_v52, %v5256_v32  ;;  %vm5371_vm3 = vcmp.eq.f32.partialorder %v1010_v49, 8.507059e+37  ;;  %v5382_v56 = vpop.eup %3590 }
 0x42e   :  { %v1013_v39 = vor.u32 1.1754944e-38, %v1012_v0  ;;  %vm5377_vm12 = vmor %vm1021_vm11, %vm1022_vm6  ;;  %v1025_v37 = vand.u32 2147483647, %v5091_v35  ;;  %v1009_v3 = vsel %vm5342_vm5, %v5060_v50, %v1005_v45  ;;  %v1028_v4 = vor.u32 1.1754944e-38, %v1027_v8 }
 0x42f   :  { %v1024_v46 = vsel %vm5377_vm12, %v5185_v15, %v1020_v17  ;;  %v1871_v40 = vsel %vm558_vm2, %v5350_v41, inf  ;;  %vm1037_vm1 = vweird.f32 %v5242_v38  ;;  %v1054_v35 = vsel %vm5359_vm13, %v5101_v59, %v1050_v57 }
 0x430   :  { %vm5396_vm4 = vcmp.eq.f32.partialorder %v1055_v54, 8.507059e+37  ;;  %v1058_v0 = vor.u32 1.1754944e-38, %v1057_v34  ;;  %v1107_v50 = vmul.f32 %v5367_v30, %v5276_v42  ;;  %v1035_v15 = vadd.f32 %v5242_v38, %v1034_v19 }
 0x431   :  { %v1078_v45 = vsub.f32 1.0, %v1077_v7  ;;  %3592 = vrcp.f32 %v5365_v43  ;;  %v1062_v17 = vmul.f32 %v5382_v56, %v5271_v2  ;;  %v1042_v8 = vand.u32 2147483648, %v5159_v9 }
 0x432   :  { %v1093_v59 = vsub.f32 1.0, %v1092_v61  ;;  %v5408_v57 = vadd.f32 1e-08, %v4668_v28  ;;  %vm1036_vm6 = vweird.f32 %v5159_v9  ;;  %v1040_v54 = vand.u32 2147483647, %v5159_v9 }
 0x433   :  { %v5414_v34 = vsel %vm5371_vm3, %v1013_v39, %v1009_v3  ;;  %vm1026_vm5 = vcmp.eq.f32.partialorder %v1025_v37, 8.507059e+37  ;;  %vm5418_vm13 = vmor %vm1036_vm6, %vm1037_vm1  ;;  %v5424_v7 = vsel %vm5396_vm4, %v1058_v0, %v1054_v35  ;;  %v1072_v28 = vand.u32 2147483648, %v5271_v2 }
 0x434   :  { %1872 = vmin.xlane.f32.xlu0 %v1871_v40  ;;  %7314 = vst [vmem:[#allocation55_spill] sm:$0xff] %v5414_v34  ;;  %v5427_v19 = vsel %vm1026_vm5, %v1028_v4, %v1024_v46  ;;  %v5433_v9 = vsel %vm1536_vm14, inf, %v4399_v18  ;;  %v1039_v25 = vsel %vm5418_vm13, %v5242_v38, %v1035_v15  ;;  %v1079_v61 = vmul.f32 %v5320_v13, %v1078_v45 }
 0x435   :  { %7317 = vst [vmem:[#allocation56_spill] sm:$0xff] %v5424_v7  ;;  %v1108_v6 = vsub.f32 1.0, %v1107_v50  ;;  %v5440_v39 = vadd.f32 1e-08, %v4736_v23  ;;  %v1043_v5 = vor.u32 1.1754944e-38, %v1042_v8  ;;  %v1063_v37 = vsub.f32 1.0, %v1062_v17 }
 0x436   :  { %7318 = vst [vmem:[#allocation57_spill] sm:$0xff] %v5427_v19  ;;  %v1094_v3 = vmul.f32 %v5329_v52, %v1093_v59  ;;  %3594 = vrcp.f32 %v5408_v57  ;;  %vm1041_vm14 = vcmp.eq.f32.partialorder %v1040_v54, 8.507059e+37  ;;  %v1085_v18 = vand.u32 2147483647, %v5245_v33 }
 0x437   :  { %v5444_v46 = vpop.eup %3592  ;;  %v5448_v21 = vadd.f32 1e-08, %v4683_v47  ;;  %v1874_v38 = vsel %vm558_vm2, %v5433_v9, inf  ;;  %v5452_v4 = vsel %vm1041_vm14, %v1043_v5, %v1039_v25  ;;  %v5455_v40 = vor.u32 1.1754944e-38, %v1072_v28 }
 0x438   :  { %7319 = vst [vmem:[#allocation58_spill] sm:$0xff] %v5452_v4  ;;  %v1087_v35 = vand.u32 2147483648, %v5245_v33  ;;  %v1080_v49 = vadd.f32 %v5320_v13, %v1079_v61  ;;  %vm1082_vm11 = vweird.f32 %v5320_v13  ;;  %v1109_v0 = vmul.f32 %v5367_v30, %v1108_v6 }
 0x439   :  { %3596 = vrcp.f32 %v5440_v39  ;;  %v1064_v47 = vmul.f32 %v5382_v56, %v1063_v37  ;;  %v1095_v50 = vadd.f32 %v5329_v52, %v1094_v3  ;;  %vm1097_vm3 = vweird.f32 %v5329_v52 }
 0x43a   :  { %v1643_v15 = vmul.f32 %v5444_v46, %v5365_v43  ;;  %vm1081_vm12 = vweird.f32 %v5245_v33  ;;  %vm5468_vm1 = vcmp.eq.f32.partialorder %v1085_v18, 8.507059e+37  ;;  %v1102_v17 = vand.u32 2147483648, %v5256_v32 }
 0x43b   :  { %3598 = vrcp.f32 %v5448_v21  ;;  %vm5476_vm4 = vmor %vm1081_vm12, %vm1082_vm11  ;;  %vm1096_vm6 = vweird.f32 %v5256_v32  ;;  %v1100_v54 = vand.u32 2147483647, %v5256_v32  ;;  %v5483_v33 = vadd.f32 1e-08, %v4753_v55 }
 0x43c   :  { %1875 = vmin.xlane.f32.xlu0 %v1874_v38  ;;  %v5474_v8 = vpop.eup %3594  ;;  %v5489_v31 = vsel %vm1537_vm7, inf, %v4414_v11  ;;  %v1084_v28 = vsel %vm5476_vm4, %v5320_v13, %v1080_v49  ;;  %v1088_v25 = vor.u32 1.1754944e-38, %v1087_v35  ;;  %vm5494_vm5 = vmor %vm1096_vm6, %vm1097_vm3  ;;  %v5499_v32 = vadd.f32 %v5367_v30, %v1109_v0 }
 0x43d   :  { %vm1112_vm13 = vweird.f32 %v5367_v30  ;;  %v5503_v55 = vadd.f32 %v5382_v56, %v1064_v47  ;;  %v1099_v11 = vsel %vm5494_vm5, %v5329_v52, %v1095_v50  ;;  %v5509_v26 = vadd.f32 1e-08, %v4702_v22 }
 0x43e   :  { %v1644_v13 = vsub.f32 1.0, %v1643_v15  ;;  %v1103_v5 = vor.u32 1.1754944e-38, %v1102_v17  ;;  %vm1111_vm7 = vweird.f32 %v5276_v42  ;;  %v1688_v37 = vmul.f32 %v5474_v8, %v5408_v57  ;;  %v7338_v17 = vld [vmem:[#allocation20_spill] sm:$0xff] }
 0x43f   :  { %v5511_v6 = vpop.eup %3596  ;;  %v1877_v3 = vsel %vm558_vm2, %v5489_v31, inf  ;;  %v5520_v18 = vsel %vm5468_vm1, %v1088_v25, %v1084_v28  ;;  %vm1101_vm14 = vcmp.eq.f32.partialorder %v1100_v54, 8.507059e+37  ;;  %vm5522_vm11 = vmor %vm1111_vm7, %vm1112_vm13  ;;  %3600 = vrcp.f32 %v5483_v33 }
 0x440   :  { %7326 = vst [vmem:[#allocation59_spill] sm:$0xff] %v5520_v18  ;;  %v5528_v52 = vadd.f32 1e-08, %v4764_v16  ;;  %v5532_v35 = vsel %vm1101_vm14, %v1103_v5, %v1099_v11  ;;  %v1156_v16 = vsel %vm884_vm10, %v5326_v62, 0.0  ;;  %3602 = vrcp.f32 %v5509_v26  ;;  %v7333_v11 = vld [vmem:[#allocation32_spill] sm:$0xff] }
 0x441   :  { %v5530_v38 = vpop.eup %3598  ;;  %7329 = vst [vmem:[#allocation60_spill] sm:$0xff] %v5532_v35  ;;  %v1658_v15 = vmul.f32 %v5511_v6, %v5440_v39  ;;  %v1645_v45 = vmul.f32 %v5444_v46, %v1644_v13  ;;  %v5552_v59 = vsel %vm885_vm15, %v5414_v34, 0.0  ;;  %v5558_v28 = vsel %vm890_vm8, %v5520_v18, 0.0  ;;  %v7344_v34 = vld [vmem:[#allocation40_spill] sm:$0xff] }
 0x442   :  { %v1689_v25 = vsub.f32 1.0, %v1688_v37  ;;  %v1382_v61 = vcvt.f32.s32 %v4835_v53  ;;  %vm7334_vm10 = vcmp.eq.s32.totalorder %v3863_v48, %v7333_v11  ;;  %v1703_v5 = vmul.f32 %v5530_v38, %v5448_v21  ;;  %v7336_v53 = vld [vmem:[#allocation18_spill] sm:$0xff]  ;;  %v7340_v11 = vld [vmem:[#allocation28_spill] sm:$0xff] }
 0x443   :  { %v5565_v13 = vsel %vm7334_vm10, %v5532_v35, 0.0  ;;  %3604 = vrcp.f32 %v5528_v52  ;;  %vm7337_vm15 = vcmp.eq.s32.totalorder %v3863_v48, %v7336_v53  ;;  %vm7339_vm8 = vcmp.eq.s32.totalorder %v3863_v48, %v7338_v17 }
 0x444   :  { %1878 = vmin.xlane.f32.xlu0 %v1877_v3  ;;  %v7335_v3 = vld [vmem:[#allocation16_spill] sm:$0xff]  ;;  %v5580_v37 = vsel %vm7337_vm15, %v5452_v4, 0.0  ;;  %v5586_v54 = vsel %vm7339_vm8, %v5424_v7, 0.0  ;;  %vm7341_vm3 = vcmp.eq.s32.totalorder %v3863_v48, %v7340_v11  ;;  %v1659_v53 = vsub.f32 1.0, %v1658_v15 }
 0x445   :  { %v5574_v50 = vsel %vm1538_vm0, inf, %v7335_v3  ;;  %v5592_v23 = vsel %vm7341_vm3, %v5427_v19, 0.0  ;;  %v1698_v3 = vand.u32 2147483648, %v5408_v57  ;;  %v5595_v49 = vpop.eup %3600  ;;  %v1646_v0 = vadd.f32 %v5444_v46, %v1645_v45 }
 0x446   :  { %vm1648_vm0 = vweird.f32 %v5444_v46  ;;  %v1383_v17 = vshll.u32 %v1382_v61, 16  ;;  %v1880_v18 = vsel %vm558_vm2, %v5574_v50, inf  ;;  %v1690_v12 = vmul.f32 %v5474_v8, %v1689_v25  ;;  %v5603_v19 = vpop.eup %3602 }
 0x447   :  { %v1653_v11 = vand.u32 2147483648, %v5365_v43  ;;  %v1704_v35 = vsub.f32 1.0, %v1703_v5  ;;  %vm1692_vm12 = vweird.f32 %v5408_v57  ;;  %vm1647_vm1 = vweird.f32 %v5365_v43 }
 0x448   :  { %v1651_v15 = vand.u32 2147483647, %v5365_v43  ;;  %v1673_v45 = vmul.f32 %v5595_v49, %v5483_v33  ;;  %v5613_v25 = vor.u32 1.1754944e-38, %v1698_v3  ;;  %vm5617_vm4 = vmor %vm1647_vm1, %vm1648_vm0  ;;  %v5624_v62 = vadd.f32 1e-08, %v7344_v34  ;;  %v7345_v34 = vld [vmem:[#allocation17_spill] sm:$0xff] }
 0x449   :  { %v1380_v1 = vpop.xlane.xlu1 %1379  ;;  %vm1693_vm6 = vweird.f32 %v5474_v8  ;;  %v1650_v43 = vsel %vm5617_vm4, %v5444_v46, %v1646_v0  ;;  %v5633_v3 = vmul.f32 %v5603_v19, %v5509_v26  ;;  %v5637_v7 = vadd.f32 %v5474_v8, %v1690_v12 }
 0x44a   :  { %v1381_v47 = vcvt.f32.s32 %v1380_v1  ;;  %v1696_v1 = vand.u32 2147483647, %v5408_v57  ;;  %v1654_v4 = vor.u32 1.1754944e-38, %v1653_v11  ;;  %v5643_v10 = vsel %vm1539_vm9, inf, %v7345_v34  ;;  %vm5672_vm14 = vmor %vm1692_vm12, %vm1693_vm6  ;;  %v7353_v57 = vld [vmem:[#allocation44_spill] sm:$0xff] }
 0x44b   :  { %v1705_v46 = vmul.f32 %v5530_v38, %v1704_v35  ;;  %vm1652_vm5 = vcmp.eq.f32.partialorder %v1651_v15, 8.507059e+37  ;;  %vm1663_vm13 = vweird.f32 %v5511_v6  ;;  %v1674_v0 = vsub.f32 1.0, %v1673_v45 }
 0x44c   :  { %1881 = vmin.xlane.f32.xlu0 %v1880_v18  ;;  %v5610_v61 = vadd.s32 %v1383_v17, %v1381_v47  ;;  %v5621_v18 = vpop.eup %3604  ;;  %v1660_v47 = vmul.f32 %v5511_v6, %v1659_v53  ;;  %v1397_v17 = vcvt.f32.s32 %v4840_v20  ;;  %v5651_v12 = vsel %vm1652_vm5, %v1654_v4, %v1650_v43  ;;  %v7348_v43 = vld [vmem:[#allocation41_spill] sm:$0xff] }
 0x44d   :  { %v1733_v53 = vmul.f32 %v5621_v18, %v5528_v52  ;;  %7346 = vst [vmem:[#allocation23_spill] sm:$0xff] %v5651_v12  ;;  %3606 = vrcp.f32 %v5624_v62  ;;  %v1883_v45 = vsel %vm558_vm2, %v5643_v10, inf  ;;  %vm1707_vm9 = vweird.f32 %v5448_v21 }
 0x44e   :  { %vm1540_vm7 = vcmp.eq.s32.totalorder %v3863_v48, %v5610_v61  ;;  %v1661_v11 = vadd.f32 %v5511_v6, %v1660_v47  ;;  %v1398_v15 = vshll.u32 %v1397_v17, 16  ;;  %v1668_v4 = vand.u32 2147483648, %v5440_v39  ;;  %v7410_v61 = vld [vmem:[#allocation30_spill] sm:$0xff] }
 0x44f   :  { %v1812_v35 = vsel %vm1540_vm7, %v5651_v12, 0.0  ;;  %v5666_v34 = vadd.f32 1e-08, %v7348_v43  ;;  %vm5676_vm10 = vcmp.eq.f32.partialorder %v1696_v1, 8.507059e+37  ;;  %vm1662_vm15 = vweird.f32 %v5440_v39 }
 0x450   :  { %v5662_v5 = vadd.f32 %v1812_v35, %v1156_v16  ;;  %v1734_v35 = vsub.f32 1.0, %v1733_v53  ;;  %vm5691_vm8 = vmor %vm1662_vm15, %vm1663_vm13  ;;  %vm1708_vm3 = vweird.f32 %v5530_v38  ;;  %v5707_v12 = vadd.f32 %v5530_v38, %v1705_v46 }
 0x451   :  { %v1395_v20 = vpop.xlane.xlu1 %1394  ;;  %v1665_v53 = vsel %vm5691_vm8, %v5511_v6, %v1661_v11  ;;  %v1669_v16 = vor.u32 1.1754944e-38, %v1668_v4  ;;  %3608 = vrcp.f32 %v5666_v34  ;;  %vm1678_vm4 = vweird.f32 %v5595_v49  ;;  %vm5737_vm6 = vmor %vm1707_vm9, %vm1708_vm3 }
 0x452   :  { %v1396_v44 = vcvt.f32.s32 %v1395_v20  ;;  %7347 = vst [vmem:[#allocation26_spill] sm:$0xff] %v5662_v5  ;;  %v1666_v20 = vand.u32 2147483647, %v5440_v39  ;;  %v1521_v5 = vand.u32 65535, %v7353_v57  ;;  %v1695_v39 = vsel %vm5672_vm14, %v5474_v8, %v5637_v7  ;;  %v7356_v7 = vld [vmem:[#allocation45_spill] sm:$0xff] }
 0x453   :  { %v1412_v57 = vcvt.f32.s32 %v4849_v36  ;;  %v5709_v14 = vpop.eup %3606  ;;  %v1683_v8 = vand.u32 2147483648, %v5483_v33  ;;  %v1743_v1 = vand.u32 2147483648, %v5528_v52  ;;  %vm1677_vm5 = vweird.f32 %v5483_v33 }
 0x454   :  { %1884 = vmin.xlane.f32.xlu0 %v1883_v45  ;;  %v5683_v45 = vpop.xlane.xlu2 %1525  ;;  %v5685_v43 = vadd.s32 %v1398_v15, %v1396_v44  ;;  %v1675_v44 = vmul.f32 %v5595_v49, %v1674_v0  ;;  %v1719_v15 = vsub.f32 1.0, %v5633_v3  ;;  %vm1667_vm12 = vcmp.eq.f32.partialorder %v1666_v20, 8.507059e+37  ;;  %vm5754_vm9 = vmor %vm1677_vm5, %vm1678_vm4 }
 0x455   :  { %vm1527_vm0 = vcmp.eq.f32.partialorder %v7356_v7, %v5683_v45  ;;  %v1523_v0 = vcvt.s32.f32 %v1521_v5  ;;  %v1735_v3 = vmul.f32 %v5621_v18, %v1734_v35  ;;  %v5718_v36 = vsel %vm1667_vm12, %v1669_v16, %v1665_v53 }
 0x456   :  { %vm1541_vm1 = vcmp.eq.s32.totalorder %v3863_v48, %v5685_v43  ;;  %v1676_v4 = vadd.f32 %v5595_v49, %v1675_v44  ;;  %v1748_v5 = vmul.f32 %v5709_v14, %v5624_v62  ;;  %v1413_v47 = vshll.u32 %v1412_v57, 16 }
 0x457   :  { %v1813_v11 = vsel %vm1541_vm1, %v5718_v36, 0.0  ;;  %v1528_v20 = vsel %vm1527_vm0, %v1523_v0, inf  ;;  %v1472_v16 = vcvt.f32.s32 %v4863_v24  ;;  %v1681_v44 = vand.u32 2147483647, %v5483_v33 }
 0x458   :  { %v5729_v35 = vadd.f32 %v1813_v11, %v5552_v59  ;;  %v1736_v59 = vadd.f32 %v5621_v18, %v1735_v3  ;;  %vm1738_vm13 = vweird.f32 %v5621_v18  ;;  %v5750_v24 = vsel %vm5676_vm10, %v5613_v25, %v1695_v39 }
 0x459   :  { %v1410_v6 = vpop.xlane.xlu1 %1409  ;;  %v1427_v33 = vcvt.f32.s32 %v4825_v27  ;;  %v5766_v3 = vmul.f32 %v5603_v19, %v1719_v15  ;;  %v1680_v25 = vsel %vm5754_vm9, %v5595_v49, %v1676_v4  ;;  %v1749_v17 = vsub.f32 1.0, %v1748_v5 }
 0x45a   :  { %v1411_v46 = vcvt.f32.s32 %v1410_v6  ;;  %7357 = vst [vmem:[#allocation29_spill] sm:$0xff] %v5729_v35  ;;  %v5758_v6 = vpop.eup %3608  ;;  %vm1737_vm14 = vweird.f32 %v5528_v52  ;;  %v1684_v11 = vor.u32 1.1754944e-38, %v1683_v8  ;;  %v1473_v27 = vshll.u32 %v1472_v16, 16 }
 0x45b   :  { %vm5775_vm10 = vmor %vm1737_vm14, %vm1738_vm13  ;;  %v1744_v15 = vor.u32 1.1754944e-38, %v1743_v1  ;;  %vm1682_vm15 = vcmp.eq.f32.partialorder %v1681_v44, 8.507059e+37  ;;  %v1763_v49 = vmul.f32 %v5758_v6, %v5666_v34  ;;  %v1428_v8 = vshll.u32 %v1427_v33, 16  ;;  %v7384_v1 = vld [vmem:[#allocation47_spill] sm:$0xff] }
 0x45c   :  { %1529 = vmin.xlane.f32.xlu0 %v1528_v20  ;;  %v5743_v57 = vadd.s32 %v1413_v47, %v1411_v46  ;;  %v1741_v46 = vand.u32 2147483647, %v5528_v52  ;;  %v1740_v5 = vsel %vm5775_vm10, %v5621_v18, %v1736_v59  ;;  %v5786_v52 = vsel %vm1682_vm15, %v1684_v11, %v1680_v25  ;;  %v7369_v25 = vld [vmem:[#allocation48_spill] sm:$0xff] }
 0x45d   :  { %7364 = vst [vmem:[#allocation32_spill] sm:$0xff] %v5786_v52  ;;  %v1750_v59 = vmul.f32 %v5709_v14, %v1749_v17  ;;  %v1756_v33 = vand.u32 2147483647, %v5624_v62  ;;  %v1487_v11 = vcvt.f32.s32 %v7369_v25  ;;  %v1764_v20 = vsub.f32 1.0, %v1763_v49  ;;  %v7372_v17 = vld [vmem:[#allocation46_spill] sm:$0xff]  ;;  %v7374_v49 = vld [vmem:[#allocation19_spill] sm:$0xff] }
 0x45e   :  { %vm1542_vm8 = vcmp.eq.s32.totalorder %v3863_v48, %v5743_v57  ;;  %vm1742_vm0 = vcmp.eq.f32.partialorder %v1741_v46, 8.507059e+37  ;;  %vm1067_vm4 = vweird.f32 %v5382_v56  ;;  %vm1753_vm13 = vweird.f32 %v5709_v14 }
 0x45f   :  { %v1470_v39 = vpop.xlane.xlu0 %1469  ;;  %v1814_v44 = vsel %vm1542_vm8, %v5786_v52, 0.0  ;;  %vm1066_vm9 = vweird.f32 %v5271_v2  ;;  %v1728_v0 = vand.u32 2147483648, %v5509_v26  ;;  %vm1752_vm14 = vweird.f32 %v5624_v62 }
 0x460   :  { %v1471_v47 = vcvt.f32.s32 %v1470_v39  ;;  %v7365_v39 = vand.u32 2147483647, %v5448_v21  ;;  %v5799_v18 = vadd.f32 %v1814_v44, %v5592_v23  ;;  %v1758_v23 = vand.u32 2147483648, %v5624_v62 }
 0x461   :  { %v1425_v4 = vpop.xlane.xlu1 %1424  ;;  %v1442_v44 = vcvt.f32.s32 %v7372_v17  ;;  %vm1723_vm15 = vweird.f32 %v5603_v19 }
 0x462   :  { %v1474_v16 = vadd.s32 %v1473_v27, %v1471_v47  ;;  %v1426_v7 = vcvt.f32.s32 %v1425_v4  ;;  %vm5790_vm3 = vcmp.eq.f32.partialorder %v7365_v39, 8.507059e+37  ;;  %7368 = vst [vmem:[#allocation16_spill] sm:$0xff] %v5799_v18  ;;  %v5805_v47 = vsel %vm1742_vm0, %v1744_v15, %v1740_v5  ;;  %v7371_v4 = vld [vmem:[#allocation31_spill] sm:$0xff]  ;;  %vm5848_vm0 = vmor %vm1752_vm14, %vm1753_vm13 }
 0x463   :  { %7370 = vst [vmem:[#allocation18_spill] sm:$0xff] %v5805_v47 }
 0x464   :  { %v1429_v27 = vadd.s32 %v1428_v8, %v1426_v7  ;;  %vm1546_vm12 = vcmp.eq.s32.totalorder %v3863_v48, %v1474_v16  ;;  %v1751_v7 = vadd.f32 %v5709_v14, %v1750_v59  ;;  %v1765_v59 = vmul.f32 %v5758_v6, %v1764_v20  ;;  %v7382_v20 = vld [vmem:[#allocation49_spill] sm:$0xff] }
 0x465   :  { %v5808_v39 = vsel %vm1546_vm12, inf, %v7371_v4  ;;  %v1818_v46 = vsel %vm1546_vm12, %v5805_v47, 0.0  ;;  %v1488_v4 = vshll.u32 %v1487_v11, 16  ;;  %v7377_v11 = vand.u32 2147483647, %v5276_v42 }
 0x466   :  { %v1904_v25 = vsel %vm558_vm2, %v5808_v39, inf  ;;  %v5817_v8 = vadd.f32 %v1818_v46, %v5558_v28  ;;  %vm1543_vm5 = vcmp.eq.s32.totalorder %v3863_v48, %v1429_v27  ;;  %v1502_v62 = vcvt.f32.s32 %v7382_v20 }
 0x467   :  { %1905 = vmin.xlane.f32.xlu1 %v1904_v25  ;;  %v1485_v15 = vpop.xlane.xlu0 %1484  ;;  %v5821_v5 = vsel %vm1543_vm5, inf, %v7374_v49  ;;  %v1815_v16 = vsel %vm1543_vm5, %v5750_v24, 0.0  ;;  %v7376_v25 = vand.u32 2147483648, %v5448_v21  ;;  %vm5839_vm10 = vcmp.eq.f32.partialorder %v7377_v11, 8.507059e+37 }
 0x468   :  { %7373 = vst [vmem:[#allocation20_spill] sm:$0xff] %v5817_v8  ;;  %v1486_v17 = vcvt.f32.s32 %v1485_v15  ;;  %v1895_v28 = vsel %vm558_vm2, %v5821_v5, inf  ;;  %v5830_v27 = vadd.f32 %v1815_v16, %v5580_v37  ;;  %v1443_v8 = vshll.u32 %v1442_v44, 16 }
 0x469   :  { %1896 = vmin.xlane.f32.xlu2 %v1895_v28  ;;  %v1440_v46 = vpop.xlane.xlu1 %1439  ;;  %v1714_v49 = vor.u32 1.1754944e-38, %v7376_v25  ;;  %v7383_v28 = vsel %vm5737_vm6, %v5530_v38, %v5707_v12  ;;  %vm1767_vm12 = vweird.f32 %v5666_v34  ;;  %vm1757_vm5 = vcmp.eq.f32.partialorder %v1756_v33, 8.507059e+37 }
 0x46a   :  { %7375 = vst [vmem:[#allocation28_spill] sm:$0xff] %v5830_v27  ;;  %v5843_v37 = vadd.s32 %v1488_v4, %v1486_v17  ;;  %v1441_v16 = vcvt.f32.s32 %v1440_v46  ;;  %v1721_v4 = vadd.f32 %v5603_v19, %v5766_v3  ;;  %v1755_v17 = vsel %vm5848_vm0, %v5709_v14, %v1751_v7  ;;  %vm5906_vm0 = vmor %vm1066_vm9, %vm1067_vm4  ;;  %v7442_v27 = vld [vmem:[#allocation23_spill] sm:$0xff] }
 0x46b   :  { %v5860_v44 = vsel %vm5790_vm3, %v1714_v49, %v7383_v28  ;;  %v1759_v25 = vor.u32 1.1754944e-38, %v1758_v23  ;;  %v1766_v53 = vadd.f32 %v5758_v6, %v1765_v59  ;;  %vm1768_vm6 = vweird.f32 %v5758_v6  ;;  %v7385_v23 = vld [vmem:[#allocation21_spill] sm:$0xff] }
 0x46c   :  { %v1444_v46 = vadd.s32 %v1443_v8, %v1441_v16  ;;  %v1771_v38 = vand.u32 2147483647, %v5666_v34  ;;  %v1773_v12 = vand.u32 2147483648, %v5666_v34  ;;  %v1457_v49 = vcvt.f32.s32 %v7384_v1  ;;  %vm5895_vm14 = vmor %vm1767_vm12, %vm1768_vm6 }
 0x46d   :  { %vm1547_vm13 = vcmp.eq.s32.totalorder %v3863_v48, %v5843_v37  ;;  %v5876_v14 = vsel %vm1757_vm5, %v1759_v25, %v1755_v17  ;;  %v1503_v3 = vshll.u32 %v1502_v62, 16  ;;  %vm1722_vm12 = vweird.f32 %v5509_v26 }
 0x46e   :  { %vm1544_vm3 = vcmp.eq.s32.totalorder %v3863_v48, %v1444_v46  ;;  %v1819_v59 = vsel %vm1547_vm13, %v5876_v14, 0.0  ;;  %v1726_v46 = vand.u32 2147483647, %v5509_v26  ;;  %v1458_v25 = vshll.u32 %v1457_v49, 16  ;;  %vm5919_vm4 = vmor %vm1722_vm12, %vm1723_vm15 }
 0x46f   :  { %v1500_v33 = vpop.xlane.xlu0 %1499  ;;  %v5879_v8 = vsel %vm1544_vm3, inf, %v7385_v23  ;;  %v1816_v7 = vsel %vm1544_vm3, %v5860_v44, 0.0  ;;  %v5900_v62 = vadd.f32 %v1819_v59, %v5565_v13  ;;  %v1770_v13 = vsel %vm5895_vm14, %v5758_v6, %v1766_v53 }
 0x470   :  { %v1501_v11 = vcvt.f32.s32 %v1500_v33  ;;  %v1898_v16 = vsel %vm558_vm2, %v5879_v8, inf  ;;  %v5889_v21 = vadd.f32 %v1816_v7, %v5586_v54  ;;  %v7392_v54 = vand.u32 2147483648, %v5276_v42 }
 0x471   :  { %7389 = vst [vmem:[#allocation17_spill] sm:$0xff] %v5900_v62  ;;  %1899 = vmin.xlane.f32.xlu2 %v1898_v16  ;;  %v1455_v34 = vpop.xlane.xlu1 %1454  ;;  %v1774_v42 = vor.u32 1.1754944e-38, %v1773_v12  ;;  %v1069_v7 = vsel %vm5906_vm0, %v5382_v56, %v5503_v55  ;;  %v7395_v26 = vsel %vm5522_vm11, %v5367_v30, %v5499_v32  ;;  %v1725_v53 = vsel %vm5919_vm4, %v5603_v19, %v1721_v4  ;;  %v7399_v30 = vld [vmem:[#allocation34_spill] sm:$0xff]  ;;  %v7404_v4 = vld [vmem:[#allocation24_spill] sm:$0xff]  ;;  %v7406_v16 = vld [vmem:[#allocation25_spill] sm:$0xff] }
 0x472   :  { %7386 = vst [vmem:[#allocation40_spill] sm:$0xff] %v5889_v21  ;;  %v1118_v17 = vor.u32 1.1754944e-38, %v7392_v54  ;;  %v1504_v1 = vadd.s32 %v1503_v3, %v1501_v11  ;;  %v1456_v33 = vcvt.f32.s32 %v1455_v34  ;;  %vm1772_vm9 = vcmp.eq.f32.partialorder %v1771_v38, 8.507059e+37  ;;  %v7407_v54 = vld [vmem:[#allocation14_spill] sm:$0xff]  ;;  %v7408_v34 = vld [vmem:[#allocation27_spill] sm:$0xff] }
 0x473   :  { %v1729_v49 = vor.u32 1.1754944e-38, %v1728_v0  ;;  %v5940_v3 = vsel %vm1772_vm9, %v1774_v42, %v1770_v13  ;;  %v7398_v56 = vand.u32 2147483647, %v5271_v2  ;;  %vm7400_vm11 = vcmp.eq.s32.totalorder %v3863_v48, %v7399_v30  ;;  %v7402_v2 = vld [vmem:[#allocation22_spill] sm:$0xff] }
 0x474   :  { %v5934_v6 = vsel %vm5839_vm10, %v1118_v17, %v7395_v26  ;;  %v1459_v12 = vadd.s32 %v1458_v25, %v1456_v33  ;;  %vm1548_vm15 = vcmp.eq.s32.totalorder %v3863_v48, %v1504_v1  ;;  %7397 = vst [vmem:[#allocation44_spill] sm:$0xff] %v5940_v3  ;;  %vm1727_vm10 = vcmp.eq.f32.partialorder %v1726_v46, 8.507059e+37  ;;  %v7409_v13 = vld [vmem:[#allocation42_spill] sm:$0xff] }
 0x475   :  { %7396 = vst [vmem:[#allocation41_spill] sm:$0xff] %v5934_v6  ;;  %vm1071_vm5 = vcmp.eq.f32.partialorder %v7398_v56, 8.507059e+37  ;;  %v1164_v32 = vsel %vm7400_vm11, %v5934_v6, 0.0  ;;  %v1820_v19 = vsel %vm1548_vm15, %v5940_v3, 0.0  ;;  %v5955_v22 = vsel %vm1727_vm10, %v1729_v49, %v1725_v53 }
 0x476   :  { %v5952_v55 = vsel %vm1071_vm5, %v5455_v40, %v1069_v7  ;;  %vm1545_vm6 = vcmp.eq.s32.totalorder %v3863_v48, %v1459_v12  ;;  %v5957_v0 = vadd.f32 %v1820_v19, %v1164_v32  ;;  %vm7403_vm3 = vcmp.eq.s32.totalorder %v3863_v48, %v7402_v2  ;;  %v7411_v12 = vld [vmem:[#allocation35_spill] sm:$0xff] }
 0x477   :  { %v1161_v15 = vsel %vm7403_vm3, %v5952_v55, 0.0  ;;  %v5964_v38 = vsel %vm1545_vm6, inf, %v7404_v4  ;;  %v1817_v59 = vsel %vm1545_vm6, %v5955_v22, 0.0  ;;  %v5975_v20 = vsel %vm1540_vm7, inf, %v7406_v16 }
 0x478   :  { %7401 = vst [vmem:[#allocation45_spill] sm:$0xff] %v5957_v0  ;;  %v1901_v40 = vsel %vm558_vm2, %v5964_v38, inf  ;;  %v5969_v11 = vadd.f32 %v1817_v59, %v1161_v15  ;;  %v1886_v28 = vsel %vm558_vm2, %v5975_v20, inf  ;;  %v909_v17 = vadd.f32 1e-08, %v7407_v54 }
 0x479   :  { %1902 = vmin.xlane.f32.xlu2 %v1901_v40  ;;  %v5984_v46 = vsel %vm1541_vm1, inf, %v7408_v34  ;;  %v1565_v25 = vadd.f32 1e-08, %v7409_v13  ;;  %v5993_v23 = vsel %vm1542_vm8, inf, %v7410_v61  ;;  %v6000_v49 = vsel %vm1548_vm15, inf, %v7411_v12 }
 0x47a   :  { %7405 = vst [vmem:[#allocation48_spill] sm:$0xff] %v5969_v11  ;;  %v1889_v33 = vsel %vm558_vm2, %v5984_v46, inf  ;;  %3610 = vrcp.f32 %v909_v17  ;;  %v1892_v43 = vsel %vm558_vm2, %v5993_v23, inf  ;;  %v1910_v57 = vsel %vm558_vm2, %v6000_v49, inf }
 0x47b   :  { %3612 = vrcp.f32 %v1565_v25  ;;  %v1517_v2 = vcvt.f32.s32 %v5287_v51  ;;  %vm1126_vm1 = vweird.f32 %v909_v17  ;;  %v1132_v40 = vand.u32 2147483648, %v909_v17 }
 0x47c   :  { %v1130_v54 = vand.u32 2147483647, %v909_v17  ;;  %vm1782_vm0 = vweird.f32 %v1565_v25  ;;  %v1786_v34 = vand.u32 2147483647, %v1565_v25 }
 0x47d   :  { %v1518_v1 = vshll.u32 %v1517_v2, 16  ;;  %v1133_v51 = vor.u32 1.1754944e-38, %v1132_v40  ;;  %v7416_v2 = vld [vmem:[#allocation15_spill] sm:$0xff] }
 0x47e   :  { %vm1131_vm4 = vcmp.eq.f32.partialorder %v1130_v54, 8.507059e+37  ;;  %vm1787_vm9 = vcmp.eq.f32.partialorder %v1786_v34, 8.507059e+37  ;;  %v7417_v34 = vld [vmem:[#allocation43_spill] sm:$0xff] }
 0x480   :  { %v3611_v42 = vpop.eup %3610 }
 0x481   :  { %1887 = vmin.xlane.f32.xlu2 %v1886_v28  ;;  %v3613_v7 = vpop.eup %3612  ;;  %v1122_v26 = vmul.f32 %v3611_v42, %v909_v17  ;;  %vm1127_vm7 = vweird.f32 %v3611_v42  ;;  %v1788_v28 = vand.u32 2147483648, %v1565_v25  ;;  %v7413_v17 = vld [vmem:[#allocation36_spill] sm:$0xff] }
 0x482   :  { %v1778_v53 = vmul.f32 %v3613_v7, %v1565_v25  ;;  %vm1783_vm8 = vweird.f32 %v3613_v7  ;;  %vm1128_vm14 = vmor %vm1126_vm1, %vm1127_vm7  ;;  %vm7414_vm5 = vcmp.eq.s32.totalorder %v3863_v48, %v7413_v17 }
 0x483   :  { %v1123_v56 = vsub.f32 1.0, %v1122_v26  ;;  %vm1784_vm12 = vmor %vm1782_vm0, %vm1783_vm8 }
 0x484   :  { %v1779_v30 = vsub.f32 1.0, %v1778_v53 }
 0x485   :  { %v1124_v32 = vmul.f32 %v3611_v42, %v1123_v56 }
 0x486   :  { %v1780_v19 = vmul.f32 %v3613_v7, %v1779_v30 }
 0x487   :  { %v1125_v15 = vadd.f32 %v3611_v42, %v1124_v32 }
 0x488   :  { %v1781_v59 = vadd.f32 %v3613_v7, %v1780_v19 }
 0x489   :  { %1890 = vmin.xlane.f32.xlu2 %v1889_v33  ;;  %v1129_v33 = vsel %vm1128_vm14, %v3611_v42, %v1125_v15  ;;  %v6032_v15 = vadd.f32 1e-08, %v7416_v2 }
 0x48a   :  { %v1785_v61 = vsel %vm1784_vm12, %v3613_v7, %v1781_v59  ;;  %v6007_v26 = vsel %vm1131_vm4, %v1133_v51, %v1129_v33  ;;  %v6046_v33 = vadd.f32 1e-08, %v7417_v34 }
 0x48b   :  { %v1165_v25 = vsel %vm7414_vm5, %v6007_v26, 0.0 }
 0x491   :  { %1893 = vmin.xlane.f32.xlu2 %v1892_v43  ;;  %v1789_v43 = vor.u32 1.1754944e-38, %v1788_v28 }
 0x493   :  { %v6011_v53 = vsel %vm1787_vm9, %v1789_v43, %v1785_v61 }
 0x494   :  { %7412 = vst [vmem:[#allocation31_spill] sm:$0xff] %v6011_v53 }
 0x499   :  { %1911 = vmin.xlane.f32.xlu2 %v1910_v57 }
 0x49f   :  { %v1515_v4 = vpop.xlane.xlu0 %1514 }
 0x4a0   :  { %v1516_v16 = vcvt.f32.s32 %v1515_v4 }
 0x4a2   :  { %v6005_v13 = vadd.s32 %v1518_v1, %v1516_v16 }
 0x4a4   :  { %vm1549_vm15 = vcmp.eq.s32.totalorder %v3863_v48, %v6005_v13 }
 0x4a5   :  { %v1821_v42 = vsel %vm1549_vm15, %v6011_v53, 0.0 }
 0x4a6   :  { %v6022_v56 = vadd.f32 %v1821_v42, %v1165_v25 }
 0x4a7   :  { %v1873_v12 = vpop.xlane.xlu0 %1872 }
 0x4a8   :  { %vm1919_vm11 = vcmp.eq.f32.partialorder %v5350_v41, %v1873_v12  ;;  %v2207_v7 = vadd.f32 1e-08, %v1873_v12  ;;  %7415 = vst [vmem:[#allocation46_spill] sm:$0xff] %v6022_v56 }
 0x4a9   :  { %v1935_v30 = vsel %vm1919_vm11, %v3863_v48, 16 }
 0x4aa   :  { %3614 = vrcp.f32 %v2207_v7  ;;  %v6026_v57 = vsel %vm558_vm2, %v1935_v30, 2147483647  ;;  %v2232_v17 = vand.u32 2147483647, %v2207_v7  ;;  %vm2228_vm7 = vweird.f32 %v2207_v7 }
 0x4ab   :  { %v1953_v32 = vshra.s32 %v6026_v57, 16 }
 0x4ac   :  { %vm2233_vm8 = vcmp.eq.f32.partialorder %v2232_v17, 8.507059e+37 }
 0x4ad   :  { %v6029_v19 = vcvt.s32.f32 %v1953_v32 }
 0x4af   :  { %1956 = vmin.xlane.f32.xlu1 %v6029_v19  ;;  %v1876_v4 = vpop.xlane.xlu0 %1875 }
 0x4b0   :  { %v3615_v41 = vpop.eup %3614  ;;  %vm1920_vm10 = vcmp.eq.f32.partialorder %v5433_v9, %v1876_v4  ;;  %v6036_v59 = vadd.f32 1e-08, %v1876_v4  ;;  %v2234_v9 = vand.u32 2147483648, %v2207_v7  ;;  %v1839_v4 = vadd.f32 %v5025_v63, %v4940_v60 }
 0x4b1   :  { %v2224_v40 = vmul.f32 %v3615_v41, %v2207_v7  ;;  %v1936_v1 = vsel %vm1920_vm10, %v3863_v48, 16  ;;  %vm2229_vm6 = vweird.f32 %v3615_v41 }
 0x4b2   :  { %3616 = vrcp.f32 %v6036_v59  ;;  %v6041_v16 = vsel %vm558_vm2, %v1936_v1, 2147483647  ;;  %vm2230_vm1 = vmor %vm2228_vm7, %vm2229_vm6  ;;  %vm2243_vm12 = vweird.f32 %v6036_v59 }
 0x4b3   :  { %3618 = vrcp.f32 %v6032_v15  ;;  %v2225_v28 = vsub.f32 1.0, %v2224_v40  ;;  %v1968_v54 = vshra.s32 %v6041_v16, 16 }
 0x4b4   :  { %3620 = vrcp.f32 %v6046_v33 }
 0x4b5   :  { %v6048_v61 = vcvt.s32.f32 %v1968_v54  ;;  %v2226_v43 = vmul.f32 %v3615_v41, %v2225_v28 }
 0x4b7   :  { %1971 = vmin.xlane.f32.xlu1 %v6048_v61  ;;  %v1879_v51 = vpop.xlane.xlu0 %1878  ;;  %v2227_v2 = vadd.f32 %v3615_v41, %v2226_v43  ;;  %v2249_v43 = vand.u32 2147483648, %v6036_v59 }
 0x4b8   :  { %v3617_v25 = vpop.eup %3616  ;;  %vm1921_vm3 = vcmp.eq.f32.partialorder %v5489_v31, %v1879_v51  ;;  %v6053_v12 = vadd.f32 1e-08, %v1879_v51  ;;  %v2235_v31 = vor.u32 1.1754944e-38, %v2234_v9 }
 0x4b9   :  { %v6055_v42 = vpop.eup %3618  ;;  %v2239_v30 = vmul.f32 %v3617_v25, %v6036_v59  ;;  %v1937_v32 = vsel %vm1921_vm3, %v3863_v48, 16  ;;  %v2231_v54 = vsel %vm2230_vm1, %v3615_v41, %v2227_v2  ;;  %vm2244_vm14 = vweird.f32 %v3617_v25  ;;  %v7418_v2 = vld [vmem:[#allocation50_spill] sm:$0xff] }
 0x4ba   :  { %3622 = vrcp.f32 %v6053_v12  ;;  %v6063_v40 = vsel %vm558_vm2, %v1937_v32, 2147483647  ;;  %v1137_v34 = vmul.f32 %v6055_v42, %v6032_v15  ;;  %v6068_v51 = vsel %vm2233_vm8, %v2235_v31, %v2231_v54  ;;  %v6075_v63 = vpop.eup %3620  ;;  %v7419_v31 = vld [vmem:[#allocation8_spill] sm:$0xff]  ;;  %vm2245_vm4 = vmor %vm2243_vm12, %vm2244_vm14 }
 0x4bb   :  { %v2240_v1 = vsub.f32 1.0, %v2239_v30  ;;  %v1983_v28 = vshra.s32 %v6063_v40, 16  ;;  %v6073_v60 = vadd.f32 %v6068_v51, %v1839_v4  ;;  %v2247_v41 = vand.u32 2147483647, %v6036_v59 }
 0x4bc   :  { %v1138_v32 = vsub.f32 1.0, %v1137_v34  ;;  %v2264_v21 = vand.u32 2147483648, %v6053_v12  ;;  %vm1142_vm11 = vweird.f32 %v6055_v42  ;;  %vm2258_vm6 = vweird.f32 %v6053_v12 }
 0x4bd   :  { %v6070_v7 = vcvt.s32.f32 %v1983_v28  ;;  %v2241_v30 = vmul.f32 %v3617_v25, %v2240_v1  ;;  %v1840_v28 = vadd.f32 %v7419_v31, %v7418_v2  ;;  %v1793_v1 = vmul.f32 %v6075_v63, %v6046_v33 }
 0x4be   :  { %v2250_v2 = vor.u32 1.1754944e-38, %v2249_v43  ;;  %vm2248_vm9 = vcmp.eq.f32.partialorder %v2247_v41, 8.507059e+37  ;;  %v1139_v62 = vmul.f32 %v6055_v42, %v1138_v32  ;;  %vm1141_vm1 = vweird.f32 %v6032_v15 }
 0x4bf   :  { %1986 = vmin.xlane.f32.xlu1 %v6070_v7  ;;  %v1882_v9 = vpop.xlane.xlu0 %1881  ;;  %v2242_v0 = vadd.f32 %v3617_v25, %v2241_v30  ;;  %vm6136_vm8 = vmor %vm1141_vm1, %vm1142_vm11  ;;  %vm1797_vm14 = vweird.f32 %v6046_v33 }
 0x4c0   :  { %v3623_v17 = vpop.eup %3622  ;;  %vm1922_vm0 = vcmp.eq.f32.partialorder %v5574_v50, %v1882_v9  ;;  %v6083_v4 = vadd.f32 1e-08, %v1882_v9  ;;  %v1140_v41 = vadd.f32 %v6055_v42, %v1139_v62 }
 0x4c1   :  { %v2254_v54 = vmul.f32 %v3623_v17, %v6053_v12  ;;  %v1938_v56 = vsel %vm1922_vm0, %v3863_v48, 16  ;;  %v2246_v31 = vsel %vm2245_vm4, %v3617_v25, %v2242_v0  ;;  %vm2259_vm5 = vweird.f32 %v3623_v17 }
 0x4c2   :  { %3624 = vrcp.f32 %v6083_v4  ;;  %v6092_v34 = vsel %vm558_vm2, %v1938_v56, 2147483647  ;;  %v6096_v30 = vsel %vm2248_vm9, %v2250_v2, %v2246_v31  ;;  %v1794_v56 = vsub.f32 1.0, %v1793_v1  ;;  %vm2260_vm3 = vmor %vm2258_vm6, %vm2259_vm5 }
 0x4c3   :  { %v2255_v50 = vsub.f32 1.0, %v2254_v54  ;;  %v1998_v9 = vshra.s32 %v6092_v34, 16  ;;  %v6101_v11 = vadd.f32 %v6096_v30, %v1840_v28  ;;  %v2262_v0 = vand.u32 2147483647, %v6053_v12 }
 0x4c4   :  { %v1795_v31 = vmul.f32 %v6075_v63, %v1794_v56  ;;  %v1144_v56 = vsel %vm6136_vm8, %v6055_v42, %v1140_v41  ;;  %vm1798_vm0 = vweird.f32 %v6075_v63  ;;  %v2279_v41 = vand.u32 2147483648, %v6083_v4 }
 0x4c5   :  { %v6098_v59 = vcvt.s32.f32 %v1998_v9  ;;  %v2256_v54 = vmul.f32 %v3623_v17, %v2255_v50  ;;  %v1841_v50 = vadd.f32 %v5167_v58, %v5125_v29  ;;  %vm2263_vm7 = vcmp.eq.f32.partialorder %v2262_v0, 8.507059e+37  ;;  %vm6157_vm9 = vmor %vm1797_vm14, %vm1798_vm0 }
 0x4c6   :  { %vm2273_vm5 = vweird.f32 %v6083_v4 }
 0x4c7   :  { %2001 = vmin.xlane.f32.xlu1 %v6098_v59  ;;  %v1885_v43 = vpop.xlane.xlu0 %1884  ;;  %v2257_v2 = vadd.f32 %v3623_v17, %v2256_v54  ;;  %v1532_v54 = vcvt.f32.s32 %v5683_v45  ;;  %v1147_v45 = vand.u32 2147483648, %v6032_v15 }
 0x4c8   :  { %v6106_v25 = vpop.eup %3624  ;;  %vm1923_vm10 = vcmp.eq.f32.partialorder %v5643_v10, %v1885_v43  ;;  %v6111_v32 = vadd.f32 1e-08, %v1885_v43  ;;  %v2265_v10 = vor.u32 1.1754944e-38, %v2264_v21 }
 0x4c9   :  { %v2269_v28 = vmul.f32 %v6106_v25, %v6083_v4  ;;  %v1939_v1 = vsel %vm1923_vm10, %v3863_v48, 16  ;;  %v2261_v43 = vsel %vm2260_vm3, %v3623_v17, %v2257_v2  ;;  %v1145_v17 = vand.u32 2147483647, %v6032_v15 }
 0x4ca   :  { %3626 = vrcp.f32 %v6111_v32  ;;  %v6121_v62 = vsel %vm558_vm2, %v1939_v1, 2147483647  ;;  %v6126_v3 = vsel %vm2263_vm7, %v2265_v10, %v2261_v43  ;;  %v1533_v2 = vshll.u32 %v1532_v54, 16 }
 0x4cb   :  { %v2013_v9 = vshra.s32 %v6121_v62, 16  ;;  %v2270_v29 = vsub.f32 1.0, %v2269_v28  ;;  %v6132_v12 = vadd.f32 %v6126_v3, %v1841_v50  ;;  %v1796_v28 = vadd.f32 %v6075_v63, %v1795_v31 }
 0x4cc   :  { %v1801_v10 = vand.u32 2147483647, %v6046_v33  ;;  %v1803_v15 = vand.u32 2147483648, %v6046_v33  ;;  %vm2274_vm12 = vweird.f32 %v6106_v25  ;;  %vm1146_vm4 = vcmp.eq.f32.partialorder %v1145_v17, 8.507059e+37 }
 0x4cd   :  { %v6129_v58 = vcvt.s32.f32 %v2013_v9  ;;  %v2271_v42 = vmul.f32 %v6106_v25, %v2270_v29  ;;  %v1148_v31 = vor.u32 1.1754944e-38, %v1147_v45  ;;  %v2277_v54 = vand.u32 2147483647, %v6083_v4  ;;  %vm2275_vm11 = vmor %vm2273_vm5, %vm2274_vm12  ;;  %v7429_v4 = vld [vmem:[#allocation38_spill] sm:$0xff] }
 0x4ce   :  { %v1800_v29 = vsel %vm6157_vm9, %v6075_v63, %v1796_v28  ;;  %v1804_v47 = vor.u32 1.1754944e-38, %v1803_v15  ;;  %vm1802_vm10 = vcmp.eq.f32.partialorder %v1801_v10, 8.507059e+37  ;;  %vm7430_vm3 = vcmp.eq.s32.totalorder %v3863_v48, %v7429_v4 }
 0x4cf   :  { %2016 = vmin.xlane.f32.xlu1 %v6129_v58  ;;  %v1530_v0 = vpop.xlane.xlu0 %1529  ;;  %v2272_v17 = vadd.f32 %v6106_v25, %v2271_v42  ;;  %v6173_v45 = vsel %vm1146_vm4, %v1148_v31, %v1144_v56  ;;  %vm2278_vm6 = vcmp.eq.f32.partialorder %v2277_v54, 8.507059e+37  ;;  %v2292_v42 = vand.u32 2147483647, %v6111_v32 }
 0x4d0   :  { %v3627_v1 = vpop.eup %3626  ;;  %v1531_v50 = vcvt.f32.s32 %v1530_v0  ;;  %v7424_v0 = vld [vmem:[#allocation33_spill] sm:$0xff]  ;;  %7425 = vst [vmem:[#allocation19_spill] sm:$0xff] %v6173_v45  ;;  %v6182_v63 = vsel %vm1802_vm10, %v1804_v47, %v1800_v29  ;;  %v1166_v56 = vsel %vm7430_vm3, %v6173_v45, 0.0  ;;  %vm2288_vm1 = vweird.f32 %v6111_v32 }
 0x4d1   :  { %v2284_v9 = vmul.f32 %v3627_v1, %v6111_v32  ;;  %v6166_v33 = vsel %vm1547_vm13, inf, %v7424_v0  ;;  %v2276_v37 = vsel %vm2275_vm11, %v6106_v25, %v2272_v17  ;;  %v2280_v0 = vor.u32 1.1754944e-38, %v2279_v41  ;;  %7428 = vst [vmem:[#allocation49_spill] sm:$0xff] %v6182_v63  ;;  %v7433_v17 = vld [vmem:[#allocation11_spill] sm:$0xff] }
 0x4d2   :  { %v6155_v43 = vadd.s32 %v1533_v2, %v1531_v50  ;;  %v7426_v2 = vld [vmem:[#allocation52_spill] sm:$0xff]  ;;  %v7427_v50 = vld [vmem:[#allocation53_spill] sm:$0xff]  ;;  %v1907_v21 = vsel %vm558_vm2, %v6166_v33, inf  ;;  %vm2289_vm7 = vweird.f32 %v3627_v1  ;;  %vm2293_vm0 = vcmp.eq.f32.partialorder %v2292_v42, 8.507059e+37 }
 0x4d3   :  { %v1842_v6 = vadd.f32 %v7427_v50, %v7426_v2  ;;  %v2285_v18 = vsub.f32 1.0, %v2284_v9  ;;  %v6192_v28 = vsel %vm2278_vm6, %v2280_v0, %v2276_v37  ;;  %v2294_v9 = vand.u32 2147483648, %v6111_v32  ;;  %vm2290_vm14 = vmor %vm2288_vm1, %vm2289_vm7  ;;  %v7434_v2 = vld [vmem:[#allocation12_spill] sm:$0xff] }
 0x4d4   :  { %vm1550_vm13 = vcmp.eq.s32.totalorder %v3863_v48, %v6155_v43  ;;  %7431 = vst [vmem:[#allocation47_spill] sm:$0xff] %v6192_v28  ;;  %v1843_v50 = vadd.f32 %v7434_v2, %v7433_v17 }
 0x4d5   :  { %v1822_v25 = vsel %vm1550_vm13, %v6182_v63, 0.0  ;;  %v6197_v15 = vadd.f32 %v6192_v28, %v1842_v6  ;;  %v2286_v47 = vmul.f32 %v3627_v1, %v2285_v18  ;;  %v2295_v29 = vor.u32 1.1754944e-38, %v2294_v9 }
 0x4d6   :  { %v6194_v10 = vadd.f32 %v1822_v25, %v1166_v56 }
 0x4d7   :  { %1908 = vmin.xlane.f32.xlu1 %v1907_v21  ;;  %v2287_v41 = vadd.f32 %v3627_v1, %v2286_v47 }
 0x4d8   :  { %7432 = vst [vmem:[#allocation21_spill] sm:$0xff] %v6194_v10 }
 0x4d9   :  { %v2291_v18 = vsel %vm2290_vm14, %v3627_v1, %v2287_v41 }
 0x4da   :  { %v6209_v0 = vsel %vm2293_vm0, %v2295_v29, %v2291_v18  ;;  %v7436_v18 = vld [vmem:[#allocation58_spill] sm:$0xff] }
 0x4db   :  { %7435 = vst [vmem:[#allocation34_spill] sm:$0xff] %v6209_v0 }
 0x4dc   :  { %v1897_v31 = vpop.xlane.xlu2 %1896 }
 0x4dd   :  { %vm1927_vm8 = vcmp.eq.f32.partialorder %v5821_v5, %v1897_v31  ;;  %v2215_v54 = vadd.f32 1e-08, %v1897_v31  ;;  %v6213_v5 = vadd.f32 %v6209_v0, %v1843_v50 }
 0x4de   :  { %v1943_v6 = vsel %vm1927_vm8, %v3863_v48, 16 }
 0x4df   :  { %3628 = vrcp.f32 %v2215_v54  ;;  %v6207_v37 = vsel %vm558_vm2, %v1943_v6, 2147483647  ;;  %v2354_v41 = vand.u32 2147483648, %v2215_v54  ;;  %v2352_v17 = vand.u32 2147483647, %v2215_v54 }
 0x4e0   :  { %v2073_v32 = vshra.s32 %v6207_v37, 16  ;;  %vm2348_vm4 = vweird.f32 %v2215_v54 }
 0x4e1   :  { %v2355_v6 = vor.u32 1.1754944e-38, %v2354_v41  ;;  %vm2353_vm5 = vcmp.eq.f32.partialorder %v2352_v17, 8.507059e+37 }
 0x4e2   :  { %v6215_v21 = vcvt.s32.f32 %v2073_v32  ;;  %v1847_v32 = vadd.f32 %v5750_v24, %v7436_v18 }
 0x4e4   :  { %v6217_v4 = vpop.xlane.xlu2 %1899  ;;  %2076 = vmin.xlane.f32.xlu2 %v6215_v21 }
 0x4e5   :  { %v3629_v56 = vpop.eup %3628  ;;  %v2216_v1 = vadd.f32 1e-08, %v6217_v4 }
 0x4e6   :  { %v2344_v25 = vmul.f32 %v3629_v56, %v2215_v54  ;;  %vm2349_vm12 = vweird.f32 %v3629_v56 }
 0x4e7   :  { %3630 = vrcp.f32 %v2216_v1  ;;  %vm2350_vm9 = vmor %vm2348_vm4, %vm2349_vm12  ;;  %vm2363_vm6 = vweird.f32 %v2216_v1 }
 0x4e8   :  { %v2345_v47 = vsub.f32 1.0, %v2344_v25 }
 0x4ea   :  { %v2346_v29 = vmul.f32 %v3629_v56, %v2345_v47 }
 0x4ec   :  { %v6221_v9 = vpop.xlane.xlu2 %1902  ;;  %v2347_v2 = vadd.f32 %v3629_v56, %v2346_v29 }
 0x4ed   :  { %v6224_v42 = vadd.f32 1e-08, %v6221_v9  ;;  %v3631_v31 = vpop.eup %3630 }
 0x4ee   :  { %v2359_v50 = vmul.f32 %v3631_v31, %v2216_v1  ;;  %v2351_v25 = vsel %vm2350_vm9, %v3629_v56, %v2347_v2  ;;  %v2369_v2 = vand.u32 2147483648, %v2216_v1  ;;  %vm2364_vm10 = vweird.f32 %v3631_v31 }
 0x4ef   :  { %3632 = vrcp.f32 %v6224_v42  ;;  %v6229_v10 = vsel %vm2353_vm5, %v2355_v6, %v2351_v25  ;;  %vm2365_vm7 = vmor %vm2363_vm6, %vm2364_vm10  ;;  %vm2378_vm14 = vweird.f32 %v6224_v42 }
 0x4f0   :  { %7437 = vst [vmem:[#allocation22_spill] sm:$0xff] %v6229_v10  ;;  %v6232_v45 = vadd.f32 %v6229_v10, %v1847_v32  ;;  %v2360_v47 = vsub.f32 1.0, %v2359_v50  ;;  %v7438_v50 = vld [vmem:[#allocation56_spill] sm:$0xff] }
 0x4f1   :  { %v1848_v18 = vadd.f32 %v5860_v44, %v7438_v50 }
 0x4f2   :  { %v2361_v17 = vmul.f32 %v3631_v31, %v2360_v47  ;;  %v2370_v47 = vor.u32 1.1754944e-38, %v2369_v2 }
 0x4f4   :  { %v1888_v63 = vpop.xlane.xlu2 %1887 }
 0x4f5   :  { %vm1924_vm11 = vcmp.eq.f32.partialorder %v5975_v20, %v1888_v63  ;;  %v6235_v35 = vadd.f32 1e-08, %v1888_v63  ;;  %v3633_v54 = vpop.eup %3632  ;;  %v2367_v20 = vand.u32 2147483647, %v2216_v1  ;;  %v2362_v63 = vadd.f32 %v3631_v31, %v2361_v17 }
 0x4f6   :  { %v1940_v29 = vsel %vm1924_vm11, %v3863_v48, 16  ;;  %v2374_v41 = vmul.f32 %v3633_v54, %v6224_v42  ;;  %vm2379_vm8 = vweird.f32 %v3633_v54 }
 0x4f7   :  { %3634 = vrcp.f32 %v6235_v35  ;;  %v6240_v24 = vsel %vm558_vm2, %v1940_v29, 2147483647  ;;  %v2366_v52 = vsel %vm2365_vm7, %v3631_v31, %v2362_v63  ;;  %vm2368_vm1 = vcmp.eq.f32.partialorder %v2367_v20, 8.507059e+37  ;;  %vm2380_vm4 = vmor %vm2378_vm14, %vm2379_vm8 }
 0x4f8   :  { %v2028_v56 = vshra.s32 %v6240_v24, 16  ;;  %v2375_v29 = vsub.f32 1.0, %v2374_v41  ;;  %v6255_v17 = vsel %vm2368_vm1, %v2370_v47, %v2366_v52  ;;  %v2382_v20 = vand.u32 2147483647, %v6224_v42 }
 0x4f9   :  { %7439 = vst [vmem:[#allocation24_spill] sm:$0xff] %v6255_v17  ;;  %v6259_v41 = vadd.f32 %v6255_v17, %v1848_v18  ;;  %v2309_v63 = vand.u32 2147483648, %v6235_v35  ;;  %v2307_v47 = vand.u32 2147483647, %v6235_v35  ;;  %vm2303_vm9 = vweird.f32 %v6235_v35 }
 0x4fa   :  { %v6244_v6 = vcvt.s32.f32 %v2028_v56  ;;  %v2376_v50 = vmul.f32 %v3633_v54, %v2375_v29  ;;  %vm2383_vm5 = vcmp.eq.f32.partialorder %v2382_v20, 8.507059e+37 }
 0x4fb   :  { %7440 = vst [vmem:[#allocation25_spill] sm:$0xff] %v6259_v41  ;;  %v7441_v41 = vld [vmem:[#allocation13_spill] sm:$0xff]  ;;  %vm2308_vm10 = vcmp.eq.f32.partialorder %v2307_v47, 8.507059e+37 }
 0x4fc   :  { %2031 = vmin.xlane.f32.xlu0 %v6244_v6  ;;  %v1891_v32 = vpop.xlane.xlu2 %1890  ;;  %v2377_v31 = vadd.f32 %v3633_v54, %v2376_v50  ;;  %v1844_v10 = vadd.f32 %v7442_v27, %v7441_v41  ;;  %v3683_v47 = vld [vmem:[%s7122_s1] sm:$0xff] }
 0x4fd   :  { %v3635_v25 = vpop.eup %3634  ;;  %vm1925_vm3 = vcmp.eq.f32.partialorder %v5984_v46, %v1891_v32  ;;  %v2213_v0 = vadd.f32 1e-08, %v1891_v32  ;;  %v2384_v32 = vand.u32 2147483648, %v6224_v42 }
 0x4fe   :  { %v2299_v56 = vmul.f32 %v3635_v25, %v6235_v35  ;;  %v1941_v28 = vsel %vm1925_vm3, %v3863_v48, 16  ;;  %vm2304_vm12 = vweird.f32 %v3635_v25 }
 0x4ff   :  { %3636 = vrcp.f32 %v2213_v0  ;;  %v6253_v44 = vsel %vm558_vm2, %v1941_v28, 2147483647  ;;  %v1849_v28 = vadd.f32 %v5955_v22, %v5952_v55  ;;  %v2381_v22 = vsel %vm2380_vm4, %v3633_v54, %v2377_v31  ;;  %vm2305_vm11 = vmor %vm2303_vm9, %vm2304_vm12 }
 0x500   :  { %v2043_v1 = vshra.s32 %v6253_v44, 16  ;;  %v2300_v46 = vsub.f32 1.0, %v2299_v56  ;;  %v2324_v20 = vand.u32 2147483648, %v2213_v0  ;;  %vm2318_vm3 = vweird.f32 %v2213_v0 }
 0x501   :  { %vm1929_vm4 = vcmp.eq.f32.partialorder %v5964_v38, %v6221_v9 }
 0x502   :  { %v6261_v2 = vcvt.s32.f32 %v2043_v1  ;;  %v2301_v29 = vmul.f32 %v3635_v25, %v2300_v46  ;;  %v2385_v1 = vor.u32 1.1754944e-38, %v2384_v32  ;;  %v1945_v13 = vsel %vm1929_vm4, %v3863_v48, 16 }
 0x503   :  { %vm2516_vm4 = vweird.f32 %v6073_v60 }
 0x504   :  { %2046 = vmin.xlane.f32.xlu0 %v6261_v2  ;;  %v6268_v52 = vpop.xlane.xlu2 %1893  ;;  %v2302_v17 = vadd.f32 %v3635_v25, %v2301_v29  ;;  %v6281_v46 = vsel %vm2383_vm5, %v2385_v1, %v2381_v22 }
 0x505   :  { %v3637_v18 = vpop.eup %3636  ;;  %vm1926_vm0 = vcmp.eq.f32.partialorder %v5993_v23, %v6268_v52  ;;  %v2310_v23 = vor.u32 1.1754944e-38, %v2309_v63  ;;  %v6286_v54 = vadd.f32 %v6281_v46, %v1849_v28 }
 0x506   :  { %v2314_v56 = vmul.f32 %v3637_v18, %v2213_v0  ;;  %v1942_v55 = vsel %vm1926_vm0, %v3863_v48, 16  ;;  %v2306_v53 = vsel %vm2305_vm11, %v3635_v25, %v2302_v17  ;;  %vm2319_vm6 = vweird.f32 %v3637_v18  ;;  %v7443_v17 = vld [vmem:[#allocation55_spill] sm:$0xff] }
 0x507   :  { %v6277_v50 = vsel %vm558_vm2, %v1942_v55, 2147483647  ;;  %v6290_v29 = vsel %vm2308_vm10, %v2310_v23, %v2306_v53  ;;  %v2322_v55 = vand.u32 2147483647, %v2213_v0  ;;  %vm2320_vm7 = vmor %vm2318_vm3, %vm2319_vm6  ;;  %v2325_v25 = vor.u32 1.1754944e-38, %v2324_v20 }
 0x508   :  { %v2058_v42 = vshra.s32 %v6277_v50, 16  ;;  %v2315_v32 = vsub.f32 1.0, %v2314_v56  ;;  %v6293_v35 = vadd.f32 %v6290_v29, %v1844_v10  ;;  %v1845_v41 = vadd.f32 %v5718_v36, %v7443_v17  ;;  %v3682_v10 = vld [vmem:[%s7122_s1 + $0x8] sm:$0xff]  ;;  %v6310_v36 = vpop.xlane.xlu1 %1905  ;;  %s3730_s1 = smov 128  }
 0x509   :  { %vm2323_vm1 = vcmp.eq.f32.partialorder %v2322_v55, 8.507059e+37  ;;  %v3430_v56 = vpack.i.bf16 %v3683_v47, %v3682_v10  ;;  %v1967_v23 = vand.u32 65535, %v6041_v16  ;;  %vm1928_vm0 = vcmp.eq.f32.partialorder %v5879_v8, %v6217_v4 }
 0x50a   :  { %v6288_v31 = vcvt.s32.f32 %v2058_v42  ;;  %v2316_v63 = vmul.f32 %v3637_v18, %v2315_v32  ;;  %v1944_v16 = vsel %vm1928_vm0, %v3863_v48, 16  ;;  %v6359_v47 = vsel %vm558_vm2, %v1945_v13, 2147483647 }
 0x50b   :  { %v1969_v20 = vcvt.s32.f32 %v1967_v23  ;;  %v2103_v9 = vshra.s32 %v6359_v47, 16 }
 0x50c   :  { %2061 = vmin.xlane.f32.xlu1 %v6288_v31  ;;  %v2317_v27 = vadd.f32 %v3637_v18, %v2316_v63  ;;  %v6374_v23 = vpop.xlane.xlu2 %1911 }
 0x50d   :  { %vm1932_vm9 = vcmp.eq.f32.partialorder %v6000_v49, %v6374_v23 }
 0x50e   :  { %v2321_v28 = vsel %vm2320_vm7, %v3637_v18, %v2317_v27  ;;  %v1952_v18 = vand.u32 65535, %v6026_v57  ;;  %v1982_v57 = vand.u32 65535, %v6063_v40  ;;  %v6337_v40 = vsel %vm558_vm2, %v1944_v16, 2147483647 }
 0x50f   :  { %v6298_v53 = vsel %vm2323_vm1, %v2325_v25, %v2321_v28  ;;  %v7444_v25 = vld [vmem:[#allocation37_spill] sm:$0xff] }
 0x510   :  { %v6307_v0 = vadd.f32 %v6298_v53, %v1845_v41  ;;  %v1954_v1 = vcvt.s32.f32 %v1952_v18  ;;  %v1984_v27 = vcvt.s32.f32 %v1982_v57  ;;  %v7445_v41 = vld [vmem:[#allocation39_spill] sm:$0xff] }
 0x511   :  { %v6353_v28 = vsel %vm1550_vm13, inf, %v7445_v41 }
 0x512   :  { %v1916_v38 = vsel %vm558_vm2, %v6353_v28, inf }
 0x518   :  { %3431 = vrot.lane.b32.xlu0 %v3430_v56, %s3726_s17 }
 0x522   :  { %v6313_v22 = vpop.xlane.xlu1 %1956 }
 0x523   :  { %vm1958_vm8 = vcmp.eq.f32.partialorder %v6029_v19, %v6313_v22 }
 0x524   :  { %v1959_v42 = vsel %vm1958_vm8, %v1954_v1, inf  ;;  %v6367_v1 = vcvt.s32.f32 %v2103_v9 }
 0x525   :  { %1960 = vmin.xlane.f32.xlu2 %v1959_v42 }
 0x52a   :  { %v6318_v32 = vpop.xlane.xlu1 %1971 }
 0x52b   :  { %vm1973_vm14 = vcmp.eq.f32.partialorder %v6048_v61, %v6318_v32  ;;  %v6334_v61 = vsel %vm1549_vm15, inf, %v7444_v25  ;;  %vm1930_vm15 = vcmp.eq.f32.partialorder %v5808_v39, %v6310_v36 }
 0x52c   :  { %v1974_v63 = vsel %vm1973_vm14, %v1969_v20, inf  ;;  %v1913_v8 = vsel %vm558_vm2, %v6334_v61, inf  ;;  %v1946_v43 = vsel %vm1930_vm15, %v3863_v48, 16 }
 0x52d   :  { %1975 = vmin.xlane.f32.xlu2 %v1974_v63  ;;  %v6370_v42 = vsel %vm558_vm2, %v1946_v43, 2147483647  ;;  %v1997_v43 = vand.u32 65535, %v6092_v34 }
 0x52e   :  { %v2118_v39 = vshra.s32 %v6370_v42, 16 }
 0x52f   :  { %v1999_v34 = vcvt.s32.f32 %v1997_v43 }
 0x530   :  { %v6378_v57 = vcvt.s32.f32 %v2118_v39 }
 0x532   :  { %v6323_v55 = vpop.xlane.xlu1 %1986 }
 0x533   :  { %vm1988_vm12 = vcmp.eq.f32.partialorder %v6070_v7, %v6323_v55  ;;  %v2088_v7 = vshra.s32 %v6337_v40, 16 }
 0x534   :  { %v1989_v19 = vsel %vm1988_vm12, %v1984_v27, inf  ;;  %v2072_v27 = vand.u32 65535, %v6207_v37  ;;  %v1948_v37 = vsel %vm1932_vm9, %v3863_v48, 16 }
 0x535   :  { %1990 = vmin.xlane.f32.xlu1 %v1989_v19  ;;  %v6346_v4 = vcvt.s32.f32 %v2088_v7 }
 0x53a   :  { %v6339_v17 = vpop.xlane.xlu1 %2001 }
 0x53b   :  { %vm2003_vm3 = vcmp.eq.f32.partialorder %v6098_v59, %v6339_v17 }
 0x53d   :  { %1914 = vmin.xlane.f32.xlu1 %v1913_v8  ;;  %v2074_v8 = vcvt.s32.f32 %v2072_v27 }
 0x542   :  { %v6355_v10 = vpop.xlane.xlu1 %2016  ;;  %2091 = vmin.xlane.f32.xlu0 %v6346_v4 }
 0x543   :  { %vm2018_vm1 = vcmp.eq.f32.partialorder %v6129_v58, %v6355_v10 }
 0x545   :  { %1917 = vmin.xlane.f32.xlu1 %v1916_v38 }
 0x54a   :  { %v1909_v56 = vpop.xlane.xlu1 %1908 }
 0x54b   :  { %v2219_v18 = vadd.f32 1e-08, %v1909_v56  ;;  %vm1931_vm13 = vcmp.eq.f32.partialorder %v6166_v33, %v1909_v56  ;;  %v6397_v56 = vsel %vm558_vm2, %v1948_v37, 2147483647  ;;  %v2012_v37 = vand.u32 65535, %v6121_v62 }
 0x54c   :  { %v1947_v20 = vsel %vm1931_vm13, %v3863_v48, 16  ;;  %v2042_v62 = vand.u32 65535, %v6253_v44 }
 0x54d   :  { %3638 = vrcp.f32 %v2219_v18  ;;  %2106 = vmin.xlane.f32.xlu1 %v6367_v1  ;;  %v6382_v19 = vsel %vm558_vm2, %v1947_v20, 2147483647  ;;  %v2414_v41 = vand.u32 2147483648, %v2219_v18  ;;  %v2412_v9 = vand.u32 2147483647, %v2219_v18  ;;  %v7446_v20 = vld [vmem:[#allocation60_spill] sm:$0xff] }
 0x54e   :  { %v2133_v7 = vshra.s32 %v6382_v19, 16  ;;  %vm2408_vm10 = vweird.f32 %v2219_v18  ;;  %v1851_v27 = vadd.f32 %v5876_v14, %v7446_v20  ;;  %v2014_v14 = vcvt.s32.f32 %v2012_v37 }
 0x54f   :  { %vm2413_vm7 = vcmp.eq.f32.partialorder %v2412_v9, 8.507059e+37  ;;  %3640 = vrcp.f32 %v6073_v60 }
 0x550   :  { %v6394_v49 = vcvt.s32.f32 %v2133_v7  ;;  %v2019_v59 = vsel %vm2018_vm1, %v2014_v14, inf  ;;  %3642 = vrcp.f32 %v6101_v11  ;;  %vm2546_vm1 = vweird.f32 %v6132_v12 }
 0x551   :  { %3644 = vrcp.f32 %v6132_v12 }
 0x552   :  { %3646 = vrcp.f32 %v6197_v15 }
 0x553   :  { %v3639_v63 = vpop.eup %3638  ;;  %3648 = vrcp.f32 %v6232_v45 }
 0x554   :  { %v2404_v16 = vmul.f32 %v3639_v63, %v2219_v18  ;;  %vm2409_vm11 = vweird.f32 %v3639_v63  ;;  %v2004_v18 = vsel %vm2003_vm3, %v1999_v34, inf }
 0x555   :  { %2121 = vmin.xlane.f32.xlu1 %v6378_v57  ;;  %vm2410_vm6 = vmor %vm2408_vm10, %vm2409_vm11  ;;  %v3641_v44 = vpop.eup %3640  ;;  %vm2531_vm11 = vweird.f32 %v6101_v11 }
 0x556   :  { %v2405_v33 = vsub.f32 1.0, %v2404_v16  ;;  %v2512_v34 = vmul.f32 %v3641_v44, %v6073_v60  ;;  %vm2517_vm12 = vweird.f32 %v3641_v44 }
 0x557   :  { %v6387_v25 = vpop.xlane.xlu2 %2076  ;;  %vm2518_vm15 = vmor %vm2516_vm4, %vm2517_vm12 }
 0x558   :  { %vm2078_vm5 = vcmp.eq.f32.partialorder %v6215_v21, %v6387_v25  ;;  %v2406_v38 = vmul.f32 %v3639_v63, %v2405_v33  ;;  %v2415_v21 = vor.u32 1.1754944e-38, %v2414_v41  ;;  %v2148_v33 = vshra.s32 %v6397_v56, 16 }
 0x559   :  { %v2079_v13 = vsel %vm2078_vm5, %v2074_v8, inf }
 0x55a   :  { %2080 = vmin.xlane.f32.xlu2 %v2079_v13  ;;  %v2407_v39 = vadd.f32 %v3639_v63, %v2406_v38  ;;  %v6411_v13 = vcvt.s32.f32 %v2148_v33  ;;  %v2513_v33 = vsub.f32 1.0, %v2512_v34 }
 0x55c   :  { %v2411_v16 = vsel %vm2410_vm6, %v3639_v63, %v2407_v39  ;;  %v2027_v63 = vand.u32 65535, %v6240_v24  ;;  %v2044_v39 = vcvt.s32.f32 %v2042_v62  ;;  %v2057_v24 = vand.u32 65535, %v6277_v50  ;;  %v3643_v50 = vpop.eup %3642 }
 0x55d   :  { %2136 = vmin.xlane.f32.xlu1 %v6394_v49  ;;  %v6405_v8 = vsel %vm2413_vm7, %v2415_v21, %v2411_v16  ;;  %v2514_v37 = vmul.f32 %v3641_v44, %v2513_v33  ;;  %v3645_v62 = vpop.eup %3644  ;;  %vm2532_vm5 = vweird.f32 %v3643_v50 }
 0x55e   :  { %v6408_v7 = vadd.f32 %v6405_v8, %v1851_v27  ;;  %v2029_v38 = vcvt.s32.f32 %v2027_v63  ;;  %v2059_v20 = vcvt.s32.f32 %v2057_v24  ;;  %v7448_v24 = vld [vmem:[#allocation5_spill] sm:$0xff]  ;;  %v2542_v34 = vmul.f32 %v3645_v62, %v6132_v12  ;;  %vm2533_vm10 = vmor %vm2531_vm11, %vm2532_vm5 }
 0x55f   :  { %vm2547_vm7 = vweird.f32 %v3645_v62  ;;  %vm2561_vm11 = vweird.f32 %v6197_v15 }
 0x562   :  { %2005 = vmin.xlane.f32.xlu2 %v2004_v18  ;;  %v1963_v18 = vcvt.f32.s32 %v6313_v22  ;;  %v2520_v22 = vand.u32 2147483647, %v6073_v60 }
 0x564   :  { %v1964_v63 = vshll.u32 %v1963_v18, 16  ;;  %v7450_v18 = vld [vmem:[#allocation7_spill] sm:$0xff]  ;;  %vm2521_vm9 = vcmp.eq.f32.partialorder %v2520_v22, 8.507059e+37 }
 0x565   :  { %2151 = vmin.xlane.f32.xlu1 %v6411_v13 }
 0x56a   :  { %2020 = vmin.xlane.f32.xlu2 %v2019_v59 }
 0x56f   :  { %v6417_v41 = vpop.xlane.xlu0 %2031 }
 0x570   :  { %vm2033_vm8 = vcmp.eq.f32.partialorder %v6244_v6, %v6417_v41 }
 0x571   :  { %v2034_v9 = vsel %vm2033_vm8, %v2029_v38, inf  ;;  %vm2548_vm8 = vmor %vm2546_vm1, %vm2547_vm7 }
 0x572   :  { %2035 = vmin.xlane.f32.xlu2 %v2034_v9  ;;  %v2515_v9 = vadd.f32 %v3641_v44, %v2514_v37 }
 0x577   :  { %v6422_v43 = vpop.xlane.xlu0 %2046 }
 0x578   :  { %vm2048_vm14 = vcmp.eq.f32.partialorder %v6261_v2, %v6422_v43 }
 0x579   :  { %v2049_v58 = vsel %vm2048_vm14, %v2044_v39, inf  ;;  %v2522_v39 = vand.u32 2147483648, %v6073_v60 }
 0x57a   :  { %2050 = vmin.xlane.f32.xlu2 %v2049_v58  ;;  %v7447_v58 = vld [vmem:[#allocation6_spill] sm:$0xff] }
 0x57f   :  { %v6427_v21 = vpop.xlane.xlu1 %2061 }
 0x580   :  { %vm2063_vm0 = vcmp.eq.f32.partialorder %v6288_v31, %v6427_v21  ;;  %v2527_v31 = vmul.f32 %v3643_v50, %v6101_v11 }
 0x581   :  { %v2064_v6 = vsel %vm2063_vm0, %v2059_v20, inf  ;;  %v7449_v20 = vpack.i.bf16 %v7447_v58, %v7448_v24  ;;  %v2543_v24 = vsub.f32 1.0, %v2542_v34 }
 0x582   :  { %2065 = vmin.xlane.f32.xlu2 %v2064_v6  ;;  %v2528_v59 = vsub.f32 1.0, %v2527_v31  ;;  %v2523_v31 = vor.u32 1.1754944e-38, %v2522_v39 }
 0x583   :  { %v2544_v39 = vmul.f32 %v3645_v62, %v2543_v24  ;;  %v2087_v24 = vand.u32 65535, %v6337_v40 }
 0x58a   :  { %v3432_v27 = vpop.permute.xlu0 %3431 }
 0x58b   :  { %v3433_v16 = vunpack.i.l.bf16 %v3432_v27  ;;  %v3434_v2 = vunpack.i.h.bf16 %v3432_v27  ;;  %v2529_v27 = vmul.f32 %v3643_v50, %v2528_v59 }
 0x58d   :  { %2795 = vmatpush.msrb.mxu0 %v3433_v16  ;;  %v1978_v16 = vcvt.f32.s32 %v6318_v32  ;;  %v2537_v32 = vand.u32 2147483648, %v6101_v11 }
 0x58f   :  { %2796 = vmatpush.msrb.mxu0 %v3434_v2  ;;  %v2519_v2 = vsel %vm2518_vm15, %v3641_v44, %v2515_v9  ;;  %v1979_v60 = vshll.u32 %v1978_v16, 16  ;;  %v1993_v44 = vcvt.f32.s32 %v6323_v55  ;;  %v2538_v22 = vor.u32 1.1754944e-38, %v2537_v32 }
 0x598   :  { %v1961_v14 = vpop.xlane.xlu2 %1960 }
 0x599   :  { %v1962_v38 = vcvt.f32.s32 %v1961_v14 }
 0x59a   :  { %3436 = vrot.lane.b32.xlu2 %v7449_v20, %s3726_s17 }
 0x59b   :  { %v1965_v6 = vadd.s32 %v1964_v63, %v1962_v38  ;;  %v2524_v63 = vsel %vm2521_vm9, %v2523_v31, %v2519_v2  ;;  %v2530_v38 = vadd.f32 %v3643_v50, %v2529_v27  ;;  %v7451_v27 = vld [vmem:[#allocation51_spill] sm:$0xff] }
 0x59d   :  { %vm2191_vm13 = vcmp.eq.s32.totalorder %v3863_v48, %v1965_v6  ;;  %v2534_v9 = vsel %vm2533_vm10, %v3643_v50, %v2530_v38  ;;  %v7452_v38 = vld [vmem:[#allocation9_spill] sm:$0xff]  ;;  %vm2636_vm10 = vweird.f32 %v6232_v45 }
 0x59e   :  { %v2463_v33 = vsel %vm2191_vm13, %v6068_v51, 0.0  ;;  %v2535_v51 = vand.u32 2147483647, %v6101_v11  ;;  %v2545_v11 = vadd.f32 %v3645_v62, %v2544_v39  ;;  %v6487_v39 = vadd.f32 1e-08, %v6268_v52 }
 0x59f   :  { %v2479_v37 = vadd.f32 %v2463_v33, %v7450_v18  ;;  %v1994_v33 = vshll.u32 %v1993_v44, 16 }
 0x5a0   :  { %v1976_v14 = vpop.xlane.xlu2 %1975  ;;  %vm2536_vm3 = vcmp.eq.f32.partialorder %v2535_v51, 8.507059e+37  ;;  %v2549_v50 = vsel %vm2548_vm8, %v3645_v62, %v2545_v11  ;;  %v2089_v51 = vcvt.s32.f32 %v2087_v24 }
 0x5a1   :  { %v1977_v58 = vcvt.f32.s32 %v1976_v14  ;;  %v2525_v59 = vmul.f32 %v2524_v63, %v2479_v37  ;;  %v2539_v34 = vsel %vm2536_vm3, %v2538_v22, %v2534_v9  ;;  %v2552_v37 = vand.u32 2147483648, %v6132_v12 }
 0x5a3   :  { %v1980_v20 = vadd.s32 %v1979_v60, %v1977_v58  ;;  %3392 = vmatmul.msk.f32.vlgmr.msrb.gmra.mxu0 %vm558_vm2, %v2525_v59  ;;  %v2553_v63 = vor.u32 1.1754944e-38, %v2552_v37  ;;  %v2117_v37 = vand.u32 65535, %v6370_v42  ;;  %v2083_v42 = vcvt.f32.s32 %v6387_v25 }
 0x5a5   :  { %vm2192_vm6 = vcmp.eq.s32.totalorder %v3863_v48, %v1980_v20 }
 0x5a6   :  { %v2464_v6 = vsel %vm2192_vm6, %v6096_v30, 0.0  ;;  %v2550_v30 = vand.u32 2147483647, %v6132_v12 }
 0x5a7   :  { %v2480_v16 = vadd.f32 %v2464_v6, %v7451_v27  ;;  %v2102_v27 = vand.u32 65535, %v6359_v47 }
 0x5a8   :  { %v1991_v2 = vpop.xlane.xlu1 %1990  ;;  %vm2551_vm0 = vcmp.eq.f32.partialorder %v2550_v30, 8.507059e+37 }
 0x5a9   :  { %v1992_v31 = vcvt.f32.s32 %v1991_v2  ;;  %v2540_v18 = vmul.f32 %v2539_v34, %v2480_v16  ;;  %v2554_v59 = vsel %vm2551_vm0, %v2553_v63, %v2549_v50  ;;  %v6497_v16 = vpop.eup %3646  ;;  %v2104_v34 = vcvt.s32.f32 %v2102_v27 }
 0x5aa   :  { %v6503_v52 = vpop.eup %3648  ;;  %vm2562_vm5 = vweird.f32 %v6497_v16 }
 0x5ab   :  { %v1995_v55 = vadd.s32 %v1994_v33, %v1992_v31  ;;  %3393 = vmatmul.msk.f32.gmra.mxu0 %vm558_vm2, %v2540_v18  ;;  %v2557_v33 = vmul.f32 %v6497_v16, %v6197_v15  ;;  %v2632_v18 = vmul.f32 %v6503_v52, %v6232_v45  ;;  %vm2637_vm3 = vweird.f32 %v6503_v52 }
 0x5ad   :  { %vm2193_vm14 = vcmp.eq.s32.totalorder %v3863_v48, %v1995_v55  ;;  %v2558_v55 = vsub.f32 1.0, %v2557_v33  ;;  %v2633_v63 = vsub.f32 1.0, %v2632_v18 }
 0x5ae   :  { %v2465_v14 = vsel %vm2193_vm14, %v6126_v3, 0.0 }
 0x5af   :  { %v2481_v60 = vadd.f32 %v2465_v14, %v7452_v38  ;;  %v2119_v38 = vcvt.s32.f32 %v2117_v37 }
 0x5b0   :  { %v1915_v58 = vpop.xlane.xlu1 %1914 }
 0x5b1   :  { %vm1933_vm12 = vcmp.eq.f32.partialorder %v6334_v61, %v1915_v58  ;;  %v2555_v32 = vmul.f32 %v2554_v59, %v2481_v60  ;;  %v6479_v61 = vadd.f32 1e-08, %v1915_v58  ;;  %v2559_v60 = vmul.f32 %v6497_v16, %v2558_v55 }
 0x5b2   :  { %v1949_v20 = vsel %vm1933_vm12, %v3863_v48, 16 }
 0x5b3   :  { %3394 = vmatmul.msk.f32.gmra.mxu0 %vm558_vm2, %v2555_v32  ;;  %v6469_v12 = vsel %vm558_vm2, %v1949_v20, 2147483647  ;;  %3650 = vrcp.f32 %v6479_v61  ;;  %v7453_v20 = vld [vmem:[#allocation31_spill] sm:$0xff]  ;;  %v2444_v25 = vand.u32 2147483648, %v6479_v61  ;;  %v2442_v27 = vand.u32 2147483647, %v6479_v61 }
 0x5b4   :  { %v2163_v3 = vshra.s32 %v6469_v12, 16  ;;  %3652 = vrcp.f32 %v6487_v39  ;;  %vm2438_vm7 = vweird.f32 %v6479_v61 }
 0x5b5   :  { %v6472_v62 = vpop.xlane.xlu0 %2091  ;;  %3654 = vrcp.f32 %v6213_v5  ;;  %vm2443_vm14 = vcmp.eq.f32.partialorder %v2442_v27, 8.507059e+37 }
 0x5b6   :  { %vm2093_vm4 = vcmp.eq.f32.partialorder %v6346_v4, %v6472_v62  ;;  %v6476_v44 = vcvt.s32.f32 %v2163_v3  ;;  %v1853_v3 = vadd.f32 %v7453_v20, %v6007_v26  ;;  %3656 = vrcp.f32 %v6293_v35 }
 0x5b7   :  { %v2094_v40 = vsel %vm2093_vm4, %v2089_v51, inf  ;;  %v2634_v51 = vmul.f32 %v6503_v52, %v2633_v63  ;;  %v2445_v63 = vor.u32 1.1754944e-38, %v2444_v25  ;;  %vm6567_vm4 = vmor %vm2636_vm10, %vm2637_vm3  ;;  %3658 = vrcp.f32 %v6307_v0 }
 0x5b8   :  { %2166 = vmin.xlane.f32.xlu0 %v6476_v44  ;;  %v6482_v9 = vpop.xlane.xlu1 %1917  ;;  %2095 = vmin.xlane.f32.xlu1 %v2094_v40  ;;  %v2132_v40 = vand.u32 65535, %v6382_v19  ;;  %v2640_v19 = vand.u32 2147483647, %v6232_v45 }
 0x5b9   :  { %vm1934_vm15 = vcmp.eq.f32.partialorder %v6353_v28, %v6482_v9  ;;  %v3651_v47 = vpop.eup %3650  ;;  %v2635_v18 = vadd.f32 %v6503_v52, %v2634_v51  ;;  %v2147_v51 = vand.u32 65535, %v6397_v56  ;;  %v2337_v56 = vand.u32 2147483647, %v6487_v39 }
 0x5ba   :  { %v1950_v4 = vsel %vm1934_vm15, %v3863_v48, 16  ;;  %v6514_v11 = vpop.eup %3652  ;;  %v2434_v50 = vmul.f32 %v3651_v47, %v6479_v61  ;;  %vm2439_vm6 = vweird.f32 %v3651_v47  ;;  %vm6584_vm15 = vmor %vm2561_vm11, %vm2562_vm5  ;;  %vm2641_vm5 = vcmp.eq.f32.partialorder %v2640_v19, 8.507059e+37 }
 0x5bb   :  { %v6492_v6 = vsel %vm558_vm2, %v1950_v4, 2147483647  ;;  %v6517_v30 = vpop.eup %3654  ;;  %v2329_v14 = vmul.f32 %v6514_v11, %v6487_v39  ;;  %v6538_v4 = vadd.f32 %v6497_v16, %v2559_v60  ;;  %vm2440_vm1 = vmor %vm2438_vm7, %vm2439_vm6  ;;  %vm2334_vm12 = vweird.f32 %v6514_v11 }
 0x5bc   :  { %v2178_v22 = vshra.s32 %v6492_v6, 16  ;;  %v6527_v58 = vmul.f32 %v6517_v30, %v6213_v5  ;;  %v2435_v59 = vsub.f32 1.0, %v2434_v50  ;;  %v2639_v25 = vsel %vm6567_vm4, %v6503_v52, %v2635_v18  ;;  %v6591_v27 = vpop.eup %3656 }
 0x5bd   :  { %v2330_v32 = vsub.f32 1.0, %v2329_v14  ;;  %v2134_v14 = vcvt.s32.f32 %v2132_v40  ;;  %v2339_v40 = vand.u32 2147483648, %v6487_v39  ;;  %v2564_v18 = vsel %vm6584_vm15, %v6497_v16, %v6538_v4 }
 0x5be   :  { %v6500_v28 = vcvt.s32.f32 %v2178_v22  ;;  %v2436_v26 = vmul.f32 %v3651_v47, %v2435_v59  ;;  %v2587_v16 = vmul.f32 %v6591_v27, %v6293_v35  ;;  %vm2338_vm10 = vcmp.eq.f32.partialorder %v2337_v56, 8.507059e+37 }
 0x5bf   :  { %vm2577_vm7 = vweird.f32 %v6517_v30  ;;  %vm2591_vm4 = vweird.f32 %v6293_v35 }
 0x5c0   :  { %2181 = vmin.xlane.f32.xlu0 %v6500_v28  ;;  %v6506_v2 = vpop.xlane.xlu1 %2106  ;;  %v2437_v37 = vadd.f32 %v3651_v47, %v2436_v26  ;;  %v2588_v56 = vsub.f32 1.0, %v2587_v16 }
 0x5c1   :  { %vm2108_vm13 = vcmp.eq.f32.partialorder %v6367_v1, %v6506_v2 }
 0x5c2   :  { %v2109_v31 = vsel %vm2108_vm13, %v2104_v34, inf  ;;  %v2084_v34 = vshll.u32 %v2083_v42, 16  ;;  %v2441_v60 = vsel %vm2440_vm1, %v3651_v47, %v2437_v37  ;;  %v7454_v42 = vld [vmem:[#allocation22_spill] sm:$0xff]  ;;  %v7457_v47 = vld [vmem:[#allocation28_spill] sm:$0xff]  ;;  %vm2333_vm13 = vweird.f32 %v6487_v39 }
 0x5c3   :  { %2110 = vmin.xlane.f32.xlu1 %v2109_v31  ;;  %v2331_v31 = vmul.f32 %v6514_v11, %v2330_v32  ;;  %v6558_v59 = vsel %vm2443_vm14, %v2445_v63, %v2441_v60  ;;  %v2149_v63 = vcvt.s32.f32 %v2147_v51  ;;  %v7462_v60 = vld [vmem:[#allocation57_spill] sm:$0xff]  ;;  %vm2576_vm1 = vweird.f32 %v6213_v5 }
 0x5c5   :  { %v2332_v32 = vadd.f32 %v6514_v11, %v2331_v31 }
 0x5c8   :  { %v6522_v1 = vpop.xlane.xlu1 %2121 }
 0x5c9   :  { %vm2123_vm9 = vcmp.eq.f32.partialorder %v6378_v57, %v6522_v1  ;;  %v2573_v57 = vsub.f32 1.0, %v6527_v58  ;;  %v2008_v58 = vcvt.f32.s32 %v6339_v17  ;;  %v6572_v17 = vadd.f32 %v6558_v59, %v1853_v3 }
 0x5ca   :  { %v2124_v24 = vsel %vm2123_vm9, %v2119_v38, inf  ;;  %v2642_v38 = vand.u32 2147483648, %v6232_v45  ;;  %v2565_v3 = vand.u32 2147483647, %v6197_v15  ;;  %vm6596_vm9 = vmor %vm2333_vm13, %vm2334_vm12  ;;  %vm2592_vm12 = vweird.f32 %v6591_v27 }
 0x5cb   :  { %2125 = vmin.xlane.f32.xlu0 %v2124_v24  ;;  %v2574_v39 = vmul.f32 %v6517_v30, %v2573_v57  ;;  %v2336_v37 = vsel %vm6596_vm9, %v6514_v11, %v2332_v32  ;;  %v2023_v57 = vcvt.f32.s32 %v6355_v10  ;;  %v7465_v32 = vld [vmem:[#allocation54_spill] sm:$0xff]  ;;  %vm2593_vm15 = vmor %vm2591_vm4, %vm2592_vm12 }
 0x5cc   :  { %v2643_v26 = vor.u32 1.1754944e-38, %v2642_v38  ;;  %v2340_v38 = vor.u32 1.1754944e-38, %v2339_v40  ;;  %vm2566_vm3 = vcmp.eq.f32.partialorder %v2565_v3, 8.507059e+37  ;;  %v6630_v40 = vpop.eup %3658  ;;  %v2580_v3 = vand.u32 2147483647, %v6213_v5 }
 0x5cd   :  { %v2081_v22 = vpop.xlane.xlu2 %2080  ;;  %v2575_v51 = vadd.f32 %v6517_v30, %v2574_v39  ;;  %v7466_v39 = vld [vmem:[#allocation34_spill] sm:$0xff] }
 0x5ce   :  { %v2082_v33 = vcvt.f32.s32 %v2081_v22  ;;  %v6619_v19 = vsel %vm2338_vm10, %v2340_v38, %v2336_v37 }
 0x5d0   :  { %v2085_v55 = vadd.s32 %v2084_v34, %v2082_v33  ;;  %v6550_v50 = vpop.xlane.xlu1 %2136  ;;  %v2009_v34 = vshll.u32 %v2008_v58, 16  ;;  %v2567_v33 = vand.u32 2147483648, %v6197_v15  ;;  %v7463_v58 = vld [vmem:[#allocation32_spill] sm:$0xff] }
 0x5d1   :  { %vm2138_vm8 = vcmp.eq.f32.partialorder %v6394_v49, %v6550_v50 }
 0x5d2   :  { %vm2199_vm0 = vcmp.eq.s32.totalorder %v3863_v48, %v2085_v55  ;;  %v2139_v61 = vsel %vm2138_vm8, %v2134_v14, inf  ;;  %v2644_v55 = vsel %vm2641_vm5, %v2643_v26, %v2639_v25  ;;  %v2024_v25 = vshll.u32 %v2023_v57, 16  ;;  %vm2578_vm8 = vmor %vm2576_vm1, %vm2577_vm7 }
 0x5d3   :  { %v2471_v24 = vsel %vm2199_vm0, %v7454_v42, 0.0  ;;  %2140 = vmin.xlane.f32.xlu1 %v2139_v61  ;;  %v1846_v61 = vadd.f32 %v7463_v58, %v7462_v60  ;;  %v7464_v42 = vld [vmem:[#allocation47_spill] sm:$0xff]  ;;  %v2582_v26 = vand.u32 2147483648, %v6213_v5  ;;  %v2579_v31 = vsel %vm2578_vm8, %v6517_v30, %v2575_v51  ;;  %v7468_v51 = vld [vmem:[#allocation26_spill] sm:$0xff] }
 0x5d4   :  { %v2487_v20 = vadd.f32 %v2471_v24, %v7457_v47  ;;  %vm2581_vm0 = vcmp.eq.f32.partialorder %v2580_v3, 8.507059e+37  ;;  %v2597_v30 = vand.u32 2147483648, %v6293_v35  ;;  %vm2607_vm5 = vweird.f32 %v6630_v40 }
 0x5d5   :  { %v2006_v22 = vpop.xlane.xlu2 %2005  ;;  %v6628_v10 = vadd.f32 %v6619_v19, %v1846_v61 }
 0x5d6   :  { %v2007_v52 = vcvt.f32.s32 %v2006_v22  ;;  %v6615_v4 = vmul.f32 %v2644_v55, %v2487_v20  ;;  %v2583_v55 = vor.u32 1.1754944e-38, %v2582_v26 }
 0x5d7   :  { %3660 = vrcp.f32 %v6628_v10  ;;  %vm2621_vm1 = vweird.f32 %v6628_v10 }
 0x5d8   :  { %v2010_v15 = vadd.s32 %v2009_v34, %v2007_v52  ;;  %v6608_v14 = vpop.xlane.xlu1 %2151  ;;  %v2602_v52 = vmul.f32 %v6630_v40, %v6307_v0  ;;  %v2584_v38 = vsel %vm2581_vm0, %v2583_v55, %v2579_v31 }
 0x5d9   :  { %vm2153_vm11 = vcmp.eq.f32.partialorder %v6411_v13, %v6608_v14  ;;  %v2568_v13 = vor.u32 1.1754944e-38, %v2567_v33  ;;  %v2038_v33 = vcvt.f32.s32 %v6417_v41 }
 0x5da   :  { %vm2194_vm6 = vcmp.eq.s32.totalorder %v3863_v48, %v2010_v15  ;;  %v2154_v11 = vsel %vm2153_vm11, %v2149_v63, inf  ;;  %v7467_v15 = vld [vmem:[#allocation10_spill] sm:$0xff]  ;;  %v2603_v16 = vsub.f32 1.0, %v2602_v52  ;;  %vm2606_vm11 = vweird.f32 %v6307_v0 }
 0x5db   :  { %v2466_v24 = vsel %vm2194_vm6, %v7464_v42, 0.0  ;;  %2155 = vmin.xlane.f32.xlu0 %v2154_v11  ;;  %v2569_v20 = vsel %vm2566_vm3, %v2568_v13, %v2564_v18  ;;  %v2589_v18 = vmul.f32 %v6591_v27, %v2588_v56  ;;  %v2039_v57 = vshll.u32 %v2038_v33, 16  ;;  %vm2608_vm10 = vmor %vm2606_vm11, %vm2607_vm5 }
 0x5dc   :  { %v2482_v49 = vadd.f32 %v2466_v24, %v7465_v32  ;;  %v2595_v42 = vand.u32 2147483647, %v6293_v35  ;;  %v2604_v24 = vmul.f32 %v6630_v40, %v2603_v16  ;;  %v2053_v13 = vcvt.f32.s32 %v6422_v43 }
 0x5dd   :  { %v2021_v47 = vpop.xlane.xlu2 %2020  ;;  %v2590_v60 = vadd.f32 %v6591_v27, %v2589_v18  ;;  %v3661_v58 = vpop.eup %3660  ;;  %v2068_v52 = vcvt.f32.s32 %v6427_v21  ;;  %v2627_v21 = vand.u32 2147483648, %v6628_v10 }
 0x5de   :  { %v2022_v22 = vcvt.f32.s32 %v2021_v47  ;;  %v2570_v45 = vmul.f32 %v2569_v20, %v2482_v49  ;;  %v2617_v49 = vmul.f32 %v3661_v58, %v6628_v10  ;;  %v2598_v20 = vor.u32 1.1754944e-38, %v2597_v30 }
 0x5df   :  { %v2594_v32 = vsel %vm2593_vm15, %v6591_v27, %v2590_v60  ;;  %vm2596_vm9 = vcmp.eq.f32.partialorder %v2595_v42, 8.507059e+37  ;;  %v2605_v35 = vadd.f32 %v6630_v40, %v2604_v24  ;;  %v2054_v56 = vshll.u32 %v2053_v13, 16  ;;  %v7470_v60 = vld [vmem:[#allocation16_spill] sm:$0xff] }
 0x5e0   :  { %v2025_v34 = vadd.s32 %v2024_v25, %v2022_v22  ;;  %3395 = vmatmul.msk.f32.gmra.mxu0 %vm558_vm2, %v2570_v45  ;;  %v2599_v45 = vsel %vm2596_vm9, %v2598_v20, %v2594_v32  ;;  %v2612_v27 = vand.u32 2147483648, %v6307_v0  ;;  %vm2622_vm7 = vweird.f32 %v3661_v58  ;;  %v7471_v20 = vld [vmem:[#allocation25_spill] sm:$0xff] }
 0x5e1   :  { %v2609_v33 = vsel %vm2608_vm10, %v6630_v40, %v2605_v35  ;;  %vm2623_vm8 = vmor %vm2621_vm1, %vm2622_vm7 }
 0x5e2   :  { %vm2195_vm14 = vcmp.eq.s32.totalorder %v3863_v48, %v2025_v34  ;;  %v2618_v34 = vsub.f32 1.0, %v2617_v49  ;;  %v6681_v49 = vadd.f32 1e-08, %v6374_v23 }
 0x5e3   :  { %v2467_v37 = vsel %vm2195_vm14, %v7466_v39, 0.0  ;;  %v2613_v39 = vor.u32 1.1754944e-38, %v2612_v27  ;;  %v7472_v27 = vld [vmem:[#allocation59_spill] sm:$0xff] }
 0x5e4   :  { %v2483_v63 = vadd.f32 %v2467_v37, %v7467_v15  ;;  %v2619_v31 = vmul.f32 %v3661_v58, %v2618_v34  ;;  %v7469_v37 = vld [vmem:[#allocation29_spill] sm:$0xff]  ;;  %vm2423_vm10 = vweird.f32 %v6681_v49 }
 0x5e5   :  { %v2036_v5 = vpop.xlane.xlu2 %2035 }
 0x5e6   :  { %v2037_v11 = vcvt.f32.s32 %v2036_v5  ;;  %v2585_v41 = vmul.f32 %v2584_v38, %v2483_v63  ;;  %v2069_v5 = vshll.u32 %v2068_v52, 16  ;;  %v2620_v16 = vadd.f32 %v3661_v58, %v2619_v31 }
 0x5e8   :  { %v2040_v61 = vadd.s32 %v2039_v57, %v2037_v11  ;;  %3396 = vmatmul.msk.f32.gmra.mxu0 %vm558_vm2, %v2585_v41  ;;  %v2624_v40 = vsel %vm2623_vm8, %v3661_v58, %v2620_v16  ;;  %v2628_v41 = vor.u32 1.1754944e-38, %v2627_v21 }
 0x5ea   :  { %vm2196_vm13 = vcmp.eq.s32.totalorder %v3863_v48, %v2040_v61 }
 0x5eb   :  { %v2468_v47 = vsel %vm2196_vm13, %v6290_v29, 0.0  ;;  %v2610_v29 = vand.u32 2147483647, %v6307_v0 }
 0x5ec   :  { %v2484_v25 = vadd.f32 %v2468_v47, %v7468_v51 }
 0x5ed   :  { %v2051_v22 = vpop.xlane.xlu2 %2050  ;;  %vm2611_vm3 = vcmp.eq.f32.partialorder %v2610_v29, 8.507059e+37 }
 0x5ee   :  { %v2052_v43 = vcvt.f32.s32 %v2051_v22  ;;  %v2600_v26 = vmul.f32 %v2599_v45, %v2484_v25  ;;  %v2614_v63 = vsel %vm2611_vm3, %v2613_v39, %v2609_v33  ;;  %v2162_v39 = vand.u32 65535, %v6469_v12 }
 0x5f0   :  { %v2055_v3 = vadd.s32 %v2054_v56, %v2052_v43  ;;  %3397 = vmatmul.msk.f32.gmra.mxu0 %vm558_vm2, %v2600_v26  ;;  %v2164_v16 = vcvt.s32.f32 %v2162_v39 }
 0x5f2   :  { %vm2197_vm6 = vcmp.eq.s32.totalorder %v3863_v48, %v2055_v3  ;;  %v7473_v3 = vld [vmem:[#allocation18_spill] sm:$0xff] }
 0x5f3   :  { %v2469_v18 = vsel %vm2197_vm6, %v6298_v53, 0.0  ;;  %v2625_v53 = vand.u32 2147483647, %v6628_v10  ;;  %v2218_v10 = vadd.f32 1e-08, %v6310_v36  ;;  %v1850_v29 = vadd.f32 %v7473_v3, %v7472_v27 }
 0x5f4   :  { %v2485_v55 = vadd.f32 %v2469_v18, %v7469_v37  ;;  %vm2651_vm6 = vweird.f32 %v7471_v20 }
 0x5f5   :  { %v2066_v15 = vpop.xlane.xlu2 %2065  ;;  %vm2626_vm0 = vcmp.eq.f32.partialorder %v2625_v53, 8.507059e+37  ;;  %3662 = vrcp.f32 %v2218_v10  ;;  %v2399_v45 = vand.u32 2147483648, %v2218_v10  ;;  %vm2393_vm4 = vweird.f32 %v2218_v10  ;;  %v6723_v53 = vld [vmem:[%s7121_s0] sm:$0xff] }
 0x5f6   :  { %v2067_v38 = vcvt.f32.s32 %v2066_v15  ;;  %v2615_v0 = vmul.f32 %v2614_v63, %v2485_v55  ;;  %v2629_v42 = vsel %vm2626_vm0, %v2628_v41, %v2624_v40  ;;  %3664 = vrcp.f32 %v7471_v20  ;;  %v6728_v40 = vld [vmem:[%s7121_s0 + $0x8] sm:$0xff] }
 0x5f7   :  { %3666 = vrcp.f32 %v6681_v49  ;;  %v2400_v43 = vor.u32 1.1754944e-38, %v2399_v45  ;;  %v2098_v55 = vcvt.f32.s32 %v6472_v62  ;;  %v2655_v63 = vand.u32 2147483647, %v7471_v20  ;;  %v7481_v45 = vld [vmem:[#allocation40_spill] sm:$0xff] }
 0x5f8   :  { %v2070_v57 = vadd.s32 %v2069_v5, %v2067_v38  ;;  %3398 = vmatmul.msk.f32.gmra.mxu0 %vm558_vm2, %v2615_v0  ;;  %3668 = vrcp.f32 %v6286_v54  ;;  %v2429_v62 = vand.u32 2147483648, %v6681_v49 }
 0x5f9   :  { %v2099_v21 = vshll.u32 %v2098_v55, 16  ;;  %vm2656_vm8 = vcmp.eq.f32.partialorder %v2655_v63, 8.507059e+37 }
 0x5fa   :  { %vm2198_vm14 = vcmp.eq.s32.totalorder %v3863_v48, %v2070_v57 }
 0x5fb   :  { %v2470_v11 = vsel %vm2198_vm14, %v6619_v19, 0.0  ;;  %v3663_v19 = vpop.eup %3662 }
 0x5fc   :  { %v2486_v30 = vadd.f32 %v2470_v11, %v7470_v60  ;;  %v2389_v58 = vmul.f32 %v3663_v19, %v2218_v10  ;;  %v6685_v25 = vpop.eup %3664  ;;  %vm2394_vm12 = vweird.f32 %v3663_v19  ;;  %v3440_v11 = vpack.i.bf16 %v6728_v40, %v6723_v53 }
 0x5fd   :  { %v3437_v61 = vpop.permute.xlu2 %3436  ;;  %v6687_v36 = vpop.eup %3666  ;;  %v2647_v35 = vmul.f32 %v6685_v25, %v7471_v20  ;;  %vm2395_vm15 = vmor %vm2393_vm4, %vm2394_vm12  ;;  %vm2652_vm9 = vweird.f32 %v6685_v25  ;;  %v2657_v60 = vand.u32 2147483648, %v7471_v20  ;;  %v7480_v20 = vld [vmem:[#allocation24_spill] sm:$0xff]  ;;  %vm2666_vm4 = vweird.f32 %v6286_v54 }
 0x5fe   :  { %v2630_v24 = vmul.f32 %v2629_v42, %v2486_v30  ;;  %v3438_v13 = vunpack.i.l.bf16 %v3437_v61  ;;  %v3439_v32 = vunpack.i.h.bf16 %v3437_v61  ;;  %v2390_v47 = vsub.f32 1.0, %v2389_v58  ;;  %v6702_v18 = vpop.eup %3668  ;;  %3441 = vrot.lane.b32.xlu0 %v3440_v11, %s3726_s17  ;;  %vm6748_vm7 = vmor %vm2651_vm6, %vm2652_vm9  ;;  %v7479_v58 = vld [vmem:[#allocation44_spill] sm:$0xff] }
 0x5ff   :  { %v2419_v23 = vmul.f32 %v6687_v36, %v6681_v49  ;;  %v2648_v26 = vsub.f32 1.0, %v2647_v35  ;;  %v2662_v5 = vmul.f32 %v6702_v18, %v6286_v54  ;;  %vm2424_vm5 = vweird.f32 %v6687_v36  ;;  %v7482_v11 = vld [vmem:[#allocation48_spill] sm:$0xff] }
 0x600   :  { %3399 = vmatmul.msk.f32.gmra.mxu0 %vm558_vm2, %v2630_v24  ;;  %2866 = vmatpush.msrb.mxu1 %v3438_v13  ;;  %v2391_v51 = vmul.f32 %v3663_v19, %v2390_v47  ;;  %vm6739_vm3 = vmor %vm2423_vm10, %vm2424_vm5  ;;  %v2177_v24 = vand.u32 65535, %v6492_v6  ;;  %v2430_v47 = vor.u32 1.1754944e-38, %v2429_v62  ;;  %vm2667_vm12 = vweird.f32 %v6702_v18 }
 0x601   :  { %v2420_v52 = vsub.f32 1.0, %v2419_v23  ;;  %v2649_v31 = vmul.f32 %v6685_v25, %v2648_v26  ;;  %v2113_v23 = vcvt.f32.s32 %v6506_v2 }
 0x602   :  { %2867 = vmatpush.msrb.mxu1 %v3439_v32  ;;  %v2392_v22 = vadd.f32 %v3663_v19, %v2391_v51  ;;  %v2663_v32 = vsub.f32 1.0, %v2662_v5  ;;  %v2670_v5 = vand.u32 2147483647, %v6286_v54 }
 0x603   :  { %3400 = vmatmul.msk.f32.vlgmr.msrb.gmra.mxu1 %vm558_vm2, %v6615_v4  ;;  %v2397_v4 = vand.u32 2147483647, %v2218_v10  ;;  %v2421_v37 = vmul.f32 %v6687_v36, %v2420_v52  ;;  %v2650_v15 = vadd.f32 %v6685_v25, %v2649_v31  ;;  %v2114_v2 = vshll.u32 %v2113_v23, 16 }
 0x604   :  { %v2396_v56 = vsel %vm2395_vm15, %v3663_v19, %v2392_v22  ;;  %v7478_v19 = vld [vmem:[#allocation41_spill] sm:$0xff]  ;;  %v2658_v22 = vor.u32 1.1754944e-38, %v2657_v60  ;;  %v2664_v26 = vmul.f32 %v6702_v18, %v2663_v32  ;;  %vm2668_vm15 = vmor %vm2666_vm4, %vm2667_vm12  ;;  %vm2671_vm9 = vcmp.eq.f32.partialorder %v2670_v5, 8.507059e+37  ;;  %v6807_v32 = vld [vmem:[%s7121_s0 + $0x18] sm:$0xff] }
 0x605   :  { %vm2398_vm13 = vcmp.eq.f32.partialorder %v2397_v4, 8.507059e+37  ;;  %v2422_v12 = vadd.f32 %v6687_v36, %v2421_v37  ;;  %v2654_v6 = vsel %vm6748_vm7, %v6685_v25, %v2650_v15  ;;  %v2179_v25 = vcvt.s32.f32 %v2177_v24 }
 0x606   :  { %v6694_v34 = vsel %vm2398_vm13, %v2400_v43, %v2396_v56  ;;  %v2659_v43 = vsel %vm2656_vm8, %v2658_v22, %v2654_v6  ;;  %v2665_v37 = vadd.f32 %v6702_v18, %v2664_v26 }
 0x607   :  { %v6699_v33 = vadd.f32 %v6694_v34, %v1850_v29  ;;  %v2426_v10 = vsel %vm6739_vm3, %v6687_v36, %v2422_v12 }
 0x608   :  { %v2669_v12 = vsel %vm2668_vm15, %v6702_v18, %v2665_v37 }
 0x609   :  { %3670 = vrcp.f32 %v6699_v33  ;;  %v2687_v13 = vand.u32 2147483648, %v6699_v33 }
 0x60a   :  { %3672 = vrcp.f32 %v6408_v7 }
 0x60f   :  { %v6743_v42 = vpop.eup %3670 }
 0x610   :  { %v2677_v36 = vmul.f32 %v6743_v42, %v6699_v33  ;;  %v6780_v55 = vpop.eup %3672  ;;  %vm2682_vm5 = vweird.f32 %v6743_v42 }
 0x611   :  { %v2692_v62 = vmul.f32 %v6780_v55, %v6408_v7  ;;  %vm2697_vm7 = vweird.f32 %v6780_v55 }
 0x612   :  { %v2678_v31 = vsub.f32 1.0, %v2677_v36 }
 0x613   :  { %v2693_v24 = vsub.f32 1.0, %v2692_v62 }
 0x620   :  { %v2798_v15 = vpop.f32.mrf.mxu0 }
 0x62b   :  { %v6713_v38 = vpop.xlane.xlu0 %2166  ;;  %v2096_v0 = vpop.xlane.xlu1 %2095 }
 0x62c   :  { %vm2168_vm11 = vcmp.eq.f32.partialorder %v6476_v44, %v6713_v38  ;;  %v2097_v57 = vcvt.f32.s32 %v2096_v0  ;;  %v2427_v44 = vand.u32 2147483647, %v6681_v49  ;;  %v1852_v49 = vadd.f32 %v7479_v58, %v7478_v19 }
 0x62d   :  { %v2169_v41 = vsel %vm2168_vm11, %v2164_v16, inf  ;;  %v2679_v0 = vmul.f32 %v6743_v42, %v2678_v31  ;;  %v2128_v16 = vcvt.f32.s32 %v6522_v1  ;;  %vm2681_vm11 = vweird.f32 %v6699_v33 }
 0x62e   :  { %v2100_v30 = vadd.s32 %v2099_v21, %v2097_v57  ;;  %2170 = vmin.xlane.f32.xlu1 %v2169_v41  ;;  %vm2428_vm14 = vcmp.eq.f32.partialorder %v2427_v44, 8.507059e+37  ;;  %v2685_v58 = vand.u32 2147483647, %v6699_v33  ;;  %vm2683_vm10 = vmor %vm2681_vm11, %vm2682_vm5  ;;  %v2688_v33 = vor.u32 1.1754944e-38, %v2687_v13 }
 0x62f   :  { %v6766_v35 = vsel %vm2428_vm14, %v2430_v47, %v2426_v10  ;;  %v2680_v44 = vadd.f32 %v6743_v42, %v2679_v0  ;;  %v2143_v47 = vcvt.f32.s32 %v6550_v50  ;;  %v2158_v31 = vcvt.f32.s32 %v6608_v14 }
 0x630   :  { %vm2200_vm1 = vcmp.eq.s32.totalorder %v3863_v48, %v2100_v30  ;;  %v6775_v29 = vadd.f32 %v6766_v35, %v1852_v49  ;;  %v2129_v30 = vshll.u32 %v2128_v16, 16  ;;  %v2801_v49 = vpop.f32.mrf.mxu0  ;;  %vm2686_vm3 = vcmp.eq.f32.partialorder %v2685_v58, 8.507059e+37 }
 0x631   :  { %v2472_v51 = vsel %vm2200_vm1, %v7480_v20, 0.0  ;;  %v2684_v20 = vsel %vm2683_vm10, %v6743_v42, %v2680_v44  ;;  %v2144_v26 = vshll.u32 %v2143_v47, 16  ;;  %vm2696_vm1 = vweird.f32 %v6408_v7 }
 0x632   :  { %v2488_v4 = vadd.f32 %v2472_v51, %v7481_v45  ;;  %3674 = vrcp.f32 %v6775_v29  ;;  %v2694_v51 = vmul.f32 %v6780_v55, %v2693_v24  ;;  %v3445_v45 = vpack.i.bf16 %v2801_v49, %v2798_v15  ;;  %vm2698_vm8 = vmor %vm2696_vm1, %vm2697_vm7 }
 0x633   :  { %v6769_v56 = vpop.xlane.xlu0 %2181  ;;  %v2717_v62 = vand.u32 2147483648, %v6775_v29  ;;  %vm2711_vm4 = vweird.f32 %v6775_v29  ;;  %v2222_v49 = vadd.f32 1e-08, %v6482_v9  ;;  %vm3062_vm7 = vcmask 1044480  }
 0x634   :  { %vm2183_vm0 = vcmp.eq.f32.partialorder %v6500_v28, %v6769_v56  ;;  %v2660_v27 = vmul.f32 %v2659_v43, %v2488_v4  ;;  %v2672_v28 = vand.u32 2147483648, %v6286_v54  ;;  %v7483_v4 = vld [vmem:[#allocation20_spill] sm:$0xff] }
 0x635   :  { %v2184_v3 = vsel %vm2183_vm0, %v2179_v25, inf  ;;  %v2689_v25 = vsel %vm2686_vm3, %v2688_v33, %v2684_v20  ;;  %3676 = vrcp.f32 %v2222_v49  ;;  %vm2453_vm11 = vweird.f32 %v2222_v49 }
 0x636   :  { %2185 = vmin.xlane.f32.xlu2 %v2184_v3  ;;  %v2111_v52 = vpop.xlane.xlu1 %2110  ;;  %3401 = vmatmul.msk.f32.gmra.mxu1 %vm558_vm2, %v2660_v27  ;;  %v2673_v57 = vor.u32 1.1754944e-38, %v2672_v28  ;;  %v2695_v27 = vadd.f32 %v6780_v55, %v2694_v51  ;;  %v7484_v28 = vld [vmem:[#allocation17_spill] sm:$0xff]  ;;  %3678 = vrcp.f32 %v6572_v17  ;;  %vm3061_vm3 = vcmask 1043456  }
 0x637   :  { %v2112_v39 = vcvt.f32.s32 %v2111_v52  ;;  %v2700_v52 = vand.u32 2147483647, %v6408_v7 }
 0x638   :  { %v2674_v60 = vsel %vm2671_vm9, %v2673_v57, %v2669_v12  ;;  %v6796_v1 = vpop.eup %3674  ;;  %v2804_v44 = vpop.f32.mrf.mxu0 }
 0x639   :  { %v2115_v63 = vadd.s32 %v2114_v2, %v2112_v39  ;;  %v2707_v6 = vmul.f32 %v6796_v1, %v6775_v29  ;;  %v2699_v2 = vsel %vm2698_vm8, %v6780_v55, %v2695_v27  ;;  %vm2701_vm0 = vcmp.eq.f32.partialorder %v2700_v52, 8.507059e+37  ;;  %v6844_v55 = vld [vmem:[%s7121_s0 + $0x20] sm:$0xff] }
 0x63a   :  { %vm2712_vm12 = vweird.f32 %v6796_v1  ;;  %vm2726_vm8 = vweird.f32 %v6572_v17 }
 0x63b   :  { %vm2201_vm13 = vcmp.eq.s32.totalorder %v3863_v48, %v2115_v63  ;;  %v2708_v43 = vsub.f32 1.0, %v2707_v6  ;;  %vm2713_vm15 = vmor %vm2711_vm4, %vm2712_vm12  ;;  %v3677_v20 = vpop.eup %3676 }
 0x63c   :  { %v2473_v21 = vsel %vm2201_vm13, %v6281_v46, 0.0  ;;  %v6802_v46 = vld [vmem:[%s7121_s0 + $0x10] sm:$0xff]  ;;  %v2449_v51 = vmul.f32 %v3677_v20, %v2222_v49  ;;  %vm2454_vm5 = vweird.f32 %v3677_v20 }
 0x63d   :  { %v2489_v41 = vadd.f32 %v2473_v21, %v7482_v11  ;;  %v3450_v10 = vpack.i.bf16 %v6807_v32, %v6802_v46  ;;  %v2709_v39 = vmul.f32 %v6796_v1, %v2708_v43  ;;  %v2715_v11 = vand.u32 2147483647, %v6775_v29  ;;  %vm2455_vm10 = vmor %vm2453_vm11, %vm2454_vm5 }
 0x63e   :  { %v2126_v54 = vpop.xlane.xlu0 %2125  ;;  %vm7490_vm11 = vcmask 23552  }
 0x63f   :  { %v2127_v61 = vcvt.f32.s32 %v2126_v54  ;;  %v2675_v18 = vmul.f32 %v2674_v60, %v2489_v41  ;;  %3451 = vrot.lane.b32.xlu0 %v3450_v10, %s3726_s17  ;;  %v2710_v14 = vadd.f32 %v6796_v1, %v2709_v39  ;;  %v2718_v60 = vor.u32 1.1754944e-38, %v2717_v62  ;;  %v6866_v10 = vld [vmem:[%s7121_s0 + $0x30] sm:$0xff] }
 0x640   :  { %vm2716_vm9 = vcmp.eq.f32.partialorder %v2715_v11, 8.507059e+37 }
 0x641   :  { %v2130_v19 = vadd.s32 %v2129_v30, %v2127_v61  ;;  %3402 = vmatmul.msk.f32.gmra.mxu1 %vm558_vm2, %v2675_v18  ;;  %v2714_v41 = vsel %vm2713_vm15, %v6796_v1, %v2710_v14  ;;  %v7485_v30 = vld [vmem:[#allocation45_spill] sm:$0xff] }
 0x642   :  { %v2719_v18 = vsel %vm2716_vm9, %v2718_v60, %v2714_v41  ;;  %v6931_v60 = vld [vmem:[%s7121_s0 + $0x68] sm:$0xff] }
 0x643   :  { %vm2202_vm6 = vcmp.eq.s32.totalorder %v3863_v48, %v2130_v19 }
 0x644   :  { %v2474_v22 = vsel %vm2202_vm6, %v6694_v34, 0.0  ;;  %v2702_v34 = vand.u32 2147483648, %v6408_v7  ;;  %v2159_v7 = vshll.u32 %v2158_v31, 16 }
 0x645   :  { %v2490_v36 = vadd.f32 %v2474_v22, %v7483_v4 }
 0x646   :  { %v2141_v23 = vpop.xlane.xlu1 %2140  ;;  %v2703_v15 = vor.u32 1.1754944e-38, %v2702_v34  ;;  %v6887_v34 = vld [vmem:[%s7121_s0 + $0x40] sm:$0xff] }
 0x647   :  { %v2142_v50 = vcvt.f32.s32 %v2141_v23  ;;  %3446 = vrot.lane.b32.xlu1 %v3445_v45, %s3727_s25  ;;  %v2690_v42 = vmul.f32 %v2689_v25, %v2490_v36  ;;  %v2450_v45 = vsub.f32 1.0, %v2449_v51  ;;  %v2459_v23 = vand.u32 2147483648, %v2222_v49 }
 0x648   :  { %v2704_v0 = vsel %vm2701_vm0, %v2703_v15, %v2699_v2  ;;  %v2457_v25 = vand.u32 2147483647, %v2222_v49  ;;  %v3679_v2 = vpop.eup %3678  ;;  %v6910_v15 = vld [vmem:[%s7121_s0 + $0x58] sm:$0xff] }
 0x649   :  { %v2145_v3 = vadd.s32 %v2144_v26, %v2142_v50  ;;  %3403 = vmatmul.msk.f32.gmra.mxu1 %vm558_vm2, %v2690_v42  ;;  %v2451_v4 = vmul.f32 %v3677_v20, %v2450_v45  ;;  %v2460_v43 = vor.u32 1.1754944e-38, %v2459_v23  ;;  %v7486_v50 = vld [vmem:[#allocation19_spill] sm:$0xff]  ;;  %v7487_v42 = vld [vmem:[#allocation49_spill] sm:$0xff]  ;;  %v2722_v39 = vmul.f32 %v3679_v2, %v6572_v17 }
 0x64a   :  { %vm2458_vm6 = vcmp.eq.f32.partialorder %v2457_v25, 8.507059e+37  ;;  %v1854_v27 = vadd.f32 %v7487_v42, %v7486_v50  ;;  %vm2727_vm1 = vweird.f32 %v3679_v2  ;;  %v7489_v42 = vld [vmem:[#allocation21_spill] sm:$0xff] }
 0x64b   :  { %vm2203_vm14 = vcmp.eq.s32.totalorder %v3863_v48, %v2145_v3  ;;  %v2452_v36 = vadd.f32 %v3677_v20, %v2451_v4  ;;  %v6892_v3 = vld [vmem:[%s7121_s0 + $0x48] sm:$0xff] }
 0x64c   :  { %v2475_v37 = vsel %vm2203_vm14, %v6405_v8, 0.0  ;;  %v6849_v8 = vld [vmem:[%s7121_s0 + $0x28] sm:$0xff]  ;;  %v3480_v52 = vpack.i.bf16 %v6892_v3, %v6887_v34  ;;  %vm2728_vm14 = vmor %vm2726_vm8, %vm2727_vm1 }
 0x64d   :  { %v2491_v63 = vadd.f32 %v2475_v37, %v7484_v28  ;;  %v3460_v21 = vpack.i.bf16 %v6849_v8, %v6844_v55  ;;  %v2456_v9 = vsel %vm2455_vm10, %v3677_v20, %v2452_v36  ;;  %v6905_v37 = vld [vmem:[%s7121_s0 + $0x50] sm:$0xff]  ;;  %v7488_v20 = vld [vmem:[#allocation46_spill] sm:$0xff]  ;;  %vm7491_vm10 = vmmov %vm7490_vm11 }
 0x64e   :  { %v2156_v5 = vpop.xlane.xlu0 %2155  ;;  %v6880_v26 = vsel %vm2458_vm6, %v2460_v43, %v2456_v9  ;;  %v3490_v28 = vpack.i.bf16 %v6910_v15, %v6905_v37  ;;  %vm3036_vm6 = vcmask 72704  }
 0x64f   :  { %v2157_v16 = vcvt.f32.s32 %v2156_v5  ;;  %v2705_v12 = vmul.f32 %v2704_v0, %v2491_v63  ;;  %3461 = vrot.lane.b32.xlu0 %v3460_v21, %s3726_s17  ;;  %v6897_v31 = vadd.f32 %v6880_v26, %v1854_v27  ;;  %v2723_v63 = vsub.f32 1.0, %v2722_v39  ;;  %v3021_v5 = vld [vmem:[%s7123_s2] sm:$0xff]  ;;  %v3022_v0 = vld [vmem:[%s7123_s2 + $0x8] sm:$0x1] }
 0x651   :  { %v2160_v57 = vadd.s32 %v2159_v7, %v2157_v16  ;;  %3404 = vmatmul.msk.f32.gmra.mxu1 %vm558_vm2, %v2705_v12  ;;  %3680 = vrcp.f32 %v6897_v31  ;;  %v3023_v16 = vpack.c.bf16 %v3022_v0, %v3021_v5  ;;  %v3728_v12 = vmov 65535  }
 0x652   :  { %v3063_v14 = vsel %vm3061_vm3, 4294967295, %v3728_v12  ;;  %v2724_v11 = vmul.f32 %v3679_v2, %v2723_v63  ;;  %vm2741_vm15 = vweird.f32 %v6897_v31 }
 0x653   :  { %vm2204_vm13 = vcmp.eq.s32.totalorder %v3863_v48, %v2160_v57  ;;  %v3064_v62 = vsel %vm3062_vm7, %v3063_v14, 0  ;;  %v2173_v57 = vcvt.f32.s32 %v6713_v38 }
 0x654   :  { %v2476_v54 = vsel %vm2204_vm13, %v6766_v35, 0.0  ;;  %v6871_v35 = vld [vmem:[%s7121_s0 + $0x38] sm:$0xff]  ;;  %v3066_v21 = vand.u32 %v3064_v62, %v3023_v16 }
 0x655   :  { %v2492_v61 = vadd.f32 %v2476_v54, %v7485_v30  ;;  %v3470_v1 = vpack.i.bf16 %v6871_v35, %v6866_v10  ;;  %v6926_v54 = vld [vmem:[%s7121_s0 + $0x60] sm:$0xff]  ;;  %v2174_v38 = vshll.u32 %v2173_v57, 16 }
 0x656   :  { %3075 = vmatpush.bf16.msra.mxu2 %v3066_v21 }
 0x657   :  { %v2720_v24 = vmul.f32 %v2719_v18, %v2492_v61  ;;  %3471 = vrot.lane.b32.xlu2 %v3470_v1, %s3726_s17  ;;  %v3681_v7 = vpop.eup %3680  ;;  %v2725_v18 = vadd.f32 %v3679_v2, %v2724_v11  ;;  %v2730_v1 = vand.u32 2147483647, %v6572_v17 }
 0x658   :  { %v2737_v41 = vmul.f32 %v3681_v7, %v6897_v31  ;;  %vm2742_vm4 = vweird.f32 %v3681_v7 }
 0x659   :  { %3405 = vmatmul.msk.f32.gmra.mxu1 %vm558_vm2, %v2720_v24  ;;  %vm2731_vm12 = vcmp.eq.f32.partialorder %v2730_v1, 8.507059e+37  ;;  %vm2743_vm13 = vmor %vm2741_vm15, %vm2742_vm4 }
 0x65a   :  { %v2738_v24 = vsub.f32 1.0, %v2737_v41 }
 0x65c   :  { %v2739_v49 = vmul.f32 %v3681_v7, %v2738_v24 }
 0x65d   :  { %v2807_v13 = vpop.f32.mrf.mxu0 }
 0x65e   :  { %v3455_v29 = vpack.i.bf16 %v2807_v13, %v2804_v44  ;;  %v3500_v44 = vpack.i.bf16 %v6931_v60, %v6926_v54  ;;  %v2732_v13 = vand.u32 2147483648, %v6572_v17  ;;  %v2740_v17 = vadd.f32 %v3681_v7, %v2739_v49 }
 0x660   :  { %3456 = vrot.lane.b32.xlu1 %v3455_v29, %s3727_s25  ;;  %v2744_v9 = vsel %vm2743_vm13, %v3681_v7, %v2740_v17 }
 0x665   :  { %v2810_v19 = vpop.f32.mrf.mxu0 }
 0x66d   :  { %v2813_v58 = vpop.f32.mrf.mxu0 }
 0x66e   :  { %v3465_v6 = vpack.i.bf16 %v2813_v58, %v2810_v19  ;;  %v2188_v19 = vcvt.f32.s32 %v6769_v56  ;;  %v2729_v58 = vsel %vm2728_vm14, %v3679_v2, %v2725_v18  ;;  %v2747_v56 = vand.u32 2147483648, %v6897_v31 }
 0x670   :  { %3466 = vrot.lane.b32.xlu1 %v3465_v6, %s3727_s25  ;;  %v2189_v45 = vshll.u32 %v2188_v19, 16  ;;  %v2748_v50 = vor.u32 1.1754944e-38, %v2747_v56  ;;  %v3442_v63 = vpop.permute.xlu0 %3441 }
 0x671   :  { %v3443_v5 = vunpack.i.l.bf16 %v3442_v63 }
 0x675   :  { %v2816_v47 = vpop.f32.mrf.mxu0 }
 0x678   :  { %3481 = vrot.lane.b32.xlu1 %v3480_v52, %s3726_s17 }
 0x67d   :  { %v2819_v22 = vpop.f32.mrf.mxu0 }
 0x67e   :  { %v3475_v33 = vpack.i.bf16 %v2819_v22, %v2816_v47  ;;  %v2733_v47 = vor.u32 1.1754944e-38, %v2732_v13 }
 0x680   :  { %3476 = vrot.lane.b32.xlu0 %v3475_v33, %s3727_s25  ;;  %3491 = vrot.lane.b32.xlu1 %v3490_v28, %s3726_s17  ;;  %v2734_v33 = vsel %vm2731_vm12, %v2733_v47, %v2729_v58  ;;  %v2869_v23 = vpop.f32.mrf.mxu1 }
 0x688   :  { %3501 = vrot.lane.b32.xlu1 %v3500_v44, %s3726_s17 }
 0x6a1   :  { %v2171_v30 = vpop.xlane.xlu1 %2170 }
 0x6a2   :  { %v2172_v61 = vcvt.f32.s32 %v2171_v30 }
 0x6a4   :  { %v2175_v29 = vadd.s32 %v2174_v38, %v2172_v61 }
 0x6a6   :  { %vm2205_vm0 = vcmp.eq.s32.totalorder %v3863_v48, %v2175_v29 }
 0x6a7   :  { %v2477_v6 = vsel %vm2205_vm0, %v6558_v59, 0.0  ;;  %v2745_v59 = vand.u32 2147483647, %v6897_v31  ;;  %v3444_v31 = vunpack.i.h.bf16 %v3442_v63 }
 0x6a8   :  { %v2493_v51 = vadd.f32 %v2477_v6, %v7488_v20 }
 0x6a9   :  { %v2186_v22 = vpop.xlane.xlu2 %2185  ;;  %vm2746_vm5 = vcmp.eq.f32.partialorder %v2745_v59, 8.507059e+37 }
 0x6aa   :  { %v2187_v4 = vcvt.f32.s32 %v2186_v22  ;;  %v2735_v36 = vmul.f32 %v2734_v33, %v2493_v51  ;;  %v2749_v52 = vsel %vm2746_vm5, %v2748_v50, %v2744_v9  ;;  %v6974_v50 = vld [vmem:[%s7121_s0 + $0x78] sm:$0xff]  ;;  %vm3151_vm5 = vcmask 261120  }
 0x6ac   :  { %v2190_v25 = vadd.s32 %v2189_v45, %v2187_v4  ;;  %3406 = vmatmul.msk.f32.gmra.mxu1 %vm558_vm2, %v2735_v36 }
 0x6ae   :  { %vm2206_vm9 = vcmp.eq.s32.totalorder %v3863_v48, %v2190_v25 }
 0x6af   :  { %v2478_v43 = vsel %vm2206_vm9, %v6880_v26, 0.0 }
 0x6b0   :  { %v2494_v27 = vadd.f32 %v2478_v43, %v7489_v42  ;;  %v6969_v43 = vld [vmem:[%s7121_s0 + $0x70] sm:$0xff] }
 0x6b1   :  { %v3452_v11 = vpop.permute.xlu0 %3451  ;;  %v3472_v45 = vpop.permute.xlu2 %3471  ;;  %v3510_v42 = vpack.i.bf16 %v6974_v50, %v6969_v43 }
 0x6b2   :  { %v2750_v2 = vmul.f32 %v2749_v52, %v2494_v27  ;;  %v3454_v41 = vunpack.i.h.bf16 %v3452_v11  ;;  %v3453_v44 = vunpack.i.l.bf16 %v3452_v11  ;;  %v3474_v4 = vunpack.i.h.bf16 %v3472_v45 }
 0x6b3   :  { %v2872_v39 = vpop.f32.mrf.mxu1  ;;  %v3473_v36 = vunpack.i.l.bf16 %v3472_v45 }
 0x6b4   :  { %v3485_v28 = vpack.i.bf16 %v2872_v39, %v2869_v23  ;;  %3407 = vmatmul.msk.f32.gmra.mxu1 %vm558_vm2, %v2750_v2  ;;  %vm7492_vm2 = vmmov %vm7491_vm10 }
 0x6b5   :  { %vm7493_vm3 = vmmov %vm7492_vm2 }
 0x6b6   :  { %3486 = vrot.lane.b32.xlu0 %v3485_v28, %s3727_s25  ;;  %vm7494_vm7 = vmmov %vm7492_vm2 }
 0x6b7   :  { %vm7495_vm1 = vmmov %vm7492_vm2 }
 0x6b8   :  { %vm7496_vm8 = vmmov %vm7495_vm1 }
 0x6b9   :  { %v3447_v0 = vpop.permute.xlu1 %3446  ;;  %vm7497_vm14 = vmmov %vm7495_vm1 }
 0x6ba   :  { %v3449_v48 = vunpack.i.h.bf16 %v3447_v0  ;;  %v3448_v7 = vunpack.i.l.bf16 %v3447_v0  ;;  %vm7498_vm0 = vmmov %vm7495_vm1 }
 0x6bb   :  { %vm7499_vm12 = vmmov %vm7498_vm0 }
 0x6bc   :  { %v3005_v26 = vsel %vm7490_vm11, %v3443_v5, %v3448_v7  ;;  %v3006_v16 = vsel %vm7491_vm10, %v3444_v31, %v3449_v48  ;;  %v3135_v7 = vld [vmem:[%s7125_s4 + $0x10] sm:$0xff]  ;;  %vm7500_vm4 = vmmov %vm7498_vm0 }
 0x6bd   :  { %v3025_v12 = vpack.c.bf16 %v3006_v16, %v3005_v26  ;;  %v3136_v26 = vld [vmem:[%s7125_s4 + $0x18] sm:$0xff]  ;;  %v3133_v16 = vld [vmem:[%s7125_s4] sm:$0xff]  ;;  %vm7501_vm15 = vmmov %vm7498_vm0 }
 0x6be   :  { %v2875_v14 = vpop.f32.mrf.mxu1  ;;  %vm7502_vm13 = vmmov %vm7498_vm0 }
 0x6bf   :  { %3408 = vmatmul.msk.bf16.vlgmr.msra.gmra.mxu2 %vm3036_vm6, %v3025_v12  ;;  %v3138_v12 = vpack.c.bf16 %v3136_v26, %v3135_v7  ;;  %vm7503_vm9 = vmmov %vm7498_vm0 }
 0x6c0   :  { %vm7504_vm11 = vmmov %vm7498_vm0 }
 0x6c1   :  { %v3462_v19 = vpop.permute.xlu0 %3461  ;;  %3182 = vmatpush.bf16.msra.mxu3 %v3138_v12  ;;  %vm7505_vm10 = vmmov %vm7498_vm0 }
 0x6c2   :  { %v3464_v58 = vunpack.i.h.bf16 %v3462_v19  ;;  %v3463_v49 = vunpack.i.l.bf16 %v3462_v19 }
 0x6c6   :  { %v2878_v62 = vpop.f32.mrf.mxu1 }
 0x6c7   :  { %v3495_v21 = vpack.i.bf16 %v2878_v62, %v2875_v14  ;;  %v3134_v14 = vld [vmem:[%s7125_s4 + $0x8] sm:$0xff] }
 0x6c9   :  { %3496 = vrot.lane.b32.xlu0 %v3495_v21, %s3727_s25 }
 0x6ce   :  { %v2881_v57 = vpop.f32.mrf.mxu1 }
 0x6d1   :  { %3511 = vrot.lane.b32.xlu0 %v3510_v42, %s3726_s17 }
 0x6d2   :  { %v3457_v30 = vpop.permute.xlu1 %3456 }
 0x6d3   :  { %v3459_v38 = vunpack.i.h.bf16 %v3457_v30  ;;  %v3458_v61 = vunpack.i.l.bf16 %v3457_v30 }
 0x6d5   :  { %v3007_v18 = vsel %vm7492_vm2, %v3453_v44, %v3458_v61  ;;  %v3008_v24 = vsel %vm7493_vm3, %v3454_v41, %v3459_v38  ;;  %vm7506_vm2 = vmmov %vm7498_vm0 }
 0x6d6   :  { %v2884_v13 = vpop.f32.mrf.mxu1  ;;  %v3026_v29 = vpack.c.bf16 %v3008_v24, %v3007_v18  ;;  %vm7507_vm3 = vmmov %vm7498_vm0 }
 0x6d7   :  { %v3505_v1 = vpack.i.bf16 %v2884_v13, %v2881_v57  ;;  %v3137_v57 = vpack.c.bf16 %v3134_v14, %v3133_v16 }
 0x6d8   :  { %3409 = vmatmul.msk.bf16.gmra.mxu2 %vm3036_vm6, %v3026_v29 }
 0x6d9   :  { %3506 = vrot.lane.b32.xlu2 %v3505_v1, %s3727_s25  ;;  %3183 = vmatpush.bf16.msra.mxu3 %v3137_v57 }
 0x6e2   :  { %v3467_v6 = vpop.permute.xlu1 %3466 }
 0x6e3   :  { %v3469_v47 = vunpack.i.h.bf16 %v3467_v6  ;;  %v3468_v20 = vunpack.i.l.bf16 %v3467_v6 }
 0x6e5   :  { %v3009_v51 = vsel %vm7494_vm7, %v3463_v49, %v3468_v20  ;;  %v3010_v22 = vsel %vm7495_vm1, %v3464_v58, %v3469_v47  ;;  %v7001_v58 = vld [vmem:[%s7124_s3] ss:$0 sm:$0xff]  ;;  %vm7508_vm7 = vmmov %vm7498_vm0 }
 0x6e6   :  { %v3027_v33 = vpack.c.bf16 %v3010_v22, %v3009_v51  ;;  %vm7509_vm1 = vmmov %vm7498_vm0 }
 0x6e8   :  { %3410 = vmatmul.msk.bf16.gmra.mxu2 %vm3036_vm6, %v3027_v33 }
 0x6ea   :  { %v3482_v27 = vpop.permute.xlu1 %3481 }
 0x6eb   :  { %v3484_v52 = vunpack.i.h.bf16 %v3482_v27  ;;  %v3483_v2 = vunpack.i.l.bf16 %v3482_v27 }
 0x6f2   :  { %v3477_v17 = vpop.permute.xlu0 %3476  ;;  %v3492_v11 = vpop.permute.xlu1 %3491 }
 0x6f3   :  { %v3479_v23 = vunpack.i.h.bf16 %v3477_v17  ;;  %v3478_v56 = vunpack.i.l.bf16 %v3477_v17  ;;  %v3494_v41 = vunpack.i.h.bf16 %v3492_v11  ;;  %v3493_v44 = vunpack.i.l.bf16 %v3492_v11 }
 0x6f5   :  { %v3011_v25 = vsel %vm7496_vm8, %v3473_v36, %v3478_v56  ;;  %v3012_v59 = vsel %vm7497_vm14, %v3474_v4, %v3479_v23  ;;  %vm7510_vm8 = vmmov %vm7498_vm0 }
 0x6f6   :  { %v3028_v9 = vpack.c.bf16 %v3012_v59, %v3011_v25  ;;  %vm7511_vm14 = vmmov %vm7498_vm0 }
 0x6f8   :  { %3411 = vmatmul.msk.bf16.gmra.mxu2 %vm3036_vm6, %v3028_v9 }
 0x6fa   :  { %v3502_v19 = vpop.permute.xlu1 %3501 }
 0x6fb   :  { %v3504_v47 = vunpack.i.h.bf16 %v3502_v19  ;;  %v3503_v20 = vunpack.i.l.bf16 %v3502_v19 }
 0x728   :  { %v3487_v39 = vpop.permute.xlu0 %3486 }
 0x729   :  { %v3489_v28 = vunpack.i.h.bf16 %v3487_v39  ;;  %v3488_v63 = vunpack.i.l.bf16 %v3487_v39  ;;  %v2887_v31 = vpop.f32.mrf.mxu1 }
 0x72b   :  { %v3013_v5 = vsel %vm7498_vm0, %v3483_v2, %v3488_v63  ;;  %v3014_v0 = vsel %vm7499_vm12, %v3484_v52, %v3489_v28  ;;  %vm7512_vm12 = vmmov %vm7498_vm0 }
 0x72c   :  { %v3029_v48 = vpack.c.bf16 %v3014_v0, %v3013_v5 }
 0x72e   :  { %3412 = vmatmul.msk.bf16.gmra.mxu2 %vm3036_vm6, %v3029_v48 }
 0x731   :  { %v2890_v62 = vpop.f32.mrf.mxu1 }
 0x732   :  { %v3515_v21 = vpack.i.bf16 %v2890_v62, %v2887_v31 }
 0x733   :  { %v3507_v1 = vpop.permute.xlu2 %3506 }
 0x734   :  { %3516 = vrot.lane.b32.xlu1 %v3515_v21, %s3727_s25  ;;  %v3509_v49 = vunpack.i.h.bf16 %v3507_v1  ;;  %v3508_v6 = vunpack.i.l.bf16 %v3507_v1 }
 0x736   :  { %v3017_v45 = vsel %vm7502_vm13, %v3503_v20, %v3508_v6  ;;  %v3018_v4 = vsel %vm7503_vm9, %v3504_v47, %v3509_v49  ;;  %vm7515_vm13 = vmmov %vm7498_vm0 }
 0x737   :  { %v3031_v56 = vpack.c.bf16 %v3018_v4, %v3017_v45  ;;  %vm7516_vm9 = vmmov %vm7498_vm0 }
 0x73b   :  { %v3497_v30 = vpop.permute.xlu0 %3496 }
 0x73c   :  { %v3499_v38 = vunpack.i.h.bf16 %v3497_v30  ;;  %v3498_v61 = vunpack.i.l.bf16 %v3497_v30 }
 0x73e   :  { %v3015_v18 = vsel %vm7500_vm4, %v3493_v44, %v3498_v61  ;;  %v3016_v24 = vsel %vm7501_vm15, %v3494_v41, %v3499_v38  ;;  %vm7513_vm4 = vmmov %vm7498_vm0 }
 0x73f   :  { %v3030_v13 = vpack.c.bf16 %v3016_v24, %v3015_v18  ;;  %vm7514_vm15 = vmmov %vm7498_vm0 }
 0x741   :  { %3413 = vmatmul.msk.bf16.gmra.mxu2 %vm3036_vm6, %v3030_v13 }
 0x742   :  { %v3077_v29 = vpop.f32.mrf.mxu2 }
 0x743   :  { %v3078_v51 = vadd.f32 %v7001_v58, %v3077_v29  ;;  %v3512_v57 = vpop.permute.xlu0 %3511 }
 0x744   :  { %v3514_v11 = vunpack.i.h.bf16 %v3512_v57  ;;  %v3513_v41 = vunpack.i.l.bf16 %v3512_v57 }
 0x745   :  { %v3117_v36 = vmax.f32 %v3078_v51, 0.0 }
 0x74a   :  { %v3079_v22 = vpop.f32.mrf.mxu2 }
 0x74b   :  { %v3080_v33 = vadd.f32 %v7001_v58, %v3079_v22 }
 0x74d   :  { %v3118_v17 = vmax.f32 %v3080_v33, 0.0 }
 0x74f   :  { %v3140_v23 = vpack.c.bf16 %v3118_v17, %v3117_v36  ;;  %v7029_v17 = vld [vmem:[%s7126_s5] ss:$0 sm:$0xff]  ;;  %s3729_s5 = smov [#allocation2]  }
 0x751   :  { %3414 = vmatmul.msk.bf16.gmra.mxu2 %vm3036_vm6, %v3031_v56  ;;  %3416 = vmatmul.msk.bf16.vlgmr.msra.gmra.mxu3 %vm3151_vm5, %v3140_v23 }
 0x75b   :  { %v3082_v25 = vpop.f32.mrf.mxu2 }
 0x75c   :  { %v3083_v59 = vadd.f32 %v7001_v58, %v3082_v25 }
 0x75e   :  { %v3119_v27 = vmax.f32 %v3083_v59, 0.0 }
 0x763   :  { %v3084_v9 = vpop.f32.mrf.mxu2 }
 0x764   :  { %v3085_v42 = vadd.f32 %v7001_v58, %v3084_v9 }
 0x766   :  { %v3120_v52 = vmax.f32 %v3085_v42, 0.0 }
 0x768   :  { %v3141_v2 = vpack.c.bf16 %v3120_v52, %v3119_v27 }
 0x76a   :  { %3417 = vmatmul.msk.bf16.gmra.mxu3 %vm3151_vm5, %v3141_v2 }
 0x76b   :  { %v3087_v39 = vpop.f32.mrf.mxu2 }
 0x76c   :  { %v3088_v28 = vadd.f32 %v7001_v58, %v3087_v39 }
 0x76e   :  { %v3121_v5 = vmax.f32 %v3088_v28, 0.0 }
 0x773   :  { %v3089_v63 = vpop.f32.mrf.mxu2 }
 0x774   :  { %v3090_v31 = vadd.f32 %v7001_v58, %v3089_v63 }
 0x776   :  { %v3122_v0 = vmax.f32 %v3090_v31, 0.0 }
 0x778   :  { %v3142_v48 = vpack.c.bf16 %v3122_v0, %v3121_v5 }
 0x77a   :  { %3418 = vmatmul.msk.bf16.gmra.mxu3 %vm3151_vm5, %v3142_v48 }
 0x77b   :  { %v3092_v7 = vpop.f32.mrf.mxu2 }
 0x77c   :  { %v3093_v26 = vadd.f32 %v7001_v58, %v3092_v7 }
 0x77e   :  { %v3123_v14 = vmax.f32 %v3093_v26, 0.0 }
 0x783   :  { %v3094_v16 = vpop.f32.mrf.mxu2 }
 0x784   :  { %v3095_v12 = vadd.f32 %v7001_v58, %v3094_v16 }
 0x786   :  { %v3124_v62 = vmax.f32 %v3095_v12, 0.0 }
 0x788   :  { %v3143_v21 = vpack.c.bf16 %v3124_v62, %v3123_v14 }
 0x78a   :  { %3419 = vmatmul.msk.bf16.gmra.mxu3 %vm3151_vm5, %v3143_v21 }
 0x7a6   :  { %v3517_v44 = vpop.permute.xlu1 %3516 }
 0x7a7   :  { %v3519_v30 = vunpack.i.h.bf16 %v3517_v44  ;;  %v3518_v38 = vunpack.i.l.bf16 %v3517_v44 }
 0x7a9   :  { %v3019_v61 = vsel %vm7504_vm11, %v3513_v41, %v3518_v38  ;;  %v3020_v18 = vsel %vm7505_vm10, %v3514_v11, %v3519_v30  ;;  %vm7518_vm11 = vmmov %vm7498_vm0 }
 0x7aa   :  { %v3032_v24 = vpack.c.bf16 %v3020_v18, %v3019_v61  ;;  %vm7519_vm10 = vmmov %vm7498_vm0 }
 0x7ac   :  { %3415 = vmatmul.msk.bf16.gmra.mxu2 %vm3036_vm6, %v3032_v24  ;;  %vm3321_vm6 = vcmask 547840  }
 0x7b1   :  { %v3097_v13 = vpop.f32.mrf.mxu2 }
 0x7b2   :  { %v3098_v29 = vadd.f32 %v7001_v58, %v3097_v13 }
 0x7b4   :  { %v3125_v49 = vmax.f32 %v3098_v29, 0.0 }
 0x7b9   :  { %v3099_v1 = vpop.f32.mrf.mxu2 }
 0x7ba   :  { %v3100_v19 = vadd.f32 %v7001_v58, %v3099_v1 }
 0x7bc   :  { %v3126_v6 = vmax.f32 %v3100_v19, 0.0 }
 0x7be   :  { %v3144_v47 = vpack.c.bf16 %v3126_v6, %v3125_v49 }
 0x7c0   :  { %3420 = vmatmul.msk.bf16.gmra.mxu3 %vm3151_vm5, %v3144_v47 }
 0x7c4   :  { %v3102_v20 = vpop.f32.mrf.mxu2 }
 0x7c5   :  { %v3103_v51 = vadd.f32 %v7001_v58, %v3102_v20 }
 0x7c7   :  { %v3127_v45 = vmax.f32 %v3103_v51, 0.0 }
 0x7cc   :  { %v3104_v22 = vpop.f32.mrf.mxu2 }
 0x7cd   :  { %v3105_v33 = vadd.f32 %v7001_v58, %v3104_v22 }
 0x7cf   :  { %v3128_v4 = vmax.f32 %v3105_v33, 0.0 }
 0x7d1   :  { %v3145_v36 = vpack.c.bf16 %v3128_v4, %v3127_v45 }
 0x7d3   :  { %3421 = vmatmul.msk.bf16.gmra.mxu3 %vm3151_vm5, %v3145_v36 }
 0x7d4   :  { %v3107_v23 = vpop.f32.mrf.mxu2  ;;  %v3185_v56 = vpop.f32.mrf.mxu3 }
 0x7d5   :  { %v3186_v25 = vadd.f32 %v7029_v17, %v3185_v56  ;;  %v3108_v9 = vadd.f32 %v7001_v58, %v3107_v23 }
 0x7d7   :  { %v3225_v59 = vmax.f32 %v3186_v25, 0.0  ;;  %v3129_v39 = vmax.f32 %v3108_v9, 0.0 }
 0x7d9   :  { %3257 = vrot.lane.b32.xlu2 %v3225_v59, %s3727_s25 }
 0x7dc   :  { %v3109_v42 = vpop.f32.mrf.mxu2  ;;  %v3187_v27 = vpop.f32.mrf.mxu3 }
 0x7dd   :  { %v3110_v52 = vadd.f32 %v7001_v58, %v3109_v42  ;;  %v3188_v2 = vadd.f32 %v7029_v17, %v3187_v27 }
 0x7df   :  { %v3130_v28 = vmax.f32 %v3110_v52, 0.0  ;;  %v3226_v63 = vmax.f32 %v3188_v2, 0.0 }
 0x7e1   :  { %v3146_v31 = vpack.c.bf16 %v3130_v28, %v3129_v39  ;;  %3259 = vrot.lane.b32.xlu0 %v3226_v63, %s3727_s25 }
 0x7e3   :  { %3422 = vmatmul.msk.bf16.gmra.mxu3 %vm3151_vm5, %v3146_v31 }
 0x7ed   :  { %v3190_v5 = vpop.f32.mrf.mxu3 }
 0x7ee   :  { %v3191_v0 = vadd.f32 %v7029_v17, %v3190_v5 }
 0x7f0   :  { %v3227_v48 = vmax.f32 %v3191_v0, 0.0 }
 0x7f2   :  { %3261 = vrot.lane.b32.xlu1 %v3227_v48, %s3727_s25 }
 0x7f5   :  { %v3192_v7 = vpop.f32.mrf.mxu3 }
 0x7f6   :  { %v3193_v26 = vadd.f32 %v7029_v17, %v3192_v7 }
 0x7f8   :  { %v3228_v16 = vmax.f32 %v3193_v26, 0.0 }
 0x7fa   :  { %3263 = vrot.lane.b32.xlu2 %v3228_v16, %s3727_s25 }
 0x7fd   :  { %v3195_v12 = vpop.f32.mrf.mxu3 }
 0x7fe   :  { %v3196_v14 = vadd.f32 %v7029_v17, %v3195_v12 }
 0x800   :  { %v3229_v62 = vmax.f32 %v3196_v14, 0.0 }
 0x802   :  { %3265 = vrot.lane.b32.xlu0 %v3229_v62, %s3727_s25 }
 0x805   :  { %v3197_v21 = vpop.f32.mrf.mxu3 }
 0x806   :  { %v3198_v57 = vadd.f32 %v7029_v17, %v3197_v21 }
 0x808   :  { %v3230_v11 = vmax.f32 %v3198_v57, 0.0 }
 0x80a   :  { %3267 = vrot.lane.b32.xlu1 %v3230_v11, %s3727_s25 }
 0x80d   :  { %v3200_v41 = vpop.f32.mrf.mxu3 }
 0x80e   :  { %v3201_v44 = vadd.f32 %v7029_v17, %v3200_v41 }
 0x810   :  { %v3231_v30 = vmax.f32 %v3201_v44, 0.0 }
 0x812   :  { %3269 = vrot.lane.b32.xlu2 %v3231_v30, %s3727_s25 }
 0x815   :  { %v3202_v38 = vpop.f32.mrf.mxu3 }
 0x816   :  { %v3203_v61 = vadd.f32 %v7029_v17, %v3202_v38 }
 0x818   :  { %v3232_v18 = vmax.f32 %v3203_v61, 0.0 }
 0x81a   :  { %3271 = vrot.lane.b32.xlu0 %v3232_v18, %s3727_s25 }
 0x82f   :  { %v3112_v24 = vpop.f32.mrf.mxu2 }
 0x830   :  { %v3113_v19 = vadd.f32 %v7001_v58, %v3112_v24 }
 0x832   :  { %v3131_v47 = vmax.f32 %v3113_v19, 0.0 }
 0x833   :  { %v3258_v13 = vpop.permute.xlu2 %3257 }
 0x834   :  { %v3305_v29 = vsel %vm7506_vm2, %v6723_v53, %v3258_v13  ;;  %vm7520_vm2 = vmmov %vm7498_vm0 }
 0x835   :  { %v3322_v1 = vsel %vm3321_vm6, %v3305_v29, 0.0 }
 0x836   :  { %3338 = vst [vmem:[#allocation2] sm:$0xff] %v3322_v1 }
 0x837   :  { %v3114_v49 = vpop.f32.mrf.mxu2 }
 0x838   :  { %v3115_v6 = vadd.f32 %v7001_v58, %v3114_v49 }
 0x83a   :  { %v3132_v20 = vmax.f32 %v3115_v6, 0.0 }
 0x83c   :  { %v3147_v51 = vpack.c.bf16 %v3132_v20, %v3131_v47 }
 0x83e   :  { %3423 = vmatmul.msk.bf16.gmra.mxu3 %vm3151_vm5, %v3147_v51  ;;  %vm7517_vm5 = vmmov %vm7498_vm0 }
 0x843   :  { %v3205_v22 = vpop.f32.mrf.mxu3 }
 0x844   :  { %v3206_v33 = vadd.f32 %v7029_v17, %v3205_v22 }
 0x846   :  { %v3233_v45 = vmax.f32 %v3206_v33, 0.0 }
 0x848   :  { %3273 = vrot.lane.b32.xlu1 %v3233_v45, %s3727_s25 }
 0x84b   :  { %v3207_v53 = vpop.f32.mrf.mxu3 }
 0x84c   :  { %v3208_v4 = vadd.f32 %v7029_v17, %v3207_v53 }
 0x84e   :  { %v3234_v36 = vmax.f32 %v3208_v4, 0.0 }
 0x850   :  { %3275 = vrot.lane.b32.xlu2 %v3234_v36, %s3727_s25 }
 0x853   :  { %v3260_v23 = vpop.permute.xlu0 %3259 }
 0x854   :  { %v3306_v58 = vsel %vm7507_vm3, %v6728_v40, %v3260_v23  ;;  %v3264_v56 = vpop.permute.xlu2 %3263 }
 0x855   :  { %v3323_v25 = vsel %vm3321_vm6, %v3306_v58, 0.0  ;;  %v3308_v59 = vsel %vm7508_vm7, %v6807_v32, %v3264_v56 }
 0x856   :  { %3339 = vst [vmem:[#allocation2 + $0x8] sm:$0xff] %v3323_v25  ;;  %v3325_v9 = vsel %vm3321_vm6, %v3308_v59, 0.0  ;;  %v3210_v42 = vpop.f32.mrf.mxu3 }
 0x857   :  { %3341 = vst [vmem:[#allocation2 + $0x18] sm:$0xff] %v3325_v9  ;;  %v3211_v27 = vadd.f32 %v7029_v17, %v3210_v42 }
 0x859   :  { %v3235_v52 = vmax.f32 %v3211_v27, 0.0 }
 0x85b   :  { %3277 = vrot.lane.b32.xlu0 %v3235_v52, %s3727_s25 }
 0x85e   :  { %v3212_v2 = vpop.f32.mrf.mxu3 }
 0x85f   :  { %v3213_v39 = vadd.f32 %v7029_v17, %v3212_v2 }
 0x861   :  { %v3236_v40 = vmax.f32 %v3213_v39, 0.0 }
 0x863   :  { %3279 = vrot.lane.b32.xlu1 %v3236_v40, %s3727_s25 }
 0x864   :  { %v3262_v28 = vpop.permute.xlu1 %3261 }
 0x865   :  { %v3307_v32 = vsel %vm7509_vm1, %v6802_v46, %v3262_v28 }
 0x866   :  { %v3324_v63 = vsel %vm3321_vm6, %v3307_v32, 0.0  ;;  %v3215_v31 = vpop.f32.mrf.mxu3 }
 0x867   :  { %3340 = vst [vmem:[#allocation2 + $0x10] sm:$0xff] %v3324_v63  ;;  %v3216_v5 = vadd.f32 %v7029_v17, %v3215_v31 }
 0x869   :  { %v3237_v0 = vmax.f32 %v3216_v5, 0.0 }
 0x86b   :  { %3281 = vrot.lane.b32.xlu2 %v3237_v0, %s3727_s25 }
 0x86c   :  { %v3270_v48 = vpop.permute.xlu2 %3269 }
 0x86d   :  { %v3311_v7 = vsel %vm7510_vm8, %v6866_v10, %v3270_v48 }
 0x86e   :  { %v3328_v26 = vsel %vm3321_vm6, %v3311_v7, 0.0  ;;  %v3217_v16 = vpop.f32.mrf.mxu3 }
 0x86f   :  { %3344 = vst [vmem:[#allocation2 + $0x30] sm:$0xff] %v3328_v26  ;;  %v3218_v12 = vadd.f32 %v7029_v17, %v3217_v16 }
 0x871   :  { %v3238_v46 = vmax.f32 %v3218_v12, 0.0 }
 0x873   :  { %3283 = vrot.lane.b32.xlu0 %v3238_v46, %s3727_s25 }
 0x874   :  { %v3266_v14 = vpop.permute.xlu0 %3265 }
 0x875   :  { %v3309_v62 = vsel %vm7511_vm14, %v6844_v55, %v3266_v14 }
 0x876   :  { %v3326_v21 = vsel %vm3321_vm6, %v3309_v62, 0.0 }
 0x877   :  { %3342 = vst [vmem:[#allocation2 + $0x20] sm:$0xff] %v3326_v21 }
 0x87c   :  { %v3268_v57 = vpop.permute.xlu1 %3267 }
 0x87d   :  { %v3310_v10 = vsel %vm7498_vm0, %v6849_v8, %v3268_v57 }
 0x87e   :  { %v3327_v11 = vsel %vm3321_vm6, %v3310_v10, 0.0 }
 0x87f   :  { %3343 = vst [vmem:[#allocation2 + $0x28] sm:$0xff] %v3327_v11 }
 0x88c   :  { %v3272_v41 = vpop.permute.xlu0 %3271 }
 0x88d   :  { %v3312_v44 = vsel %vm7512_vm12, %v6871_v35, %v3272_v41 }
 0x88e   :  { %v3329_v30 = vsel %vm3321_vm6, %v3312_v44, 0.0 }
 0x88f   :  { %3345 = vst [vmem:[#allocation2 + $0x38] sm:$0xff] %v3329_v30 }
 0x8aa   :  { %v3276_v38 = vpop.permute.xlu2 %3275 }
 0x8ab   :  { %v3314_v55 = vsel %vm7513_vm4, %v6892_v3, %v3276_v38 }
 0x8ac   :  { %v3331_v61 = vsel %vm3321_vm6, %v3314_v55, 0.0 }
 0x8ad   :  { %3347 = vst [vmem:[#allocation2 + $0x48] sm:$0xff] %v3331_v61 }
 0x8ba   :  { %v3274_v18 = vpop.permute.xlu1 %3273 }
 0x8bb   :  { %v3313_v8 = vsel %vm7514_vm15, %v6887_v34, %v3274_v18 }
 0x8bc   :  { %v3330_v24 = vsel %vm3321_vm6, %v3313_v8, 0.0 }
 0x8bd   :  { %3346 = vst [vmem:[#allocation2 + $0x40] sm:$0xff] %v3330_v24 }
 0x8c1   :  { %v3220_v13 = vpop.f32.mrf.mxu3 }
 0x8c2   :  { %v3221_v35 = vadd.f32 %v7029_v17, %v3220_v13 }
 0x8c4   :  { %v3239_v29 = vmax.f32 %v3221_v35, 0.0 }
 0x8c5   :  { %v3282_v1 = vpop.permute.xlu2 %3281 }
 0x8c6   :  { %v3317_v19 = vsel %vm7515_vm13, %v6926_v54, %v3282_v1  ;;  %3285 = vrot.lane.b32.xlu1 %v3239_v29, %s3727_s25 }
 0x8c7   :  { %v3334_v3 = vsel %vm3321_vm6, %v3317_v19, 0.0 }
 0x8c8   :  { %3350 = vst [vmem:[#allocation2 + $0x60] sm:$0xff] %v3334_v3 }
 0x8c9   :  { %v3222_v49 = vpop.f32.mrf.mxu3 }
 0x8ca   :  { %v3223_v6 = vadd.f32 %v7029_v17, %v3222_v49 }
 0x8cc   :  { %v3240_v34 = vmax.f32 %v3223_v6, 0.0 }
 0x8cd   :  { %v3278_v47 = vpop.permute.xlu0 %3277 }
 0x8ce   :  { %v3315_v20 = vsel %vm7516_vm9, %v6905_v37, %v3278_v47  ;;  %3287 = vrot.lane.b32.xlu2 %v3240_v34, %s3727_s25  ;;  %s3358_s25 = sshll.u32 %s3729_s5, 4  ;;  %s3359_s25 = int_to_ptr.vmem [resolvable:$true] %s3358_s25 }
 0x8cf   :  { %v3332_v51 = vsel %vm3321_vm6, %v3315_v20, 0.0 }
 0x8d0   :  { %3348 = vst [vmem:[#allocation2 + $0x50] sm:$0xff] %v3332_v51 }
 0x8d5   :  { %v3280_v22 = vpop.permute.xlu1 %3279 }
 0x8d6   :  { %v3316_v54 = vsel %vm7517_vm5, %v6910_v15, %v3280_v22 }
 0x8d7   :  { %v3333_v33 = vsel %vm3321_vm6, %v3316_v54, 0.0 }
 0x8d8   :  { %3349 = vst [vmem:[#allocation2 + $0x58] sm:$0xff] %v3333_v33 }
 0x8e5   :  { %v3284_v45 = vpop.permute.xlu0 %3283 }
 0x8e6   :  { %v3318_v17 = vsel %vm7518_vm11, %v6931_v60, %v3284_v45 }
 0x8e7   :  { %v3335_v53 = vsel %vm3321_vm6, %v3318_v17, 0.0 }
 0x8e8   :  { %3351 = vst [vmem:[#allocation2 + $0x68] sm:$0xff] %v3335_v53 }
 0x928   :  { %v3288_v37 = vpop.permute.xlu2 %3287 }
 0x929   :  { %v3320_v4 = vsel %vm7519_vm10, %v6974_v50, %v3288_v37 }
 0x92a   :  { %v3337_v36 = vsel %vm3321_vm6, %v3320_v4, 0.0 }
 0x92b   :  { %3353 = vst [vmem:[#allocation2 + $0x78] sm:$0xff] %v3337_v36 }
 0x938   :  { %v3286_v15 = vpop.permute.xlu1 %3285 }
 0x939   :  { %v3319_v60 = vsel %vm7520_vm2, %v6969_v43, %v3286_v15 }
 0x93a   :  { %v3336_v23 = vsel %vm3321_vm6, %v3319_v60, 0.0 }
 0x93b   :  { %3352 = vst [vmem:[#allocation2 + $0x70] sm:$0xff] %v3336_v23 }
 0x93c   :  { %3366 = dma.vmem_to_hbm [thread:$0]  %s3359_s25, 2048, %s3361_s16, [#allocation3], %s3730_s1, %s3730_s1, %s3731_s18  }
 0x93d   :  { %3724 = dma.done.wait [#allocation3], 2048  }
 0x93e   :  { %3725 = vsyncadd [#allocation3], 4294965248 }
 0x93f   :  { %3371 = vsyncpa [#allocation3], 1 }

</bundles_post_ra>
